<compile_context>
chip_gen: v7x
topology: tpu7x:2x2x1
jax: 0.10.0
libtpu: 0.0.40
codegen_flags: <defaults>
</compile_context>

<pallas_src>
import math

import jax
import jax.numpy as jnp
from jax.experimental import pallas as pl
from jax.experimental.pallas import tpu as pltpu


_LN_EPS = 1e-5
_NEG_INF = -1e9


def _gelu_new(x):
    # GPT-2 tanh approximation of GELU (f32 math).
    c = math.sqrt(2.0 / math.pi)
    return 0.5 * x * (1.0 + jnp.tanh(c * (x + 0.044715 * x * x * x)))


def _largest_divisor_leq(n, cap):
    cap = int(max(1, min(n, cap)))
    for c in range(cap, 0, -1):
        if n % c == 0:
            return c
    return 1


def _make_kernel(S, H, n_head):
    d = H // n_head
    assert n_head * d == H
    scale = 1.0 / math.sqrt(d)
    FF = 4 * H

    # Head-group size: bound the (G, S, S) f32 score block to ~8 MiB of VMEM.
    g_cap = max(1, (8 * 1024 * 1024) // (S * S * 4))
    G = _largest_divisor_leq(n_head, g_cap)

    # MLP column-chunk: bounds the (S, C) gelu intermediate.
    C = _largest_divisor_leq(FF, 1024)

    def layernorm(v, g, b):  # f32 in, f32 out
        mu = jnp.mean(v, axis=-1, keepdims=True)
        var = jnp.mean((v - mu) ** 2, axis=-1, keepdims=True)
        return (v - mu) * jax.lax.rsqrt(var + _LN_EPS) * g + b

    def kernel(x_ref,
               ln1g_ref, ln1b_ref,
               wqkv_ref, bqkv_ref,
               wo_ref, bo_ref,
               ln2g_ref, ln2b_ref,
               wfc_ref, bfc_ref,
               wpr_ref, bpr_ref,
               o_ref,
               q_s, k_s, v_s, attn_s):
        x = x_ref[0].astype(jnp.float32)                       # (S, H) f32 residual stream

        # ---------------- attention branch ----------------
        h1 = layernorm(x, ln1g_ref[0], ln1b_ref[0]).astype(jnp.bfloat16)
        qkv = jnp.dot(h1, wqkv_ref[...],
                      preferred_element_type=jnp.float32) + bqkv_ref[0]    # (S, 3H) f32

        q2 = qkv[:, 0:H] * scale          # fold 1/sqrt(d) into q once
        k2 = qkv[:, H:2 * H]
        v2 = qkv[:, 2 * H:3 * H]
        # Stage heads as (n_head, S, d) bf16 in VMEM scratch (no lane concatenate later).
        for hh in range(n_head):
            q_s[hh] = q2[:, hh * d:(hh + 1) * d].astype(jnp.bfloat16)
            k_s[hh] = k2[:, hh * d:(hh + 1) * d].astype(jnp.bfloat16)
            v_s[hh] = v2[:, hh * d:(hh + 1) * d].astype(jnp.bfloat16)

        # Causal mask as an additive bias, built once.
        row = jax.lax.broadcasted_iota(jnp.int32, (S, S), 0)
        col = jax.lax.broadcasted_iota(jnp.int32, (S, S), 1)
        bias = jnp.where(col <= row, 0.0, _NEG_INF).astype(jnp.float32)    # (S, S)

        # TODO(synk): flash-style K/V streaming with a query-tile grid axis for very long S;
        # here score memory is bounded by the head-group size G instead.
        for g0 in range(0, n_head, G):
            qg = q_s[pl.ds(g0, G), :, :]                       # (G, S, d) bf16
            kg = k_s[pl.ds(g0, G), :, :]
            vg = v_s[pl.ds(g0, G), :, :]
            s = jnp.einsum('hqd,hkd->hqk', qg, kg,
                           preferred_element_type=jnp.float32)             # (G, S, S) f32
            s = s + bias[None, :, :]
            m = jnp.max(s, axis=-1, keepdims=True)
            p = jnp.exp(s - m)
            l = jnp.sum(p, axis=-1, keepdims=True)
            inv = pl.reciprocal(l, approx=True)                # EUP slot, ~free
            ctx = jnp.einsum('hqk,hkd->hqd', p.astype(jnp.bfloat16), vg,
                             preferred_element_type=jnp.float32)           # (G, S, d) f32
            ctx = ctx * inv                                    # normalize once, in f32
            for gg in range(G):
                hh = g0 + gg
                attn_s[:, hh * d:(hh + 1) * d] = ctx[gg].astype(jnp.bfloat16)

        attn = jnp.dot(attn_s[...], wo_ref[...],
                       preferred_element_type=jnp.float32) + bo_ref[0]     # (S, H) f32
        x1 = x + attn

        # ---------------- MLP branch (column-chunked) ----------------
        h2 = layernorm(x1, ln2g_ref[0], ln2b_ref[0]).astype(jnp.bfloat16)
        acc = jnp.zeros((S, H), jnp.float32)
        for c0 in range(0, FF, C):
            ffc = jnp.dot(h2, wfc_ref[:, c0:c0 + C],
                          preferred_element_type=jnp.float32) + bfc_ref[0, c0:c0 + C]
            ffc = _gelu_new(ffc).astype(jnp.bfloat16)          # gelu in f32, cast at matmul boundary
            acc = acc + jnp.dot(ffc, wpr_ref[pl.ds(c0, C), :],
                                preferred_element_type=jnp.float32)

        o_ref[0] = (x1 + acc + bpr_ref[0]).astype(o_ref.dtype)

    return kernel


def _weight_spec(shape, single_buffer):
    if single_buffer:
        # Constant-index weight blocks: single-buffer to halve their VMEM footprint.
        return pl.BlockSpec(shape, lambda b: (0, 0), pipeline_mode=pl.Buffered(1))
    return pl.BlockSpec(shape, lambda b: (0, 0))


def gpt2_layer_pallas(x, params, n_head, *, single_buffer_weights=True):
    B, S, H = x.shape
    d = H // n_head
    kernel = _make_kernel(S, H, n_head)

    bf16 = jnp.bfloat16
    # Matmul weights live in bf16 (MXU-native); biases / LN params stay f32.
    w_qkv = params["w_qkv"].astype(bf16)
    w_o = params["w_attn_proj"].astype(bf16)
    w_fc = params["w_fc"].astype(bf16)
    w_pr = params["w_mlp_proj"].astype(bf16)

    small = lambda shape: pl.BlockSpec(shape, lambda b: (0, 0))
    wspec = lambda shape: _weight_spec(shape, single_buffer_weights)

    in_specs = [
        pl.BlockSpec((1, S, H), lambda b: (b, 0, 0)),   # x
        small((1, H)), small((1, H)),                   # ln1 gamma, beta
        wspec((H, 3 * H)), small((1, 3 * H)),           # c_attn W, b
        wspec((H, H)), small((1, H)),                   # attn c_proj W, b
        small((1, H)), small((1, H)),                   # ln2 gamma, beta
        wspec((H, 4 * H)), small((1, 4 * H)),           # c_fc W, b
        wspec((4 * H, H)), small((1, H)),               # mlp c_proj W, b
    ]
    out_spec = pl.BlockSpec((1, S, H), lambda b: (b, 0, 0))

    scratch_shapes = [
        pltpu.VMEM((n_head, S, d), bf16),   # q heads
        pltpu.VMEM((n_head, S, d), bf16),   # k heads
        pltpu.VMEM((n_head, S, d), bf16),   # v heads
        pltpu.VMEM((S, H), bf16),           # attention output (pre c_proj)
    ]

    return pl.pallas_call(
        kernel,
        out_shape=jax.ShapeDtypeStruct((B, S, H), x.dtype),
        grid_spec=pltpu.PrefetchScalarGridSpec(
            num_scalar_prefetch=0,
            grid=(B,),
            in_specs=in_specs,
            out_specs=out_spec,
            scratch_shapes=scratch_shapes,
        ),
        compiler_params=pltpu.CompilerParams(
            dimension_semantics=("parallel",),
            vmem_limit_bytes=64 * 1024 * 1024,
        ),
    )(
        x,
        params["ln1_g"], params["ln1_b"],
        w_qkv, params["b_qkv"],
        w_o, params["b_attn_proj"],
        params["ln2_g"], params["ln2_b"],
        w_fc, params["b_fc"],
        w_pr, params["b_mlp_proj"],
    )


def init_params(key, H, initializer_range=0.02):
    ks = jax.random.split(key, 4)
    f32 = jnp.float32
    return {
        # LayerNorm: weight=1, bias=0 (matches _init_weights)
        "ln1_g": jnp.ones((1, H), f32),
        "ln1_b": jnp.zeros((1, H), f32),
        "ln2_g": jnp.ones((1, H), f32),
        "ln2_b": jnp.zeros((1, H), f32),
        # Conv1D weights: normal(0, initializer_range), biases zero.
        "w_qkv": initializer_range * jax.random.normal(ks[0], (H, 3 * H), f32),
        "b_qkv": jnp.zeros((1, 3 * H), f32),
        "w_attn_proj": initializer_range * jax.random.normal(ks[1], (H, H), f32),
        "b_attn_proj": jnp.zeros((1, H), f32),
        "w_fc": initializer_range * jax.random.normal(ks[2], (H, 4 * H), f32),
        "b_fc": jnp.zeros((1, 4 * H), f32),
        "w_mlp_proj": initializer_range * jax.random.normal(ks[3], (4 * H, H), f32),
        "b_mlp_proj": jnp.zeros((1, H), f32),
    }


def gpt2_layer_ref(x, params, n_head):
    """Pure-JAX f32 reference for correctness checking."""
    B, S, H = x.shape
    d = H // n_head

    def ln(v, g, b):
        mu = jnp.mean(v, axis=-1, keepdims=True)
        var = jnp.mean((v - mu) ** 2, axis=-1, keepdims=True)
        return (v - mu) * jax.lax.rsqrt(var + _LN_EPS) * g + b

    h = ln(x, params["ln1_g"][0], params["ln1_b"][0])
    qkv = h @ params["w_qkv"] + params["b_qkv"][0]
    q, k, v = jnp.split(qkv, 3, axis=-1)
    to_heads = lambda t: t.reshape(B, S, n_head, d).transpose(0, 2, 1, 3)
    q, k, v = to_heads(q), to_heads(k), to_heads(v)
    s = jnp.einsum('bhqd,bhkd->bhqk', q, k) / math.sqrt(d)
    mask = jnp.tril(jnp.ones((S, S), bool))
    s = jnp.where(mask[None, None], s, _NEG_INF)
    p = jax.nn.softmax(s, axis=-1)
    ctx = jnp.einsum('bhqk,bhkd->bhqd', p, v).transpose(0, 2, 1, 3).reshape(B, S, H)
    x1 = x + ctx @ params["w_attn_proj"] + params["b_attn_proj"][0]
    h2 = ln(x1, params["ln2_g"][0], params["ln2_b"][0])
    ff = _gelu_new(h2 @ params["w_fc"] + params["b_fc"][0])
    return x1 + ff @ params["w_mlp_proj"] + params["b_mlp_proj"][0]


if __name__ == "__main__":
    # Small, lane-dense test config (H multiple of 128 so output stores are unmasked).
    B, S, H, n_head = 2, 16, 128, 4

    key = jax.random.PRNGKey(0)
    k_x, k_p = jax.random.split(key)
    x = jax.random.normal(k_x, (B, S, H), jnp.float32)
    params = init_params(k_p, H)

    try:
        out = gpt2_layer_pallas(x, params, n_head, single_buffer_weights=True)
        out = jax.block_until_ready(out)
    except Exception:
        # Fallback for JAX builds without single-buffer pipeline_mode support.
        out = gpt2_layer_pallas(x, params, n_head, single_buffer_weights=False)
        out = jax.block_until_ready(out)

    ref = gpt2_layer_ref(x, params, n_head)
    err = float(jnp.max(jnp.abs(out - ref)))
    assert out.shape == (B, S, H) and out.dtype == jnp.float32
    assert err < 5e-2, f"max abs err vs f32 reference: {err}"
    print("KERNEL_OK")
</pallas_src>

<mosaic_0001>
module attributes {stable_mosaic.version = 11 : i64} {
  func.func @kernel(%arg0: i32, %arg1: memref<1x16x128xf32, #tpu.memory_space<vmem>>, %arg2: memref<1x128xf32, #tpu.memory_space<vmem>>, %arg3: memref<1x128xf32, #tpu.memory_space<vmem>>, %arg4: memref<128x384xbf16, #tpu.memory_space<vmem>>, %arg5: memref<1x384xf32, #tpu.memory_space<vmem>>, %arg6: memref<128x128xbf16, #tpu.memory_space<vmem>>, %arg7: memref<1x128xf32, #tpu.memory_space<vmem>>, %arg8: memref<1x128xf32, #tpu.memory_space<vmem>>, %arg9: memref<1x128xf32, #tpu.memory_space<vmem>>, %arg10: memref<128x512xbf16, #tpu.memory_space<vmem>>, %arg11: memref<1x512xf32, #tpu.memory_space<vmem>>, %arg12: memref<512x128xbf16, #tpu.memory_space<vmem>>, %arg13: memref<1x128xf32, #tpu.memory_space<vmem>>, %arg14: memref<1x16x128xf32, #tpu.memory_space<vmem>>, %arg15: memref<4x16x32xbf16, #tpu.memory_space<vmem>>, %arg16: memref<4x16x32xbf16, #tpu.memory_space<vmem>>, %arg17: memref<4x16x32xbf16, #tpu.memory_space<vmem>>, %arg18: memref<16x128xbf16, #tpu.memory_space<vmem>>) attributes {dimension_semantics = [#tpu.dimension_semantics<parallel>], iteration_bounds = array<i64: 2>, scalar_prefetch = 0 : i64, scratch_operands = 4 : i64, tpu.core_type = #tpu.core_type<tc>, window_params = [{transform_indices = @transform_0, window_bounds = array<i64: 1, 16, 128>}, {pipeline_mode = #tpu.pipeline_mode<synchronous>, transform_indices = @transform_1, window_bounds = array<i64: 1, 128>}, {pipeline_mode = #tpu.pipeline_mode<synchronous>, transform_indices = @transform_2, window_bounds = array<i64: 1, 128>}, {pipeline_mode = #tpu.pipeline_mode<synchronous>, transform_indices = @transform_3, window_bounds = array<i64: 128, 384>}, {pipeline_mode = #tpu.pipeline_mode<synchronous>, transform_indices = @transform_4, window_bounds = array<i64: 1, 384>}, {pipeline_mode = #tpu.pipeline_mode<synchronous>, transform_indices = @transform_5, window_bounds = array<i64: 128, 128>}, {pipeline_mode = #tpu.pipeline_mode<synchronous>, transform_indices = @transform_6, window_bounds = array<i64: 1, 128>}, {pipeline_mode = #tpu.pipeline_mode<synchronous>, transform_indices = @transform_7, window_bounds = array<i64: 1, 128>}, {pipeline_mode = #tpu.pipeline_mode<synchronous>, transform_indices = @transform_8, window_bounds = array<i64: 1, 128>}, {pipeline_mode = #tpu.pipeline_mode<synchronous>, transform_indices = @transform_9, window_bounds = array<i64: 128, 512>}, {pipeline_mode = #tpu.pipeline_mode<synchronous>, transform_indices = @transform_10, window_bounds = array<i64: 1, 512>}, {pipeline_mode = #tpu.pipeline_mode<synchronous>, transform_indices = @transform_11, window_bounds = array<i64: 512, 128>}, {pipeline_mode = #tpu.pipeline_mode<synchronous>, transform_indices = @transform_12, window_bounds = array<i64: 1, 128>}, {transform_indices = @transform_13, window_bounds = array<i64: 1, 16, 128>}]} {
    %c0 = arith.constant 0 : index
    %c0_0 = arith.constant 0 : index
    %c0_1 = arith.constant 0 : index
    %0 = vector.load %arg1[%c0, %c0_0, %c0_1] : memref<1x16x128xf32, #tpu.memory_space<vmem>>, vector<1x16x128xf32>
    %1 = vector.shape_cast %0 : vector<1x16x128xf32> to vector<16x128xf32>
    %c0_2 = arith.constant 0 : index
    %c0_3 = arith.constant 0 : index
    %2 = vector.load %arg2[%c0_2, %c0_3] : memref<1x128xf32, #tpu.memory_space<vmem>>, vector<1x128xf32>
    %3 = vector.shape_cast %2 : vector<1x128xf32> to vector<128xf32>
    %c0_4 = arith.constant 0 : index
    %c0_5 = arith.constant 0 : index
    %4 = vector.load %arg3[%c0_4, %c0_5] : memref<1x128xf32, #tpu.memory_space<vmem>>, vector<1x128xf32>
    %5 = vector.shape_cast %4 : vector<1x128xf32> to vector<128xf32>
    %cst = arith.constant dense<0.000000e+00> : vector<16xf32>
    %6 = vector.multi_reduction <add>, %1, %cst [1] : vector<16x128xf32> to vector<16xf32>
    %7 = vector.shape_cast %6 : vector<16xf32> to vector<16x1xf32>
    %cst_6 = arith.constant 1.280000e+02 : f32
    %8 = vector.broadcast %cst_6 : f32 to vector<16x1xf32>
    %9 = arith.divf %7, %8 : vector<16x1xf32>
    %10 = vector.broadcast %9 : vector<16x1xf32> to vector<16x128xf32>
    %11 = arith.subf %1, %10 : vector<16x128xf32>
    %12 = arith.mulf %11, %11 : vector<16x128xf32>
    %cst_7 = arith.constant dense<0.000000e+00> : vector<16xf32>
    %13 = vector.multi_reduction <add>, %12, %cst_7 [1] : vector<16x128xf32> to vector<16xf32>
    %14 = vector.shape_cast %13 : vector<16xf32> to vector<16x1xf32>
    %cst_8 = arith.constant 1.280000e+02 : f32
    %15 = vector.broadcast %cst_8 : f32 to vector<16x1xf32>
    %16 = arith.divf %14, %15 : vector<16x1xf32>
    %17 = vector.broadcast %9 : vector<16x1xf32> to vector<16x128xf32>
    %18 = arith.subf %1, %17 : vector<16x128xf32>
    %cst_9 = arith.constant 9.99999974E-6 : f32
    %19 = vector.broadcast %cst_9 : f32 to vector<16x1xf32>
    %20 = arith.addf %16, %19 : vector<16x1xf32>
    %21 = math.rsqrt %20 : vector<16x1xf32>
    %22 = vector.broadcast %21 : vector<16x1xf32> to vector<16x128xf32>
    %23 = arith.mulf %18, %22 : vector<16x128xf32>
    %24 = vector.shape_cast %3 : vector<128xf32> to vector<1x128xf32>
    %25 = vector.broadcast %24 : vector<1x128xf32> to vector<16x128xf32>
    %26 = arith.mulf %23, %25 : vector<16x128xf32>
    %27 = vector.shape_cast %5 : vector<128xf32> to vector<1x128xf32>
    %28 = vector.broadcast %27 : vector<1x128xf32> to vector<16x128xf32>
    %29 = arith.addf %26, %28 : vector<16x128xf32>
    %30 = arith.truncf %29 : vector<16x128xf32> to vector<16x128xbf16>
    %c0_10 = arith.constant 0 : index
    %c0_11 = arith.constant 0 : index
    %31 = vector.load %arg4[%c0_10, %c0_11] : memref<128x384xbf16, #tpu.memory_space<vmem>>, vector<128x384xbf16>
    %cst_12 = arith.constant dense<0.000000e+00> : vector<16x384xf32>
    %32 = tpu.matmul %30, %31, %cst_12 {dimension_numbers = #tpu.dot_dimension_numbers<[1], [0], [0], [1], [0, 0, 1, 1], [], []>} : vector<16x128xbf16>, vector<128x384xbf16>, vector<16x384xf32> -> vector<16x384xf32>
    %c0_13 = arith.constant 0 : index
    %c0_14 = arith.constant 0 : index
    %33 = vector.load %arg5[%c0_13, %c0_14] : memref<1x384xf32, #tpu.memory_space<vmem>>, vector<1x384xf32>
    %34 = vector.shape_cast %33 : vector<1x384xf32> to vector<384xf32>
    %35 = vector.shape_cast %34 : vector<384xf32> to vector<1x384xf32>
    %36 = vector.broadcast %35 : vector<1x384xf32> to vector<16x384xf32>
    %37 = arith.addf %32, %36 : vector<16x384xf32>
    %38 = vector.extract_strided_slice %37 {offsets = [0, 0], sizes = [16, 128], strides = [1, 1]} : vector<16x384xf32> to vector<16x128xf32>
    %cst_15 = arith.constant 0.176776692 : f32
    %39 = vector.broadcast %cst_15 : f32 to vector<16x128xf32>
    %40 = arith.mulf %38, %39 : vector<16x128xf32>
    %41 = vector.extract_strided_slice %37 {offsets = [0, 128], sizes = [16, 128], strides = [1, 1]} : vector<16x384xf32> to vector<16x128xf32>
    %42 = vector.extract_strided_slice %37 {offsets = [0, 256], sizes = [16, 128], strides = [1, 1]} : vector<16x384xf32> to vector<16x128xf32>
    %43 = vector.extract_strided_slice %40 {offsets = [0, 0], sizes = [16, 32], strides = [1, 1]} : vector<16x128xf32> to vector<16x32xf32>
    %44 = arith.truncf %43 : vector<16x32xf32> to vector<16x32xbf16>
    %c0_16 = arith.constant 0 : index
    %c0_17 = arith.constant 0 : index
    %c0_18 = arith.constant 0 : index
    %45 = vector.load %arg15[%c0_16, %c0_17, %c0_18] : memref<4x16x32xbf16, #tpu.memory_space<vmem>>, vector<1x16x32xbf16>
    %46 = vector.shape_cast %45 : vector<1x16x32xbf16> to vector<16x32xbf16>
    %47 = vector.shape_cast %44 : vector<16x32xbf16> to vector<1x16x32xbf16>
    tpu.vector_store %arg15[%c0_16, %c0_17, %c0_18], %47 {strides = array<i32>} : memref<4x16x32xbf16, #tpu.memory_space<vmem>>, vector<1x16x32xbf16>,
    %48 = vector.extract_strided_slice %41 {offsets = [0, 0], sizes = [16, 32], strides = [1, 1]} : vector<16x128xf32> to vector<16x32xf32>
    %49 = arith.truncf %48 : vector<16x32xf32> to vector<16x32xbf16>
    %c0_19 = arith.constant 0 : index
    %c0_20 = arith.constant 0 : index
    %c0_21 = arith.constant 0 : index
    %50 = vector.load %arg16[%c0_19, %c0_20, %c0_21] : memref<4x16x32xbf16, #tpu.memory_space<vmem>>, vector<1x16x32xbf16>
    %51 = vector.shape_cast %50 : vector<1x16x32xbf16> to vector<16x32xbf16>
    %52 = vector.shape_cast %49 : vector<16x32xbf16> to vector<1x16x32xbf16>
    tpu.vector_store %arg16[%c0_19, %c0_20, %c0_21], %52 {strides = array<i32>} : memref<4x16x32xbf16, #tpu.memory_space<vmem>>, vector<1x16x32xbf16>,
    %53 = vector.extract_strided_slice %42 {offsets = [0, 0], sizes = [16, 32], strides = [1, 1]} : vector<16x128xf32> to vector<16x32xf32>
    %54 = arith.truncf %53 : vector<16x32xf32> to vector<16x32xbf16>
    %c0_22 = arith.constant 0 : index
    %c0_23 = arith.constant 0 : index
    %c0_24 = arith.constant 0 : index
    %55 = vector.load %arg17[%c0_22, %c0_23, %c0_24] : memref<4x16x32xbf16, #tpu.memory_space<vmem>>, vector<1x16x32xbf16>
    %56 = vector.shape_cast %55 : vector<1x16x32xbf16> to vector<16x32xbf16>
    %57 = vector.shape_cast %54 : vector<16x32xbf16> to vector<1x16x32xbf16>
    tpu.vector_store %arg17[%c0_22, %c0_23, %c0_24], %57 {strides = array<i32>} : memref<4x16x32xbf16, #tpu.memory_space<vmem>>, vector<1x16x32xbf16>,
    %58 = vector.extract_strided_slice %40 {offsets = [0, 32], sizes = [16, 32], strides = [1, 1]} : vector<16x128xf32> to vector<16x32xf32>
    %59 = arith.truncf %58 : vector<16x32xf32> to vector<16x32xbf16>
    %c1 = arith.constant 1 : index
    %c0_25 = arith.constant 0 : index
    %c0_26 = arith.constant 0 : index
    %60 = vector.load %arg15[%c1, %c0_25, %c0_26] : memref<4x16x32xbf16, #tpu.memory_space<vmem>>, vector<1x16x32xbf16>
    %61 = vector.shape_cast %60 : vector<1x16x32xbf16> to vector<16x32xbf16>
    %62 = vector.shape_cast %59 : vector<16x32xbf16> to vector<1x16x32xbf16>
    tpu.vector_store %arg15[%c1, %c0_25, %c0_26], %62 {strides = array<i32>} : memref<4x16x32xbf16, #tpu.memory_space<vmem>>, vector<1x16x32xbf16>,
    %63 = vector.extract_strided_slice %41 {offsets = [0, 32], sizes = [16, 32], strides = [1, 1]} : vector<16x128xf32> to vector<16x32xf32>
    %64 = arith.truncf %63 : vector<16x32xf32> to vector<16x32xbf16>
    %c1_27 = arith.constant 1 : index
    %c0_28 = arith.constant 0 : index
    %c0_29 = arith.constant 0 : index
    %65 = vector.load %arg16[%c1_27, %c0_28, %c0_29] : memref<4x16x32xbf16, #tpu.memory_space<vmem>>, vector<1x16x32xbf16>
    %66 = vector.shape_cast %65 : vector<1x16x32xbf16> to vector<16x32xbf16>
    %67 = vector.shape_cast %64 : vector<16x32xbf16> to vector<1x16x32xbf16>
    tpu.vector_store %arg16[%c1_27, %c0_28, %c0_29], %67 {strides = array<i32>} : memref<4x16x32xbf16, #tpu.memory_space<vmem>>, vector<1x16x32xbf16>,
    %68 = vector.extract_strided_slice %42 {offsets = [0, 32], sizes = [16, 32], strides = [1, 1]} : vector<16x128xf32> to vector<16x32xf32>
    %69 = arith.truncf %68 : vector<16x32xf32> to vector<16x32xbf16>
    %c1_30 = arith.constant 1 : index
    %c0_31 = arith.constant 0 : index
    %c0_32 = arith.constant 0 : index
    %70 = vector.load %arg17[%c1_30, %c0_31, %c0_32] : memref<4x16x32xbf16, #tpu.memory_space<vmem>>, vector<1x16x32xbf16>
    %71 = vector.shape_cast %70 : vector<1x16x32xbf16> to vector<16x32xbf16>
    %72 = vector.shape_cast %69 : vector<16x32xbf16> to vector<1x16x32xbf16>
    tpu.vector_store %arg17[%c1_30, %c0_31, %c0_32], %72 {strides = array<i32>} : memref<4x16x32xbf16, #tpu.memory_space<vmem>>, vector<1x16x32xbf16>,
    %73 = vector.extract_strided_slice %40 {offsets = [0, 64], sizes = [16, 32], strides = [1, 1]} : vector<16x128xf32> to vector<16x32xf32>
    %74 = arith.truncf %73 : vector<16x32xf32> to vector<16x32xbf16>
    %c2 = arith.constant 2 : index
    %c0_33 = arith.constant 0 : index
    %c0_34 = arith.constant 0 : index
    %75 = vector.load %arg15[%c2, %c0_33, %c0_34] : memref<4x16x32xbf16, #tpu.memory_space<vmem>>, vector<1x16x32xbf16>
    %76 = vector.shape_cast %75 : vector<1x16x32xbf16> to vector<16x32xbf16>
    %77 = vector.shape_cast %74 : vector<16x32xbf16> to vector<1x16x32xbf16>
    tpu.vector_store %arg15[%c2, %c0_33, %c0_34], %77 {strides = array<i32>} : memref<4x16x32xbf16, #tpu.memory_space<vmem>>, vector<1x16x32xbf16>,
    %78 = vector.extract_strided_slice %41 {offsets = [0, 64], sizes = [16, 32], strides = [1, 1]} : vector<16x128xf32> to vector<16x32xf32>
    %79 = arith.truncf %78 : vector<16x32xf32> to vector<16x32xbf16>
    %c2_35 = arith.constant 2 : index
    %c0_36 = arith.constant 0 : index
    %c0_37 = arith.constant 0 : index
    %80 = vector.load %arg16[%c2_35, %c0_36, %c0_37] : memref<4x16x32xbf16, #tpu.memory_space<vmem>>, vector<1x16x32xbf16>
    %81 = vector.shape_cast %80 : vector<1x16x32xbf16> to vector<16x32xbf16>
    %82 = vector.shape_cast %79 : vector<16x32xbf16> to vector<1x16x32xbf16>
    tpu.vector_store %arg16[%c2_35, %c0_36, %c0_37], %82 {strides = array<i32>} : memref<4x16x32xbf16, #tpu.memory_space<vmem>>, vector<1x16x32xbf16>,
    %83 = vector.extract_strided_slice %42 {offsets = [0, 64], sizes = [16, 32], strides = [1, 1]} : vector<16x128xf32> to vector<16x32xf32>
    %84 = arith.truncf %83 : vector<16x32xf32> to vector<16x32xbf16>
    %c2_38 = arith.constant 2 : index
    %c0_39 = arith.constant 0 : index
    %c0_40 = arith.constant 0 : index
    %85 = vector.load %arg17[%c2_38, %c0_39, %c0_40] : memref<4x16x32xbf16, #tpu.memory_space<vmem>>, vector<1x16x32xbf16>
    %86 = vector.shape_cast %85 : vector<1x16x32xbf16> to vector<16x32xbf16>
    %87 = vector.shape_cast %84 : vector<16x32xbf16> to vector<1x16x32xbf16>
    tpu.vector_store %arg17[%c2_38, %c0_39, %c0_40], %87 {strides = array<i32>} : memref<4x16x32xbf16, #tpu.memory_space<vmem>>, vector<1x16x32xbf16>,
    %88 = vector.extract_strided_slice %40 {offsets = [0, 96], sizes = [16, 32], strides = [1, 1]} : vector<16x128xf32> to vector<16x32xf32>
    %89 = arith.truncf %88 : vector<16x32xf32> to vector<16x32xbf16>
    %c3 = arith.constant 3 : index
    %c0_41 = arith.constant 0 : index
    %c0_42 = arith.constant 0 : index
    %90 = vector.load %arg15[%c3, %c0_41, %c0_42] : memref<4x16x32xbf16, #tpu.memory_space<vmem>>, vector<1x16x32xbf16>
    %91 = vector.shape_cast %90 : vector<1x16x32xbf16> to vector<16x32xbf16>
    %92 = vector.shape_cast %89 : vector<16x32xbf16> to vector<1x16x32xbf16>
    tpu.vector_store %arg15[%c3, %c0_41, %c0_42], %92 {strides = array<i32>} : memref<4x16x32xbf16, #tpu.memory_space<vmem>>, vector<1x16x32xbf16>,
    %93 = vector.extract_strided_slice %41 {offsets = [0, 96], sizes = [16, 32], strides = [1, 1]} : vector<16x128xf32> to vector<16x32xf32>
    %94 = arith.truncf %93 : vector<16x32xf32> to vector<16x32xbf16>
    %c3_43 = arith.constant 3 : index
    %c0_44 = arith.constant 0 : index
    %c0_45 = arith.constant 0 : index
    %95 = vector.load %arg16[%c3_43, %c0_44, %c0_45] : memref<4x16x32xbf16, #tpu.memory_space<vmem>>, vector<1x16x32xbf16>
    %96 = vector.shape_cast %95 : vector<1x16x32xbf16> to vector<16x32xbf16>
    %97 = vector.shape_cast %94 : vector<16x32xbf16> to vector<1x16x32xbf16>
    tpu.vector_store %arg16[%c3_43, %c0_44, %c0_45], %97 {strides = array<i32>} : memref<4x16x32xbf16, #tpu.memory_space<vmem>>, vector<1x16x32xbf16>,
    %98 = vector.extract_strided_slice %42 {offsets = [0, 96], sizes = [16, 32], strides = [1, 1]} : vector<16x128xf32> to vector<16x32xf32>
    %99 = arith.truncf %98 : vector<16x32xf32> to vector<16x32xbf16>
    %c3_46 = arith.constant 3 : index
    %c0_47 = arith.constant 0 : index
    %c0_48 = arith.constant 0 : index
    %100 = vector.load %arg17[%c3_46, %c0_47, %c0_48] : memref<4x16x32xbf16, #tpu.memory_space<vmem>>, vector<1x16x32xbf16>
    %101 = vector.shape_cast %100 : vector<1x16x32xbf16> to vector<16x32xbf16>
    %102 = vector.shape_cast %99 : vector<16x32xbf16> to vector<1x16x32xbf16>
    tpu.vector_store %arg17[%c3_46, %c0_47, %c0_48], %102 {strides = array<i32>} : memref<4x16x32xbf16, #tpu.memory_space<vmem>>, vector<1x16x32xbf16>,
    %103 = tpu.iota {dimensions = array<i32: 0>} : vector<16x16xi32>
    %104 = tpu.iota {dimensions = array<i32: 1>} : vector<16x16xi32>
    %105 = arith.cmpi sle, %104, %103 : vector<16x16xi32>
    %cst_49 = arith.constant 0.000000e+00 : f32
    %cst_50 = arith.constant -1.000000e+09 : f32
    %106 = vector.broadcast %cst_49 : f32 to vector<16x16xf32>
    %107 = vector.broadcast %cst_50 : f32 to vector<16x16xf32>
    %108 = arith.select %105, %106, %107 : vector<16x16xi1>, vector<16x16xf32>
    %c0_51 = arith.constant 0 : index
    %c0_52 = arith.constant 0 : index
    %c0_53 = arith.constant 0 : index
    %109 = vector.load %arg15[%c0_51, %c0_52, %c0_53] : memref<4x16x32xbf16, #tpu.memory_space<vmem>>, vector<4x16x32xbf16>
    %c0_54 = arith.constant 0 : index
    %c0_55 = arith.constant 0 : index
    %c0_56 = arith.constant 0 : index
    %110 = vector.load %arg16[%c0_54, %c0_55, %c0_56] : memref<4x16x32xbf16, #tpu.memory_space<vmem>>, vector<4x16x32xbf16>
    %c0_57 = arith.constant 0 : index
    %c0_58 = arith.constant 0 : index
    %c0_59 = arith.constant 0 : index
    %111 = vector.load %arg17[%c0_57, %c0_58, %c0_59] : memref<4x16x32xbf16, #tpu.memory_space<vmem>>, vector<4x16x32xbf16>
    "tpu.trace_start"() <{level = 10 : i32, message = "hqd,hkd->hqk"}> : () -> ()
    %cst_60 = arith.constant dense<0.000000e+00> : vector<4x16x16xf32>
    %112 = tpu.matmul %109, %110, %cst_60 {dimension_numbers = #tpu.dot_dimension_numbers<[2], [2], [1], [1], [0, 0, 0, 1, 1, 1], [0], [0]>} : vector<4x16x32xbf16>, vector<4x16x32xbf16>, vector<4x16x16xf32> -> vector<4x16x16xf32>
    "tpu.trace_stop"() : () -> ()
    %113 = vector.shape_cast %108 : vector<16x16xf32> to vector<1x16x16xf32>
    %114 = vector.broadcast %113 : vector<1x16x16xf32> to vector<4x16x16xf32>
    %115 = arith.addf %112, %114 : vector<4x16x16xf32>
    %cst_61 = arith.constant dense<0xFF800000> : vector<4x16xf32>
    %116 = vector.multi_reduction <maximumf>, %115, %cst_61 [2] : vector<4x16x16xf32> to vector<4x16xf32>
    %117 = vector.shape_cast %116 : vector<4x16xf32> to vector<4x16x1xf32>
    %118 = vector.broadcast %117 : vector<4x16x1xf32> to vector<4x16x16xf32>
    %119 = arith.subf %115, %118 : vector<4x16x16xf32>
    %120 = math.exp %119 : vector<4x16x16xf32>
    %cst_62 = arith.constant dense<0.000000e+00> : vector<4x16xf32>
    %121 = vector.multi_reduction <add>, %120, %cst_62 [2] : vector<4x16x16xf32> to vector<4x16xf32>
    %122 = vector.shape_cast %121 : vector<4x16xf32> to vector<4x16x1xf32>
    %123 = tpu.reciprocal %122 {approx = true} : vector<4x16x1xf32> -> vector<4x16x1xf32>
    %124 = arith.truncf %120 : vector<4x16x16xf32> to vector<4x16x16xbf16>
    "tpu.trace_start"() <{level = 10 : i32, message = "hqk,hkd->hqd"}> : () -> ()
    %cst_63 = arith.constant dense<0.000000e+00> : vector<4x16x32xf32>
    %125 = tpu.matmul %124, %111, %cst_63 {dimension_numbers = #tpu.dot_dimension_numbers<[2], [1], [1], [2], [0, 0, 0, 1, 1, 2], [0], [0]>} : vector<4x16x16xbf16>, vector<4x16x32xbf16>, vector<4x16x32xf32> -> vector<4x16x32xf32>
    "tpu.trace_stop"() : () -> ()
    %126 = vector.broadcast %123 : vector<4x16x1xf32> to vector<4x16x32xf32>
    %127 = arith.mulf %125, %126 : vector<4x16x32xf32>
    %128 = vector.extract_strided_slice %127 {offsets = [0, 0, 0], sizes = [1, 16, 32], strides = [1, 1, 1]} : vector<4x16x32xf32> to vector<1x16x32xf32>
    %129 = vector.shape_cast %128 : vector<1x16x32xf32> to vector<16x32xf32>
    %130 = arith.truncf %129 : vector<16x32xf32> to vector<16x32xbf16>
    %c0_64 = arith.constant 0 : index
    %c0_65 = arith.constant 0 : index
    %131 = vector.load %arg18[%c0_64, %c0_65] : memref<16x128xbf16, #tpu.memory_space<vmem>>, vector<16x32xbf16>
    tpu.vector_store %arg18[%c0_64, %c0_65], %130 {strides = array<i32>} : memref<16x128xbf16, #tpu.memory_space<vmem>>, vector<16x32xbf16>,
    %132 = vector.extract_strided_slice %127 {offsets = [1, 0, 0], sizes = [1, 16, 32], strides = [1, 1, 1]} : vector<4x16x32xf32> to vector<1x16x32xf32>
    %133 = vector.shape_cast %132 : vector<1x16x32xf32> to vector<16x32xf32>
    %134 = arith.truncf %133 : vector<16x32xf32> to vector<16x32xbf16>
    %c0_66 = arith.constant 0 : index
    %c32 = arith.constant 32 : index
    %135 = vector.load %arg18[%c0_66, %c32] : memref<16x128xbf16, #tpu.memory_space<vmem>>, vector<16x32xbf16>
    tpu.vector_store %arg18[%c0_66, %c32], %134 {strides = array<i32>} : memref<16x128xbf16, #tpu.memory_space<vmem>>, vector<16x32xbf16>,
    %136 = vector.extract_strided_slice %127 {offsets = [2, 0, 0], sizes = [1, 16, 32], strides = [1, 1, 1]} : vector<4x16x32xf32> to vector<1x16x32xf32>
    %137 = vector.shape_cast %136 : vector<1x16x32xf32> to vector<16x32xf32>
    %138 = arith.truncf %137 : vector<16x32xf32> to vector<16x32xbf16>
    %c0_67 = arith.constant 0 : index
    %c64 = arith.constant 64 : index
    %139 = vector.load %arg18[%c0_67, %c64] : memref<16x128xbf16, #tpu.memory_space<vmem>>, vector<16x32xbf16>
    tpu.vector_store %arg18[%c0_67, %c64], %138 {strides = array<i32>} : memref<16x128xbf16, #tpu.memory_space<vmem>>, vector<16x32xbf16>,
    %140 = vector.extract_strided_slice %127 {offsets = [3, 0, 0], sizes = [1, 16, 32], strides = [1, 1, 1]} : vector<4x16x32xf32> to vector<1x16x32xf32>
    %141 = vector.shape_cast %140 : vector<1x16x32xf32> to vector<16x32xf32>
    %142 = arith.truncf %141 : vector<16x32xf32> to vector<16x32xbf16>
    %c0_68 = arith.constant 0 : index
    %c96 = arith.constant 96 : index
    %143 = vector.load %arg18[%c0_68, %c96] : memref<16x128xbf16, #tpu.memory_space<vmem>>, vector<16x32xbf16>
    tpu.vector_store %arg18[%c0_68, %c96], %142 {strides = array<i32>} : memref<16x128xbf16, #tpu.memory_space<vmem>>, vector<16x32xbf16>,
    %c0_69 = arith.constant 0 : index
    %c0_70 = arith.constant 0 : index
    %144 = vector.load %arg18[%c0_69, %c0_70] : memref<16x128xbf16, #tpu.memory_space<vmem>>, vector<16x128xbf16>
    %c0_71 = arith.constant 0 : index
    %c0_72 = arith.constant 0 : index
    %145 = vector.load %arg6[%c0_71, %c0_72] : memref<128x128xbf16, #tpu.memory_space<vmem>>, vector<128x128xbf16>
    %cst_73 = arith.constant dense<0.000000e+00> : vector<16x128xf32>
    %146 = tpu.matmul %144, %145, %cst_73 {dimension_numbers = #tpu.dot_dimension_numbers<[1], [0], [0], [1], [0, 0, 1, 1], [], []>} : vector<16x128xbf16>, vector<128x128xbf16>, vector<16x128xf32> -> vector<16x128xf32>
    %c0_74 = arith.constant 0 : index
    %c0_75 = arith.constant 0 : index
    %147 = vector.load %arg7[%c0_74, %c0_75] : memref<1x128xf32, #tpu.memory_space<vmem>>, vector<1x128xf32>
    %148 = vector.shape_cast %147 : vector<1x128xf32> to vector<128xf32>
    %149 = vector.shape_cast %148 : vector<128xf32> to vector<1x128xf32>
    %150 = vector.broadcast %149 : vector<1x128xf32> to vector<16x128xf32>
    %151 = arith.addf %146, %150 : vector<16x128xf32>
    %152 = arith.addf %1, %151 : vector<16x128xf32>
    %c0_76 = arith.constant 0 : index
    %c0_77 = arith.constant 0 : index
    %153 = vector.load %arg8[%c0_76, %c0_77] : memref<1x128xf32, #tpu.memory_space<vmem>>, vector<1x128xf32>
    %154 = vector.shape_cast %153 : vector<1x128xf32> to vector<128xf32>
    %c0_78 = arith.constant 0 : index
    %c0_79 = arith.constant 0 : index
    %155 = vector.load %arg9[%c0_78, %c0_79] : memref<1x128xf32, #tpu.memory_space<vmem>>, vector<1x128xf32>
    %156 = vector.shape_cast %155 : vector<1x128xf32> to vector<128xf32>
    %cst_80 = arith.constant dense<0.000000e+00> : vector<16xf32>
    %157 = vector.multi_reduction <add>, %152, %cst_80 [1] : vector<16x128xf32> to vector<16xf32>
    %158 = vector.shape_cast %157 : vector<16xf32> to vector<16x1xf32>
    %cst_81 = arith.constant 1.280000e+02 : f32
    %159 = vector.broadcast %cst_81 : f32 to vector<16x1xf32>
    %160 = arith.divf %158, %159 : vector<16x1xf32>
    %161 = vector.broadcast %160 : vector<16x1xf32> to vector<16x128xf32>
    %162 = arith.subf %152, %161 : vector<16x128xf32>
    %163 = arith.mulf %162, %162 : vector<16x128xf32>
    %cst_82 = arith.constant dense<0.000000e+00> : vector<16xf32>
    %164 = vector.multi_reduction <add>, %163, %cst_82 [1] : vector<16x128xf32> to vector<16xf32>
    %165 = vector.shape_cast %164 : vector<16xf32> to vector<16x1xf32>
    %cst_83 = arith.constant 1.280000e+02 : f32
    %166 = vector.broadcast %cst_83 : f32 to vector<16x1xf32>
    %167 = arith.divf %165, %166 : vector<16x1xf32>
    %168 = vector.broadcast %160 : vector<16x1xf32> to vector<16x128xf32>
    %169 = arith.subf %152, %168 : vector<16x128xf32>
    %cst_84 = arith.constant 9.99999974E-6 : f32
    %170 = vector.broadcast %cst_84 : f32 to vector<16x1xf32>
    %171 = arith.addf %167, %170 : vector<16x1xf32>
    %172 = math.rsqrt %171 : vector<16x1xf32>
    %173 = vector.broadcast %172 : vector<16x1xf32> to vector<16x128xf32>
    %174 = arith.mulf %169, %173 : vector<16x128xf32>
    %175 = vector.shape_cast %154 : vector<128xf32> to vector<1x128xf32>
    %176 = vector.broadcast %175 : vector<1x128xf32> to vector<16x128xf32>
    %177 = arith.mulf %174, %176 : vector<16x128xf32>
    %178 = vector.shape_cast %156 : vector<128xf32> to vector<1x128xf32>
    %179 = vector.broadcast %178 : vector<1x128xf32> to vector<16x128xf32>
    %180 = arith.addf %177, %179 : vector<16x128xf32>
    %181 = arith.truncf %180 : vector<16x128xf32> to vector<16x128xbf16>
    %cst_85 = arith.constant 0.000000e+00 : f32
    %182 = vector.broadcast %cst_85 : f32 to vector<16x128xf32>
    %c0_86 = arith.constant 0 : index
    %c0_87 = arith.constant 0 : index
    %183 = vector.load %arg10[%c0_86, %c0_87] : memref<128x512xbf16, #tpu.memory_space<vmem>>, vector<128x512xbf16>
    %cst_88 = arith.constant dense<0.000000e+00> : vector<16x512xf32>
    %184 = tpu.matmul %181, %183, %cst_88 {dimension_numbers = #tpu.dot_dimension_numbers<[1], [0], [0], [1], [0, 0, 1, 1], [], []>} : vector<16x128xbf16>, vector<128x512xbf16>, vector<16x512xf32> -> vector<16x512xf32>
    %c0_89 = arith.constant 0 : index
    %c0_90 = arith.constant 0 : index
    %185 = vector.load %arg11[%c0_89, %c0_90] : memref<1x512xf32, #tpu.memory_space<vmem>>, vector<1x512xf32>
    %186 = vector.shape_cast %185 : vector<1x512xf32> to vector<512xf32>
    %187 = vector.shape_cast %186 : vector<512xf32> to vector<1x512xf32>
    %188 = vector.broadcast %187 : vector<1x512xf32> to vector<16x512xf32>
    %189 = arith.addf %184, %188 : vector<16x512xf32>
    %cst_91 = arith.constant 5.000000e-01 : f32
    %190 = vector.broadcast %cst_91 : f32 to vector<16x512xf32>
    %191 = arith.mulf %190, %189 : vector<16x512xf32>
    %cst_92 = arith.constant 4.471500e-02 : f32
    %192 = vector.broadcast %cst_92 : f32 to vector<16x512xf32>
    %193 = arith.mulf %192, %189 : vector<16x512xf32>
    %194 = arith.mulf %193, %189 : vector<16x512xf32>
    %195 = arith.mulf %194, %189 : vector<16x512xf32>
    %196 = arith.addf %189, %195 : vector<16x512xf32>
    %cst_93 = arith.constant 0.797884583 : f32
    %197 = vector.broadcast %cst_93 : f32 to vector<16x512xf32>
    %198 = arith.mulf %197, %196 : vector<16x512xf32>
    %199 = math.tanh %198 : vector<16x512xf32>
    %cst_94 = arith.constant 1.000000e+00 : f32
    %200 = vector.broadcast %cst_94 : f32 to vector<16x512xf32>
    %201 = arith.addf %200, %199 : vector<16x512xf32>
    %202 = arith.mulf %191, %201 : vector<16x512xf32>
    %203 = arith.truncf %202 : vector<16x512xf32> to vector<16x512xbf16>
    %c0_95 = arith.constant 0 : index
    %c0_96 = arith.constant 0 : index
    %204 = vector.load %arg12[%c0_95, %c0_96] : memref<512x128xbf16, #tpu.memory_space<vmem>>, vector<512x128xbf16>
    %cst_97 = arith.constant dense<0.000000e+00> : vector<16x128xf32>
    %205 = tpu.matmul %203, %204, %cst_97 {dimension_numbers = #tpu.dot_dimension_numbers<[1], [0], [0], [1], [0, 0, 1, 1], [], []>} : vector<16x512xbf16>, vector<512x128xbf16>, vector<16x128xf32> -> vector<16x128xf32>
    %206 = arith.addf %182, %205 : vector<16x128xf32>
    %207 = arith.addf %152, %206 : vector<16x128xf32>
    %c0_98 = arith.constant 0 : index
    %c0_99 = arith.constant 0 : index
    %208 = vector.load %arg13[%c0_98, %c0_99] : memref<1x128xf32, #tpu.memory_space<vmem>>, vector<1x128xf32>
    %209 = vector.shape_cast %208 : vector<1x128xf32> to vector<128xf32>
    %210 = vector.shape_cast %209 : vector<128xf32> to vector<1x128xf32>
    %211 = vector.broadcast %210 : vector<1x128xf32> to vector<16x128xf32>
    %212 = arith.addf %207, %211 : vector<16x128xf32>
    %c0_100 = arith.constant 0 : index
    %c0_101 = arith.constant 0 : index
    %c0_102 = arith.constant 0 : index
    %213 = vector.load %arg14[%c0_100, %c0_101, %c0_102] : memref<1x16x128xf32, #tpu.memory_space<vmem>>, vector<1x16x128xf32>
    %214 = vector.shape_cast %213 : vector<1x16x128xf32> to vector<16x128xf32>
    %215 = vector.shape_cast %212 : vector<16x128xf32> to vector<1x16x128xf32>
    tpu.vector_store %arg14[%c0_100, %c0_101, %c0_102], %215 {strides = array<i32>} : memref<1x16x128xf32, #tpu.memory_space<vmem>>, vector<1x16x128xf32>,
    return
  }
  func.func @transform_0(%arg0: i32) -> (i32, i32, i32) {
    %c0_i32 = arith.constant 0 : i32
    %c0_i32_0 = arith.constant 0 : i32
    %c0_i32_1 = arith.constant 0 : i32
    return %arg0, %c0_i32, %c0_i32_0 : i32, i32, i32
  }
  func.func @transform_1(%arg0: i32) -> (i32, i32) {
    %c0_i32 = arith.constant 0 : i32
    %c0_i32_0 = arith.constant 0 : i32
    %c0_i32_1 = arith.constant 0 : i32
    return %c0_i32, %c0_i32_0 : i32, i32
  }
  func.func @transform_2(%arg0: i32) -> (i32, i32) {
    %c0_i32 = arith.constant 0 : i32
    %c0_i32_0 = arith.constant 0 : i32
    %c0_i32_1 = arith.constant 0 : i32
    return %c0_i32, %c0_i32_0 : i32, i32
  }
  func.func @transform_3(%arg0: i32) -> (i32, i32) {
    %c0_i32 = arith.constant 0 : i32
    %c0_i32_0 = arith.constant 0 : i32
    %c0_i32_1 = arith.constant 0 : i32
    return %c0_i32, %c0_i32_0 : i32, i32
  }
  func.func @transform_4(%arg0: i32) -> (i32, i32) {
    %c0_i32 = arith.constant 0 : i32
    %c0_i32_0 = arith.constant 0 : i32
    %c0_i32_1 = arith.constant 0 : i32
    return %c0_i32, %c0_i32_0 : i32, i32
  }
  func.func @transform_5(%arg0: i32) -> (i32, i32) {
    %c0_i32 = arith.constant 0 : i32
    %c0_i32_0 = arith.constant 0 : i32
    %c0_i32_1 = arith.constant 0 : i32
    return %c0_i32, %c0_i32_0 : i32, i32
  }
  func.func @transform_6(%arg0: i32) -> (i32, i32) {
    %c0_i32 = arith.constant 0 : i32
    %c0_i32_0 = arith.constant 0 : i32
    %c0_i32_1 = arith.constant 0 : i32
    return %c0_i32, %c0_i32_0 : i32, i32
  }
  func.func @transform_7(%arg0: i32) -> (i32, i32) {
    %c0_i32 = arith.constant 0 : i32
    %c0_i32_0 = arith.constant 0 : i32
    %c0_i32_1 = arith.constant 0 : i32
    return %c0_i32, %c0_i32_0 : i32, i32
  }
  func.func @transform_8(%arg0: i32) -> (i32, i32) {
    %c0_i32 = arith.constant 0 : i32
    %c0_i32_0 = arith.constant 0 : i32
    %c0_i32_1 = arith.constant 0 : i32
    return %c0_i32, %c0_i32_0 : i32, i32
  }
  func.func @transform_9(%arg0: i32) -> (i32, i32) {
    %c0_i32 = arith.constant 0 : i32
    %c0_i32_0 = arith.constant 0 : i32
    %c0_i32_1 = arith.constant 0 : i32
    return %c0_i32, %c0_i32_0 : i32, i32
  }
  func.func @transform_10(%arg0: i32) -> (i32, i32) {
    %c0_i32 = arith.constant 0 : i32
    %c0_i32_0 = arith.constant 0 : i32
    %c0_i32_1 = arith.constant 0 : i32
    return %c0_i32, %c0_i32_0 : i32, i32
  }
  func.func @transform_11(%arg0: i32) -> (i32, i32) {
    %c0_i32 = arith.constant 0 : i32
    %c0_i32_0 = arith.constant 0 : i32
    %c0_i32_1 = arith.constant 0 : i32
    return %c0_i32, %c0_i32_0 : i32, i32
  }
  func.func @transform_12(%arg0: i32) -> (i32, i32) {
    %c0_i32 = arith.constant 0 : i32
    %c0_i32_0 = arith.constant 0 : i32
    %c0_i32_1 = arith.constant 0 : i32
    return %c0_i32, %c0_i32_0 : i32, i32
  }
  func.func @transform_13(%arg0: i32) -> (i32, i32, i32) {
    %c0_i32 = arith.constant 0 : i32
    %c0_i32_0 = arith.constant 0 : i32
    %c0_i32_1 = arith.constant 0 : i32
    return %arg0, %c0_i32, %c0_i32_0 : i32, i32, i32
  }
}

module attributes {stable_mosaic.version = 11 : i64} {
  func.func @kernel(%arg0: i32, %arg1: memref<1x16x128xf32, #tpu.memory_space<vmem>>, %arg2: memref<1x128xf32, #tpu.memory_space<vmem>>, %arg3: memref<1x128xf32, #tpu.memory_space<vmem>>, %arg4: memref<128x384xbf16, #tpu.memory_space<vmem>>, %arg5: memref<1x384xf32, #tpu.memory_space<vmem>>, %arg6: memref<128x128xbf16, #tpu.memory_space<vmem>>, %arg7: memref<1x128xf32, #tpu.memory_space<vmem>>, %arg8: memref<1x128xf32, #tpu.memory_space<vmem>>, %arg9: memref<1x128xf32, #tpu.memory_space<vmem>>, %arg10: memref<128x512xbf16, #tpu.memory_space<vmem>>, %arg11: memref<1x512xf32, #tpu.memory_space<vmem>>, %arg12: memref<512x128xbf16, #tpu.memory_space<vmem>>, %arg13: memref<1x128xf32, #tpu.memory_space<vmem>>, %arg14: memref<1x16x128xf32, #tpu.memory_space<vmem>>, %arg15: memref<4x16x32xbf16, #tpu.memory_space<vmem>>, %arg16: memref<4x16x32xbf16, #tpu.memory_space<vmem>>, %arg17: memref<4x16x32xbf16, #tpu.memory_space<vmem>>, %arg18: memref<16x128xbf16, #tpu.memory_space<vmem>>) attributes {dimension_semantics = [#tpu.dimension_semantics<parallel>], iteration_bounds = array<i64: 2>, scalar_prefetch = 0 : i64, scratch_operands = 4 : i64, tpu.core_type = #tpu.core_type<tc>, window_params = [{transform_indices = @transform_0, window_bounds = array<i64: 1, 16, 128>}, {pipeline_mode = #tpu.pipeline_mode<synchronous>, transform_indices = @transform_1, window_bounds = array<i64: 1, 128>}, {pipeline_mode = #tpu.pipeline_mode<synchronous>, transform_indices = @transform_2, window_bounds = array<i64: 1, 128>}, {pipeline_mode = #tpu.pipeline_mode<synchronous>, transform_indices = @transform_3, window_bounds = array<i64: 128, 384>}, {pipeline_mode = #tpu.pipeline_mode<synchronous>, transform_indices = @transform_4, window_bounds = array<i64: 1, 384>}, {pipeline_mode = #tpu.pipeline_mode<synchronous>, transform_indices = @transform_5, window_bounds = array<i64: 128, 128>}, {pipeline_mode = #tpu.pipeline_mode<synchronous>, transform_indices = @transform_6, window_bounds = array<i64: 1, 128>}, {pipeline_mode = #tpu.pipeline_mode<synchronous>, transform_indices = @transform_7, window_bounds = array<i64: 1, 128>}, {pipeline_mode = #tpu.pipeline_mode<synchronous>, transform_indices = @transform_8, window_bounds = array<i64: 1, 128>}, {pipeline_mode = #tpu.pipeline_mode<synchronous>, transform_indices = @transform_9, window_bounds = array<i64: 128, 512>}, {pipeline_mode = #tpu.pipeline_mode<synchronous>, transform_indices = @transform_10, window_bounds = array<i64: 1, 512>}, {pipeline_mode = #tpu.pipeline_mode<synchronous>, transform_indices = @transform_11, window_bounds = array<i64: 512, 128>}, {pipeline_mode = #tpu.pipeline_mode<synchronous>, transform_indices = @transform_12, window_bounds = array<i64: 1, 128>}, {transform_indices = @transform_13, window_bounds = array<i64: 1, 16, 128>}]} {
    %c0 = arith.constant 0 : index
    %c0_0 = arith.constant 0 : index
    %c0_1 = arith.constant 0 : index
    %0 = vector.load %arg1[%c0, %c0_0, %c0_1] : memref<1x16x128xf32, #tpu.memory_space<vmem>>, vector<1x16x128xf32>
    %1 = vector.shape_cast %0 : vector<1x16x128xf32> to vector<16x128xf32>
    %c0_2 = arith.constant 0 : index
    %c0_3 = arith.constant 0 : index
    %2 = vector.load %arg2[%c0_2, %c0_3] : memref<1x128xf32, #tpu.memory_space<vmem>>, vector<1x128xf32>
    %3 = vector.shape_cast %2 : vector<1x128xf32> to vector<128xf32>
    %c0_4 = arith.constant 0 : index
    %c0_5 = arith.constant 0 : index
    %4 = vector.load %arg3[%c0_4, %c0_5] : memref<1x128xf32, #tpu.memory_space<vmem>>, vector<1x128xf32>
    %5 = vector.shape_cast %4 : vector<1x128xf32> to vector<128xf32>
    %cst = arith.constant dense<0.000000e+00> : vector<16xf32>
    %6 = vector.multi_reduction <add>, %1, %cst [1] : vector<16x128xf32> to vector<16xf32>
    %7 = vector.shape_cast %6 : vector<16xf32> to vector<16x1xf32>
    %cst_6 = arith.constant 1.280000e+02 : f32
    %8 = vector.broadcast %cst_6 : f32 to vector<16x1xf32>
    %9 = arith.divf %7, %8 : vector<16x1xf32>
    %10 = vector.broadcast %9 : vector<16x1xf32> to vector<16x128xf32>
    %11 = arith.subf %1, %10 : vector<16x128xf32>
    %12 = arith.mulf %11, %11 : vector<16x128xf32>
    %cst_7 = arith.constant dense<0.000000e+00> : vector<16xf32>
    %13 = vector.multi_reduction <add>, %12, %cst_7 [1] : vector<16x128xf32> to vector<16xf32>
    %14 = vector.shape_cast %13 : vector<16xf32> to vector<16x1xf32>
    %cst_8 = arith.constant 1.280000e+02 : f32
    %15 = vector.broadcast %cst_8 : f32 to vector<16x1xf32>
    %16 = arith.divf %14, %15 : vector<16x1xf32>
    %17 = vector.broadcast %9 : vector<16x1xf32> to vector<16x128xf32>
    %18 = arith.subf %1, %17 : vector<16x128xf32>
    %cst_9 = arith.constant 9.99999974E-6 : f32
    %19 = vector.broadcast %cst_9 : f32 to vector<16x1xf32>
    %20 = arith.addf %16, %19 : vector<16x1xf32>
    %21 = math.rsqrt %20 : vector<16x1xf32>
    %22 = vector.broadcast %21 : vector<16x1xf32> to vector<16x128xf32>
    %23 = arith.mulf %18, %22 : vector<16x128xf32>
    %24 = vector.shape_cast %3 : vector<128xf32> to vector<1x128xf32>
    %25 = vector.broadcast %24 : vector<1x128xf32> to vector<16x128xf32>
    %26 = arith.mulf %23, %25 : vector<16x128xf32>
    %27 = vector.shape_cast %5 : vector<128xf32> to vector<1x128xf32>
    %28 = vector.broadcast %27 : vector<1x128xf32> to vector<16x128xf32>
    %29 = arith.addf %26, %28 : vector<16x128xf32>
    %30 = arith.truncf %29 : vector<16x128xf32> to vector<16x128xbf16>
    %c0_10 = arith.constant 0 : index
    %c0_11 = arith.constant 0 : index
    %31 = vector.load %arg4[%c0_10, %c0_11] : memref<128x384xbf16, #tpu.memory_space<vmem>>, vector<128x384xbf16>
    %cst_12 = arith.constant dense<0.000000e+00> : vector<16x384xf32>
    %32 = tpu.matmul %30, %31, %cst_12 {dimension_numbers = #tpu.dot_dimension_numbers<[1], [0], [0], [1], [0, 0, 1, 1], [], []>} : vector<16x128xbf16>, vector<128x384xbf16>, vector<16x384xf32> -> vector<16x384xf32>
    %c0_13 = arith.constant 0 : index
    %c0_14 = arith.constant 0 : index
    %33 = vector.load %arg5[%c0_13, %c0_14] : memref<1x384xf32, #tpu.memory_space<vmem>>, vector<1x384xf32>
    %34 = vector.shape_cast %33 : vector<1x384xf32> to vector<384xf32>
    %35 = vector.shape_cast %34 : vector<384xf32> to vector<1x384xf32>
    %36 = vector.broadcast %35 : vector<1x384xf32> to vector<16x384xf32>
    %37 = arith.addf %32, %36 : vector<16x384xf32>
    %38 = vector.extract_strided_slice %37 {offsets = [0, 0], sizes = [16, 128], strides = [1, 1]} : vector<16x384xf32> to vector<16x128xf32>
    %cst_15 = arith.constant 0.176776692 : f32
    %39 = vector.broadcast %cst_15 : f32 to vector<16x128xf32>
    %40 = arith.mulf %38, %39 : vector<16x128xf32>
    %41 = vector.extract_strided_slice %37 {offsets = [0, 128], sizes = [16, 128], strides = [1, 1]} : vector<16x384xf32> to vector<16x128xf32>
    %42 = vector.extract_strided_slice %37 {offsets = [0, 256], sizes = [16, 128], strides = [1, 1]} : vector<16x384xf32> to vector<16x128xf32>
    %43 = vector.extract_strided_slice %40 {offsets = [0, 0], sizes = [16, 32], strides = [1, 1]} : vector<16x128xf32> to vector<16x32xf32>
    %44 = arith.truncf %43 : vector<16x32xf32> to vector<16x32xbf16>
    %c0_16 = arith.constant 0 : index
    %c0_17 = arith.constant 0 : index
    %c0_18 = arith.constant 0 : index
    %45 = vector.load %arg15[%c0_16, %c0_17, %c0_18] : memref<4x16x32xbf16, #tpu.memory_space<vmem>>, vector<1x16x32xbf16>
    %46 = vector.shape_cast %45 : vector<1x16x32xbf16> to vector<16x32xbf16>
    %47 = vector.shape_cast %44 : vector<16x32xbf16> to vector<1x16x32xbf16>
    tpu.vector_store %arg15[%c0_16, %c0_17, %c0_18], %47 {strides = array<i32>} : memref<4x16x32xbf16, #tpu.memory_space<vmem>>, vector<1x16x32xbf16>,
    %48 = vector.extract_strided_slice %41 {offsets = [0, 0], sizes = [16, 32], strides = [1, 1]} : vector<16x128xf32> to vector<16x32xf32>
    %49 = arith.truncf %48 : vector<16x32xf32> to vector<16x32xbf16>
    %c0_19 = arith.constant 0 : index
    %c0_20 = arith.constant 0 : index
    %c0_21 = arith.constant 0 : index
    %50 = vector.load %arg16[%c0_19, %c0_20, %c0_21] : memref<4x16x32xbf16, #tpu.memory_space<vmem>>, vector<1x16x32xbf16>
    %51 = vector.shape_cast %50 : vector<1x16x32xbf16> to vector<16x32xbf16>
    %52 = vector.shape_cast %49 : vector<16x32xbf16> to vector<1x16x32xbf16>
    tpu.vector_store %arg16[%c0_19, %c0_20, %c0_21], %52 {strides = array<i32>} : memref<4x16x32xbf16, #tpu.memory_space<vmem>>, vector<1x16x32xbf16>,
    %53 = vector.extract_strided_slice %42 {offsets = [0, 0], sizes = [16, 32], strides = [1, 1]} : vector<16x128xf32> to vector<16x32xf32>
    %54 = arith.truncf %53 : vector<16x32xf32> to vector<16x32xbf16>
    %c0_22 = arith.constant 0 : index
    %c0_23 = arith.constant 0 : index
    %c0_24 = arith.constant 0 : index
    %55 = vector.load %arg17[%c0_22, %c0_23, %c0_24] : memref<4x16x32xbf16, #tpu.memory_space<vmem>>, vector<1x16x32xbf16>
    %56 = vector.shape_cast %55 : vector<1x16x32xbf16> to vector<16x32xbf16>
    %57 = vector.shape_cast %54 : vector<16x32xbf16> to vector<1x16x32xbf16>
    tpu.vector_store %arg17[%c0_22, %c0_23, %c0_24], %57 {strides = array<i32>} : memref<4x16x32xbf16, #tpu.memory_space<vmem>>, vector<1x16x32xbf16>,
    %58 = vector.extract_strided_slice %40 {offsets = [0, 32], sizes = [16, 32], strides = [1, 1]} : vector<16x128xf32> to vector<16x32xf32>
    %59 = arith.truncf %58 : vector<16x32xf32> to vector<16x32xbf16>
    %c1 = arith.constant 1 : index
    %c0_25 = arith.constant 0 : index
    %c0_26 = arith.constant 0 : index
    %60 = vector.load %arg15[%c1, %c0_25, %c0_26] : memref<4x16x32xbf16, #tpu.memory_space<vmem>>, vector<1x16x32xbf16>
    %61 = vector.shape_cast %60 : vector<1x16x32xbf16> to vector<16x32xbf16>
    %62 = vector.shape_cast %59 : vector<16x32xbf16> to vector<1x16x32xbf16>
    tpu.vector_store %arg15[%c1, %c0_25, %c0_26], %62 {strides = array<i32>} : memref<4x16x32xbf16, #tpu.memory_space<vmem>>, vector<1x16x32xbf16>,
    %63 = vector.extract_strided_slice %41 {offsets = [0, 32], sizes = [16, 32], strides = [1, 1]} : vector<16x128xf32> to vector<16x32xf32>
    %64 = arith.truncf %63 : vector<16x32xf32> to vector<16x32xbf16>
    %c1_27 = arith.constant 1 : index
    %c0_28 = arith.constant 0 : index
    %c0_29 = arith.constant 0 : index
    %65 = vector.load %arg16[%c1_27, %c0_28, %c0_29] : memref<4x16x32xbf16, #tpu.memory_space<vmem>>, vector<1x16x32xbf16>
    %66 = vector.shape_cast %65 : vector<1x16x32xbf16> to vector<16x32xbf16>
    %67 = vector.shape_cast %64 : vector<16x32xbf16> to vector<1x16x32xbf16>
    tpu.vector_store %arg16[%c1_27, %c0_28, %c0_29], %67 {strides = array<i32>} : memref<4x16x32xbf16, #tpu.memory_space<vmem>>, vector<1x16x32xbf16>,
    %68 = vector.extract_strided_slice %42 {offsets = [0, 32], sizes = [16, 32], strides = [1, 1]} : vector<16x128xf32> to vector<16x32xf32>
    %69 = arith.truncf %68 : vector<16x32xf32> to vector<16x32xbf16>
    %c1_30 = arith.constant 1 : index
    %c0_31 = arith.constant 0 : index
    %c0_32 = arith.constant 0 : index
    %70 = vector.load %arg17[%c1_30, %c0_31, %c0_32] : memref<4x16x32xbf16, #tpu.memory_space<vmem>>, vector<1x16x32xbf16>
    %71 = vector.shape_cast %70 : vector<1x16x32xbf16> to vector<16x32xbf16>
    %72 = vector.shape_cast %69 : vector<16x32xbf16> to vector<1x16x32xbf16>
    tpu.vector_store %arg17[%c1_30, %c0_31, %c0_32], %72 {strides = array<i32>} : memref<4x16x32xbf16, #tpu.memory_space<vmem>>, vector<1x16x32xbf16>,
    %73 = vector.extract_strided_slice %40 {offsets = [0, 64], sizes = [16, 32], strides = [1, 1]} : vector<16x128xf32> to vector<16x32xf32>
    %74 = arith.truncf %73 : vector<16x32xf32> to vector<16x32xbf16>
    %c2 = arith.constant 2 : index
    %c0_33 = arith.constant 0 : index
    %c0_34 = arith.constant 0 : index
    %75 = vector.load %arg15[%c2, %c0_33, %c0_34] : memref<4x16x32xbf16, #tpu.memory_space<vmem>>, vector<1x16x32xbf16>
    %76 = vector.shape_cast %75 : vector<1x16x32xbf16> to vector<16x32xbf16>
    %77 = vector.shape_cast %74 : vector<16x32xbf16> to vector<1x16x32xbf16>
    tpu.vector_store %arg15[%c2, %c0_33, %c0_34], %77 {strides = array<i32>} : memref<4x16x32xbf16, #tpu.memory_space<vmem>>, vector<1x16x32xbf16>,
    %78 = vector.extract_strided_slice %41 {offsets = [0, 64], sizes = [16, 32], strides = [1, 1]} : vector<16x128xf32> to vector<16x32xf32>
    %79 = arith.truncf %78 : vector<16x32xf32> to vector<16x32xbf16>
    %c2_35 = arith.constant 2 : index
    %c0_36 = arith.constant 0 : index
    %c0_37 = arith.constant 0 : index
    %80 = vector.load %arg16[%c2_35, %c0_36, %c0_37] : memref<4x16x32xbf16, #tpu.memory_space<vmem>>, vector<1x16x32xbf16>
    %81 = vector.shape_cast %80 : vector<1x16x32xbf16> to vector<16x32xbf16>
    %82 = vector.shape_cast %79 : vector<16x32xbf16> to vector<1x16x32xbf16>
    tpu.vector_store %arg16[%c2_35, %c0_36, %c0_37], %82 {strides = array<i32>} : memref<4x16x32xbf16, #tpu.memory_space<vmem>>, vector<1x16x32xbf16>,
    %83 = vector.extract_strided_slice %42 {offsets = [0, 64], sizes = [16, 32], strides = [1, 1]} : vector<16x128xf32> to vector<16x32xf32>
    %84 = arith.truncf %83 : vector<16x32xf32> to vector<16x32xbf16>
    %c2_38 = arith.constant 2 : index
    %c0_39 = arith.constant 0 : index
    %c0_40 = arith.constant 0 : index
    %85 = vector.load %arg17[%c2_38, %c0_39, %c0_40] : memref<4x16x32xbf16, #tpu.memory_space<vmem>>, vector<1x16x32xbf16>
    %86 = vector.shape_cast %85 : vector<1x16x32xbf16> to vector<16x32xbf16>
    %87 = vector.shape_cast %84 : vector<16x32xbf16> to vector<1x16x32xbf16>
    tpu.vector_store %arg17[%c2_38, %c0_39, %c0_40], %87 {strides = array<i32>} : memref<4x16x32xbf16, #tpu.memory_space<vmem>>, vector<1x16x32xbf16>,
    %88 = vector.extract_strided_slice %40 {offsets = [0, 96], sizes = [16, 32], strides = [1, 1]} : vector<16x128xf32> to vector<16x32xf32>
    %89 = arith.truncf %88 : vector<16x32xf32> to vector<16x32xbf16>
    %c3 = arith.constant 3 : index
    %c0_41 = arith.constant 0 : index
    %c0_42 = arith.constant 0 : index
    %90 = vector.load %arg15[%c3, %c0_41, %c0_42] : memref<4x16x32xbf16, #tpu.memory_space<vmem>>, vector<1x16x32xbf16>
    %91 = vector.shape_cast %90 : vector<1x16x32xbf16> to vector<16x32xbf16>
    %92 = vector.shape_cast %89 : vector<16x32xbf16> to vector<1x16x32xbf16>
    tpu.vector_store %arg15[%c3, %c0_41, %c0_42], %92 {strides = array<i32>} : memref<4x16x32xbf16, #tpu.memory_space<vmem>>, vector<1x16x32xbf16>,
    %93 = vector.extract_strided_slice %41 {offsets = [0, 96], sizes = [16, 32], strides = [1, 1]} : vector<16x128xf32> to vector<16x32xf32>
    %94 = arith.truncf %93 : vector<16x32xf32> to vector<16x32xbf16>
    %c3_43 = arith.constant 3 : index
    %c0_44 = arith.constant 0 : index
    %c0_45 = arith.constant 0 : index
    %95 = vector.load %arg16[%c3_43, %c0_44, %c0_45] : memref<4x16x32xbf16, #tpu.memory_space<vmem>>, vector<1x16x32xbf16>
    %96 = vector.shape_cast %95 : vector<1x16x32xbf16> to vector<16x32xbf16>
    %97 = vector.shape_cast %94 : vector<16x32xbf16> to vector<1x16x32xbf16>
    tpu.vector_store %arg16[%c3_43, %c0_44, %c0_45], %97 {strides = array<i32>} : memref<4x16x32xbf16, #tpu.memory_space<vmem>>, vector<1x16x32xbf16>,
    %98 = vector.extract_strided_slice %42 {offsets = [0, 96], sizes = [16, 32], strides = [1, 1]} : vector<16x128xf32> to vector<16x32xf32>
    %99 = arith.truncf %98 : vector<16x32xf32> to vector<16x32xbf16>
    %c3_46 = arith.constant 3 : index
    %c0_47 = arith.constant 0 : index
    %c0_48 = arith.constant 0 : index
    %100 = vector.load %arg17[%c3_46, %c0_47, %c0_48] : memref<4x16x32xbf16, #tpu.memory_space<vmem>>, vector<1x16x32xbf16>
    %101 = vector.shape_cast %100 : vector<1x16x32xbf16> to vector<16x32xbf16>
    %102 = vector.shape_cast %99 : vector<16x32xbf16> to vector<1x16x32xbf16>
    tpu.vector_store %arg17[%c3_46, %c0_47, %c0_48], %102 {strides = array<i32>} : memref<4x16x32xbf16, #tpu.memory_space<vmem>>, vector<1x16x32xbf16>,
    %103 = tpu.iota {dimensions = array<i32: 0>} : vector<16x16xi32>
    %104 = tpu.iota {dimensions = array<i32: 1>} : vector<16x16xi32>
    %105 = arith.cmpi sle, %104, %103 : vector<16x16xi32>
    %cst_49 = arith.constant 0.000000e+00 : f32
    %cst_50 = arith.constant -1.000000e+09 : f32
    %106 = vector.broadcast %cst_49 : f32 to vector<16x16xf32>
    %107 = vector.broadcast %cst_50 : f32 to vector<16x16xf32>
    %108 = arith.select %105, %106, %107 : vector<16x16xi1>, vector<16x16xf32>
    %c0_51 = arith.constant 0 : index
    %c0_52 = arith.constant 0 : index
    %c0_53 = arith.constant 0 : index
    %109 = vector.load %arg15[%c0_51, %c0_52, %c0_53] : memref<4x16x32xbf16, #tpu.memory_space<vmem>>, vector<4x16x32xbf16>
    %c0_54 = arith.constant 0 : index
    %c0_55 = arith.constant 0 : index
    %c0_56 = arith.constant 0 : index
    %110 = vector.load %arg16[%c0_54, %c0_55, %c0_56] : memref<4x16x32xbf16, #tpu.memory_space<vmem>>, vector<4x16x32xbf16>
    %c0_57 = arith.constant 0 : index
    %c0_58 = arith.constant 0 : index
    %c0_59 = arith.constant 0 : index
    %111 = vector.load %arg17[%c0_57, %c0_58, %c0_59] : memref<4x16x32xbf16, #tpu.memory_space<vmem>>, vector<4x16x32xbf16>
    "tpu.trace_start"() <{level = 10 : i32, message = "hqd,hkd->hqk"}> : () -> ()
    %cst_60 = arith.constant dense<0.000000e+00> : vector<4x16x16xf32>
    %112 = tpu.matmul %109, %110, %cst_60 {dimension_numbers = #tpu.dot_dimension_numbers<[2], [2], [1], [1], [0, 0, 0, 1, 1, 1], [0], [0]>} : vector<4x16x32xbf16>, vector<4x16x32xbf16>, vector<4x16x16xf32> -> vector<4x16x16xf32>
    "tpu.trace_stop"() : () -> ()
    %113 = vector.shape_cast %108 : vector<16x16xf32> to vector<1x16x16xf32>
    %114 = vector.broadcast %113 : vector<1x16x16xf32> to vector<4x16x16xf32>
    %115 = arith.addf %112, %114 : vector<4x16x16xf32>
    %cst_61 = arith.constant dense<0xFF800000> : vector<4x16xf32>
    %116 = vector.multi_reduction <maximumf>, %115, %cst_61 [2] : vector<4x16x16xf32> to vector<4x16xf32>
    %117 = vector.shape_cast %116 : vector<4x16xf32> to vector<4x16x1xf32>
    %118 = vector.broadcast %117 : vector<4x16x1xf32> to vector<4x16x16xf32>
    %119 = arith.subf %115, %118 : vector<4x16x16xf32>
    %120 = math.exp %119 : vector<4x16x16xf32>
    %cst_62 = arith.constant dense<0.000000e+00> : vector<4x16xf32>
    %121 = vector.multi_reduction <add>, %120, %cst_62 [2] : vector<4x16x16xf32> to vector<4x16xf32>
    %122 = vector.shape_cast %121 : vector<4x16xf32> to vector<4x16x1xf32>
    %123 = tpu.reciprocal %122 {approx = true} : vector<4x16x1xf32> -> vector<4x16x1xf32>
    %124 = arith.truncf %120 : vector<4x16x16xf32> to vector<4x16x16xbf16>
    "tpu.trace_start"() <{level = 10 : i32, message = "hqk,hkd->hqd"}> : () -> ()
    %cst_63 = arith.constant dense<0.000000e+00> : vector<4x16x32xf32>
    %125 = tpu.matmul %124, %111, %cst_63 {dimension_numbers = #tpu.dot_dimension_numbers<[2], [1], [1], [2], [0, 0, 0, 1, 1, 2], [0], [0]>} : vector<4x16x16xbf16>, vector<4x16x32xbf16>, vector<4x16x32xf32> -> vector<4x16x32xf32>
    "tpu.trace_stop"() : () -> ()
    %126 = vector.broadcast %123 : vector<4x16x1xf32> to vector<4x16x32xf32>
    %127 = arith.mulf %125, %126 : vector<4x16x32xf32>
    %128 = vector.extract_strided_slice %127 {offsets = [0, 0, 0], sizes = [1, 16, 32], strides = [1, 1, 1]} : vector<4x16x32xf32> to vector<1x16x32xf32>
    %129 = vector.shape_cast %128 : vector<1x16x32xf32> to vector<16x32xf32>
    %130 = arith.truncf %129 : vector<16x32xf32> to vector<16x32xbf16>
    %c0_64 = arith.constant 0 : index
    %c0_65 = arith.constant 0 : index
    %131 = vector.load %arg18[%c0_64, %c0_65] : memref<16x128xbf16, #tpu.memory_space<vmem>>, vector<16x32xbf16>
    tpu.vector_store %arg18[%c0_64, %c0_65], %130 {strides = array<i32>} : memref<16x128xbf16, #tpu.memory_space<vmem>>, vector<16x32xbf16>,
    %132 = vector.extract_strided_slice %127 {offsets = [1, 0, 0], sizes = [1, 16, 32], strides = [1, 1, 1]} : vector<4x16x32xf32> to vector<1x16x32xf32>
    %133 = vector.shape_cast %132 : vector<1x16x32xf32> to vector<16x32xf32>
    %134 = arith.truncf %133 : vector<16x32xf32> to vector<16x32xbf16>
    %c0_66 = arith.constant 0 : index
    %c32 = arith.constant 32 : index
    %135 = vector.load %arg18[%c0_66, %c32] : memref<16x128xbf16, #tpu.memory_space<vmem>>, vector<16x32xbf16>
    tpu.vector_store %arg18[%c0_66, %c32], %134 {strides = array<i32>} : memref<16x128xbf16, #tpu.memory_space<vmem>>, vector<16x32xbf16>,
    %136 = vector.extract_strided_slice %127 {offsets = [2, 0, 0], sizes = [1, 16, 32], strides = [1, 1, 1]} : vector<4x16x32xf32> to vector<1x16x32xf32>
    %137 = vector.shape_cast %136 : vector<1x16x32xf32> to vector<16x32xf32>
    %138 = arith.truncf %137 : vector<16x32xf32> to vector<16x32xbf16>
    %c0_67 = arith.constant 0 : index
    %c64 = arith.constant 64 : index
    %139 = vector.load %arg18[%c0_67, %c64] : memref<16x128xbf16, #tpu.memory_space<vmem>>, vector<16x32xbf16>
    tpu.vector_store %arg18[%c0_67, %c64], %138 {strides = array<i32>} : memref<16x128xbf16, #tpu.memory_space<vmem>>, vector<16x32xbf16>,
    %140 = vector.extract_strided_slice %127 {offsets = [3, 0, 0], sizes = [1, 16, 32], strides = [1, 1, 1]} : vector<4x16x32xf32> to vector<1x16x32xf32>
    %141 = vector.shape_cast %140 : vector<1x16x32xf32> to vector<16x32xf32>
    %142 = arith.truncf %141 : vector<16x32xf32> to vector<16x32xbf16>
    %c0_68 = arith.constant 0 : index
    %c96 = arith.constant 96 : index
    %143 = vector.load %arg18[%c0_68, %c96] : memref<16x128xbf16, #tpu.memory_space<vmem>>, vector<16x32xbf16>
    tpu.vector_store %arg18[%c0_68, %c96], %142 {strides = array<i32>} : memref<16x128xbf16, #tpu.memory_space<vmem>>, vector<16x32xbf16>,
    %c0_69 = arith.constant 0 : index
    %c0_70 = arith.constant 0 : index
    %144 = vector.load %arg18[%c0_69, %c0_70] : memref<16x128xbf16, #tpu.memory_space<vmem>>, vector<16x128xbf16>
    %c0_71 = arith.constant 0 : index
    %c0_72 = arith.constant 0 : index
    %145 = vector.load %arg6[%c0_71, %c0_72] : memref<128x128xbf16, #tpu.memory_space<vmem>>, vector<128x128xbf16>
    %cst_73 = arith.constant dense<0.000000e+00> : vector<16x128xf32>
    %146 = tpu.matmul %144, %145, %cst_73 {dimension_numbers = #tpu.dot_dimension_numbers<[1], [0], [0], [1], [0, 0, 1, 1], [], []>} : vector<16x128xbf16>, vector<128x128xbf16>, vector<16x128xf32> -> vector<16x128xf32>
    %c0_74 = arith.constant 0 : index
    %c0_75 = arith.constant 0 : index
    %147 = vector.load %arg7[%c0_74, %c0_75] : memref<1x128xf32, #tpu.memory_space<vmem>>, vector<1x128xf32>
    %148 = vector.shape_cast %147 : vector<1x128xf32> to vector<128xf32>
    %149 = vector.shape_cast %148 : vector<128xf32> to vector<1x128xf32>
    %150 = vector.broadcast %149 : vector<1x128xf32> to vector<16x128xf32>
    %151 = arith.addf %146, %150 : vector<16x128xf32>
    %152 = arith.addf %1, %151 : vector<16x128xf32>
    %c0_76 = arith.constant 0 : index
    %c0_77 = arith.constant 0 : index
    %153 = vector.load %arg8[%c0_76, %c0_77] : memref<1x128xf32, #tpu.memory_space<vmem>>, vector<1x128xf32>
    %154 = vector.shape_cast %153 : vector<1x128xf32> to vector<128xf32>
    %c0_78 = arith.constant 0 : index
    %c0_79 = arith.constant 0 : index
    %155 = vector.load %arg9[%c0_78, %c0_79] : memref<1x128xf32, #tpu.memory_space<vmem>>, vector<1x128xf32>
    %156 = vector.shape_cast %155 : vector<1x128xf32> to vector<128xf32>
    %cst_80 = arith.constant dense<0.000000e+00> : vector<16xf32>
    %157 = vector.multi_reduction <add>, %152, %cst_80 [1] : vector<16x128xf32> to vector<16xf32>
    %158 = vector.shape_cast %157 : vector<16xf32> to vector<16x1xf32>
    %cst_81 = arith.constant 1.280000e+02 : f32
    %159 = vector.broadcast %cst_81 : f32 to vector<16x1xf32>
    %160 = arith.divf %158, %159 : vector<16x1xf32>
    %161 = vector.broadcast %160 : vector<16x1xf32> to vector<16x128xf32>
    %162 = arith.subf %152, %161 : vector<16x128xf32>
    %163 = arith.mulf %162, %162 : vector<16x128xf32>
    %cst_82 = arith.constant dense<0.000000e+00> : vector<16xf32>
    %164 = vector.multi_reduction <add>, %163, %cst_82 [1] : vector<16x128xf32> to vector<16xf32>
    %165 = vector.shape_cast %164 : vector<16xf32> to vector<16x1xf32>
    %cst_83 = arith.constant 1.280000e+02 : f32
    %166 = vector.broadcast %cst_83 : f32 to vector<16x1xf32>
    %167 = arith.divf %165, %166 : vector<16x1xf32>
    %168 = vector.broadcast %160 : vector<16x1xf32> to vector<16x128xf32>
    %169 = arith.subf %152, %168 : vector<16x128xf32>
    %cst_84 = arith.constant 9.99999974E-6 : f32
    %170 = vector.broadcast %cst_84 : f32 to vector<16x1xf32>
    %171 = arith.addf %167, %170 : vector<16x1xf32>
    %172 = math.rsqrt %171 : vector<16x1xf32>
    %173 = vector.broadcast %172 : vector<16x1xf32> to vector<16x128xf32>
    %174 = arith.mulf %169, %173 : vector<16x128xf32>
    %175 = vector.shape_cast %154 : vector<128xf32> to vector<1x128xf32>
    %176 = vector.broadcast %175 : vector<1x128xf32> to vector<16x128xf32>
    %177 = arith.mulf %174, %176 : vector<16x128xf32>
    %178 = vector.shape_cast %156 : vector<128xf32> to vector<1x128xf32>
    %179 = vector.broadcast %178 : vector<1x128xf32> to vector<16x128xf32>
    %180 = arith.addf %177, %179 : vector<16x128xf32>
    %181 = arith.truncf %180 : vector<16x128xf32> to vector<16x128xbf16>
    %cst_85 = arith.constant 0.000000e+00 : f32
    %182 = vector.broadcast %cst_85 : f32 to vector<16x128xf32>
    %c0_86 = arith.constant 0 : index
    %c0_87 = arith.constant 0 : index
    %183 = vector.load %arg10[%c0_86, %c0_87] : memref<128x512xbf16, #tpu.memory_space<vmem>>, vector<128x512xbf16>
    %cst_88 = arith.constant dense<0.000000e+00> : vector<16x512xf32>
    %184 = tpu.matmul %181, %183, %cst_88 {dimension_numbers = #tpu.dot_dimension_numbers<[1], [0], [0], [1], [0, 0, 1, 1], [], []>} : vector<16x128xbf16>, vector<128x512xbf16>, vector<16x512xf32> -> vector<16x512xf32>
    %c0_89 = arith.constant 0 : index
    %c0_90 = arith.constant 0 : index
    %185 = vector.load %arg11[%c0_89, %c0_90] : memref<1x512xf32, #tpu.memory_space<vmem>>, vector<1x512xf32>
    %186 = vector.shape_cast %185 : vector<1x512xf32> to vector<512xf32>
    %187 = vector.shape_cast %186 : vector<512xf32> to vector<1x512xf32>
    %188 = vector.broadcast %187 : vector<1x512xf32> to vector<16x512xf32>
    %189 = arith.addf %184, %188 : vector<16x512xf32>
    %cst_91 = arith.constant 5.000000e-01 : f32
    %190 = vector.broadcast %cst_91 : f32 to vector<16x512xf32>
    %191 = arith.mulf %190, %189 : vector<16x512xf32>
    %cst_92 = arith.constant 4.471500e-02 : f32
    %192 = vector.broadcast %cst_92 : f32 to vector<16x512xf32>
    %193 = arith.mulf %192, %189 : vector<16x512xf32>
    %194 = arith.mulf %193, %189 : vector<16x512xf32>
    %195 = arith.mulf %194, %189 : vector<16x512xf32>
    %196 = arith.addf %189, %195 : vector<16x512xf32>
    %cst_93 = arith.constant 0.797884583 : f32
    %197 = vector.broadcast %cst_93 : f32 to vector<16x512xf32>
    %198 = arith.mulf %197, %196 : vector<16x512xf32>
    %199 = math.tanh %198 : vector<16x512xf32>
    %cst_94 = arith.constant 1.000000e+00 : f32
    %200 = vector.broadcast %cst_94 : f32 to vector<16x512xf32>
    %201 = arith.addf %200, %199 : vector<16x512xf32>
    %202 = arith.mulf %191, %201 : vector<16x512xf32>
    %203 = arith.truncf %202 : vector<16x512xf32> to vector<16x512xbf16>
    %c0_95 = arith.constant 0 : index
    %c0_96 = arith.constant 0 : index
    %204 = vector.load %arg12[%c0_95, %c0_96] : memref<512x128xbf16, #tpu.memory_space<vmem>>, vector<512x128xbf16>
    %cst_97 = arith.constant dense<0.000000e+00> : vector<16x128xf32>
    %205 = tpu.matmul %203, %204, %cst_97 {dimension_numbers = #tpu.dot_dimension_numbers<[1], [0], [0], [1], [0, 0, 1, 1], [], []>} : vector<16x512xbf16>, vector<512x128xbf16>, vector<16x128xf32> -> vector<16x128xf32>
    %206 = arith.addf %182, %205 : vector<16x128xf32>
    %207 = arith.addf %152, %206 : vector<16x128xf32>
    %c0_98 = arith.constant 0 : index
    %c0_99 = arith.constant 0 : index
    %208 = vector.load %arg13[%c0_98, %c0_99] : memref<1x128xf32, #tpu.memory_space<vmem>>, vector<1x128xf32>
    %209 = vector.shape_cast %208 : vector<1x128xf32> to vector<128xf32>
    %210 = vector.shape_cast %209 : vector<128xf32> to vector<1x128xf32>
    %211 = vector.broadcast %210 : vector<1x128xf32> to vector<16x128xf32>
    %212 = arith.addf %207, %211 : vector<16x128xf32>
    %c0_100 = arith.constant 0 : index
    %c0_101 = arith.constant 0 : index
    %c0_102 = arith.constant 0 : index
    %213 = vector.load %arg14[%c0_100, %c0_101, %c0_102] : memref<1x16x128xf32, #tpu.memory_space<vmem>>, vector<1x16x128xf32>
    %214 = vector.shape_cast %213 : vector<1x16x128xf32> to vector<16x128xf32>
    %215 = vector.shape_cast %212 : vector<16x128xf32> to vector<1x16x128xf32>
    tpu.vector_store %arg14[%c0_100, %c0_101, %c0_102], %215 {strides = array<i32>} : memref<1x16x128xf32, #tpu.memory_space<vmem>>, vector<1x16x128xf32>,
    return
  }
  func.func @transform_0(%arg0: i32) -> (i32, i32, i32) {
    %c0_i32 = arith.constant 0 : i32
    %c0_i32_0 = arith.constant 0 : i32
    %c0_i32_1 = arith.constant 0 : i32
    return %arg0, %c0_i32, %c0_i32_0 : i32, i32, i32
  }
  func.func @transform_1(%arg0: i32) -> (i32, i32) {
    %c0_i32 = arith.constant 0 : i32
    %c0_i32_0 = arith.constant 0 : i32
    %c0_i32_1 = arith.constant 0 : i32
    return %c0_i32, %c0_i32_0 : i32, i32
  }
  func.func @transform_2(%arg0: i32) -> (i32, i32) {
    %c0_i32 = arith.constant 0 : i32
    %c0_i32_0 = arith.constant 0 : i32
    %c0_i32_1 = arith.constant 0 : i32
    return %c0_i32, %c0_i32_0 : i32, i32
  }
  func.func @transform_3(%arg0: i32) -> (i32, i32) {
    %c0_i32 = arith.constant 0 : i32
    %c0_i32_0 = arith.constant 0 : i32
    %c0_i32_1 = arith.constant 0 : i32
    return %c0_i32, %c0_i32_0 : i32, i32
  }
  func.func @transform_4(%arg0: i32) -> (i32, i32) {
    %c0_i32 = arith.constant 0 : i32
    %c0_i32_0 = arith.constant 0 : i32
    %c0_i32_1 = arith.constant 0 : i32
    return %c0_i32, %c0_i32_0 : i32, i32
  }
  func.func @transform_5(%arg0: i32) -> (i32, i32) {
    %c0_i32 = arith.constant 0 : i32
    %c0_i32_0 = arith.constant 0 : i32
    %c0_i32_1 = arith.constant 0 : i32
    return %c0_i32, %c0_i32_0 : i32, i32
  }
  func.func @transform_6(%arg0: i32) -> (i32, i32) {
    %c0_i32 = arith.constant 0 : i32
    %c0_i32_0 = arith.constant 0 : i32
    %c0_i32_1 = arith.constant 0 : i32
    return %c0_i32, %c0_i32_0 : i32, i32
  }
  func.func @transform_7(%arg0: i32) -> (i32, i32) {
    %c0_i32 = arith.constant 0 : i32
    %c0_i32_0 = arith.constant 0 : i32
    %c0_i32_1 = arith.constant 0 : i32
    return %c0_i32, %c0_i32_0 : i32, i32
  }
  func.func @transform_8(%arg0: i32) -> (i32, i32) {
    %c0_i32 = arith.constant 0 : i32
    %c0_i32_0 = arith.constant 0 : i32
    %c0_i32_1 = arith.constant 0 : i32
    return %c0_i32, %c0_i32_0 : i32, i32
  }
  func.func @transform_9(%arg0: i32) -> (i32, i32) {
    %c0_i32 = arith.constant 0 : i32
    %c0_i32_0 = arith.constant 0 : i32
    %c0_i32_1 = arith.constant 0 : i32
    return %c0_i32, %c0_i32_0 : i32, i32
  }
  func.func @transform_10(%arg0: i32) -> (i32, i32) {
    %c0_i32 = arith.constant 0 : i32
    %c0_i32_0 = arith.constant 0 : i32
    %c0_i32_1 = arith.constant 0 : i32
    return %c0_i32, %c0_i32_0 : i32, i32
  }
  func.func @transform_11(%arg0: i32) -> (i32, i32) {
    %c0_i32 = arith.constant 0 : i32
    %c0_i32_0 = arith.constant 0 : i32
    %c0_i32_1 = arith.constant 0 : i32
    return %c0_i32, %c0_i32_0 : i32, i32
  }
  func.func @transform_12(%arg0: i32) -> (i32, i32) {
    %c0_i32 = arith.constant 0 : i32
    %c0_i32_0 = arith.constant 0 : i32
    %c0_i32_1 = arith.constant 0 : i32
    return %c0_i32, %c0_i32_0 : i32, i32
  }
  func.func @transform_13(%arg0: i32) -> (i32, i32, i32) {
    %c0_i32 = arith.constant 0 : i32
    %c0_i32_0 = arith.constant 0 : i32
    %c0_i32_1 = arith.constant 0 : i32
    return %arg0, %c0_i32, %c0_i32_0 : i32, i32, i32
  }
}

</mosaic_0001>

<bundles_post_ra>
// kernel: tpu_custom_call.1
= control target key start
LH: loop header
LB: loop body
LE: loop exit
PB: predicated region body
PF: predicated region fallthrough
CT: control target
= control target key end

     0   :  { %s4468_s0 = inlined_call_operand.hbm [shape: f32[2,16,128], index: 0, kind: input, shape index: {}]   ;;  %s4469_s1 = inlined_call_operand.hbm [shape: f32[1,128], index: 1, kind: input, shape index: {}]   ;;  %s4470_s2 = inlined_call_operand.hbm [shape: f32[1,128], index: 2, kind: input, shape index: {}]   ;;  %s4471_s3 = inlined_call_operand.hbm [shape: bf16[128,384], index: 3, kind: input, shape index: {}]   ;;  %s4472_s4 = inlined_call_operand.hbm [shape: f32[1,384], index: 4, kind: input, shape index: {}]   ;;  %s4473_s5 = inlined_call_operand.hbm [shape: bf16[128,128], index: 5, kind: input, shape index: {}]   ;;  %s4474_s6 = inlined_call_operand.hbm [shape: f32[1,128], index: 6, kind: input, shape index: {}]   ;;  %s4475_s7 = inlined_call_operand.hbm [shape: f32[1,128], index: 7, kind: input, shape index: {}]   ;;  %s4476_s8 = inlined_call_operand.hbm [shape: f32[1,128], index: 8, kind: input, shape index: {}]   ;;  %s4477_s9 = inlined_call_operand.hbm [shape: bf16[128,512], index: 9, kind: input, shape index: {}]   ;;  %s4478_s10 = inlined_call_operand.hbm [shape: f32[1,512], index: 10, kind: input, shape index: {}]   ;;  %s4479_s11 = inlined_call_operand.hbm [shape: bf16[512,128], index: 11, kind: input, shape index: {}]   ;;  %s4480_s12 = inlined_call_operand.hbm [shape: f32[1,128], index: 12, kind: input, shape index: {}]   ;;  %s4481_s13 = inlined_call_operand.hbm [shape: f32[2,16,128], index: 13, kind: output, shape index: {}]  }
   0x1   :  { %4493 = sst [smem:[#allocation39_spill]] %s4468_s0 }
   0x2   :  { %4494 = sst [smem:[#allocation40_spill]] %s4469_s1 }
   0x3   :  { %4495 = sst [smem:[#allocation41_spill]] %s4471_s3 }
   0x4   :  { %4496 = sst [smem:[#allocation42_spill]] %s4481_s13 }
   0x5   :  { %18 = vsyncpa [#allocation7], 0 }
   0x6   :  { %20 = vsyncpa [#allocation7 + $0x1], 0 }
   0x7   :  { %21 = vsyncpa [#allocation10], 0 }
   0x8   :  { %22 = vsyncpa [#allocation13], 0 }
   0x9   :  { %23 = vsyncpa [#allocation16], 0 }
   0xa   :  { %24 = vsyncpa [#allocation19], 0 }
   0xb   :  { %25 = vsyncpa [#allocation22], 0 }
   0xc   :  { %26 = vsyncpa [#allocation25], 0 }
   0xd   :  { %27 = vsyncpa [#allocation8], 0 }
   0xe   :  { %29 = vsyncpa [#allocation8 + $0x1], 0  ;;  %s3802_s25 = smov 0   ;;  %s3804_s26 = smov 0  }
   0xf   :  { %s3806_s27 = smov 0   ;;  %s3808_s28 = smov 0  }
  0x10 LB: > { %4497 = sst [smem:[#allocation36_spill]] %s3687_s25  ;;  %s3701_s29 = smov [#allocation9]   ;;  %s3699_s28 = sphi %s3808_s28, %s4539_s28   ;;  %s3695_s27 = sphi %s3806_s27, %s4538_s27   ;;  %s3691_s26 = sphi %s3804_s26, %s4537_s26   ;;  %s3687_s25 = sphi %s3802_s25, %s4536_s25  }
  0x11   : > { %s357_s30 = sshll.u32 %s3701_s29, 4  ;;  %s3823_s14 = sadd.s32 4294967295, %s3699_s28   ;;  %s3828_s30 = int_to_ptr.vmem [resolvable:$true] %s357_s30 }
  0x12   : > { %4498 = sst [smem:[#allocation37_spill]] %s3823_s14  ;;  %p2566_p0 = scmp.ge.s32.totalorder %s3699_s28, 1 }
  0x13   : > { %p4488_p1 = scmp.eq.s32.totalorder %s3823_s14, 0  ;;  %p344_p2 = scmp.lt.s32.totalorder %s3699_s28, 3 }
  0x14   : > { %s3702_s16 = smov [#allocation12]   ;;  %s3703_s19 = smov [#allocation15]  }
  0x15   : > { %p3830_p3 = pnand %p2566_p0, %p344_p2  ;;  %s378_s17 = sshll.u32 %s3702_s16, 4  ;;  %s3837_s17 = int_to_ptr.vmem [resolvable:$true] %s378_s17 }
  0x16   : > { %s402_s20 = sshll.u32 %s3703_s19, 4  ;;  %s4502_s1 = sld [smem:[#allocation40_spill]]  ;;  %s3845_s20 = int_to_ptr.vmem [resolvable:$true] %s402_s20 }
  0x17   : > { %s4499_s15 = scalar_select %p3830_p3, 1, 0 }
  0x18   : > { %p2933_p5 = pneg %p3830_p3 }
  0x19   : > { %4500 = sst [smem:[#allocation38_spill]] %s4499_s15 }
  0x1a   : > { %p3841_p6 = pnand %p2933_p5, %p4488_p1 }
  0x1c   : > { %s3243_s23 = scalar_lea.hbm %s4502_s1, 16  ;;  %p3855_p8 = pneg %p3841_p6 }
  0x1d   : > { %p3244_p7 = scmp.ne.s32.totalorder %s4502_s1, %s3243_s23  ;;  %p3250_p11 = scmp.lt.u32.totalorder %s3243_s23, %s4502_s1 }
  0x1f   : > { %p3246_p9 = pnand %p3855_p8, %p3244_p7 }
  0x21   : > { %p3247_p10 = pneg %p3246_p9 }
  0x23   : > { %p3252_p12 = pnand %p3250_p11, %p3247_p10 }
  0x25   : > { %3255 = shalt.err (!%p3252_p12)
}
  0x26   : > { %s3256_s21 = scalar_lea.vmem %s3828_s30, 16  ;;  %s3263_s22 = scalar_lea.vmem %s3828_s30, 32 }
  0x27   : > { %p3257_p13 = scmp.ne.s32.totalorder %s3828_s30, %s3256_s21  ;;  %p3264_p5 = scmp.lt.s32.totalorder %s3828_s30, %s3828_s30 }
  0x28   : > { %p3265_p7 = scmp.lt.s32.totalorder %s3263_s22, %s3256_s21 }
  0x29   : > { %p3259_p0 = pnand %p3257_p13, %p3855_p8 }
  0x2a   : > { %p3266_p9 = por %p3265_p7, %p3264_p5 }
  0x2b   : > { %p3260_p2 = pneg %p3259_p0 }
  0x2d   : > { %p3267_p4 = pnand %p3266_p9, %p3260_p2 }
  0x2f   : > { %3270 = shalt.err (!%p3267_p4)
}
  0x30   : > { %2936 = dma.hbm_to_vmem [thread:$0]  (!%p3841_p6), %s4502_s1, 16, %s3828_s30, [#allocation10]  }
  0x31   : > { %s4504_s3 = sld [smem:[#allocation41_spill]] }
  0x37   : > { %s3271_s19 = scalar_lea.hbm %s4504_s3, 3072 }
  0x38   : > { %p3272_p10 = scmp.ne.s32.totalorder %s4504_s3, %s3271_s19  ;;  %p3278_p4 = scmp.lt.u32.totalorder %s3271_s19, %s4504_s3 }
  0x3a   : > { %p3274_p11 = pnand %p3272_p10, %p3855_p8 }
  0x3c   : > { %p3275_p12 = pneg %p3274_p11 }
  0x3e   : > { %p3280_p13 = pnand %p3278_p4, %p3275_p12 }
  0x40   : > { %3283 = shalt.err (!%p3280_p13)
}
  0x41   : > { %s3284_s30 = scalar_lea.vmem %s3837_s17, 3072  ;;  %p3292_p7 = scmp.lt.s32.totalorder %s3837_s17, %s3837_s17 }
  0x42   : > { %p3285_p0 = scmp.ne.s32.totalorder %s3837_s17, %s3284_s30  ;;  %p3293_p9 = scmp.lt.s32.totalorder %s3284_s30, %s3284_s30 }
  0x44   : > { %p3287_p2 = pnand %p3285_p0, %p3855_p8  ;;  %p3294_p10 = por %p3293_p9, %p3292_p7 }
  0x46   : > { %p3288_p5 = pneg %p3287_p2 }
  0x48   : > { %p3295_p11 = pnand %p3294_p10, %p3288_p5 }
  0x4a   : > { %3298 = shalt.err (!%p3295_p11)
}
  0x4b   : > { %s3704_s0 = smov 192   ;;  %s3705_s15 = smov 12  }
  0x4c   : > { %2942 = dma.hbm_to_vmem [thread:$0]  (!%p3841_p6), %s4504_s3, 3072, %s3837_s17, [#allocation13], %s3704_s0, %s3704_s0, %s3705_s15  }
  0x4d   : > { %s3299_s19 = scalar_lea.hbm %s4473_s5, 1024 }
  0x4e   : > { %p3300_p12 = scmp.ne.s32.totalorder %s4473_s5, %s3299_s19  ;;  %p3306_p0 = scmp.lt.u32.totalorder %s3299_s19, %s4473_s5 }
  0x50   : > { %p3302_p4 = pnand %p3300_p12, %p3855_p8 }
  0x52   : > { %p3303_p13 = pneg %p3302_p4 }
  0x54   : > { %p3308_p2 = pnand %p3306_p0, %p3303_p13 }
  0x56   : > { %3311 = shalt.err (!%p3308_p2)
}
  0x57   : > { %s3312_s17 = scalar_lea.vmem %s3845_s20, 1024  ;;  %p3320_p10 = scmp.lt.s32.totalorder %s3845_s20, %s3845_s20 }
  0x58   : > { %p3313_p5 = scmp.ne.s32.totalorder %s3845_s20, %s3312_s17  ;;  %p3321_p11 = scmp.lt.s32.totalorder %s3312_s17, %s3312_s17 }
  0x5a   : > { %p3315_p7 = pnand %p3313_p5, %p3855_p8  ;;  %p3322_p12 = por %p3321_p11, %p3320_p10 }
  0x5c   : > { %p3316_p9 = pneg %p3315_p7 }
  0x5e   : > { %p3323_p4 = pnand %p3322_p12, %p3316_p9 }
  0x60   : > { %3326 = shalt.err (!%p3323_p4)
}
  0x61   : > { %s4490_s0 = smov 64   ;;  %s4491_s1 = smov 4  }
  0x62   : > { %2948 = dma.hbm_to_vmem [thread:$0]  (!%p3841_p6), %s4473_s5, 1024, %s3845_s20, [#allocation16], %s4490_s0, %s4490_s0, %s4491_s1  }
  0x63   : > { %s3708_s23 = smov [#allocation18]   ;;  %s3709_s29 = smov [#allocation21]  }
  0x64   : > { %s427_s24 = sshll.u32 %s3708_s23, 4  ;;  %s448_s19 = sshll.u32 %s3709_s29, 4  ;;  %s428_s24 = int_to_ptr.vmem [resolvable:$true] %s427_s24  ;;  %s449_s19 = int_to_ptr.vmem [resolvable:$true] %s448_s19 }
  0x65   : > { %s3327_s30 = scalar_lea.hbm %s4475_s7, 16 }
  0x66   : > { %p3328_p13 = scmp.ne.s32.totalorder %s4475_s7, %s3327_s30  ;;  %p3334_p5 = scmp.lt.u32.totalorder %s3327_s30, %s4475_s7 }
  0x68   : > { %p3330_p0 = pnand %p3328_p13, %p3855_p8 }
  0x6a   : > { %p3331_p2 = pneg %p3330_p0 }
  0x6c   : > { %p3336_p7 = pnand %p3334_p5, %p3331_p2 }
  0x6e   : > { %3339 = shalt.err (!%p3336_p7)
}
  0x6f   : > { %s3340_s20 = scalar_lea.vmem %s428_s24, 16  ;;  %s3347_s15 = scalar_lea.vmem %s428_s24, 32 }
  0x70   : > { %p3341_p9 = scmp.ne.s32.totalorder %s428_s24, %s3340_s20  ;;  %p3348_p12 = scmp.lt.s32.totalorder %s428_s24, %s428_s24 }
  0x71   : > { %p3349_p4 = scmp.lt.s32.totalorder %s3347_s15, %s3340_s20 }
  0x72   : > { %p3343_p10 = pnand %p3341_p9, %p3855_p8 }
  0x73   : > { %p3350_p1 = por %p3349_p4, %p3348_p12 }
  0x74   : > { %p3344_p11 = pneg %p3343_p10 }
  0x76   : > { %p3351_p3 = pnand %p3350_p1, %p3344_p11 }
  0x78   : > { %3354 = shalt.err (!%p3351_p3)
}
  0x79   : > { %2954 = dma.hbm_to_vmem [thread:$0]  (!%p3841_p6), %s4475_s7, 16, %s428_s24, [#allocation19]  }
  0x7a   : > { %s3355_s23 = scalar_lea.hbm %s4477_s9, 4096 }
  0x7b   : > { %p3356_p13 = scmp.ne.s32.totalorder %s4477_s9, %s3355_s23  ;;  %p3362_p3 = scmp.lt.u32.totalorder %s3355_s23, %s4477_s9 }
  0x7d   : > { %p3358_p0 = pnand %p3356_p13, %p3855_p8 }
  0x7f   : > { %p3359_p1 = pneg %p3358_p0 }
  0x81   : > { %p3364_p2 = pnand %p3362_p3, %p3359_p1 }
  0x83   : > { %3367 = shalt.err (!%p3364_p2)
}
  0x84   : > { %s3368_s17 = scalar_lea.vmem %s449_s19, 4096  ;;  %p3376_p10 = scmp.lt.s32.totalorder %s449_s19, %s449_s19 }
  0x85   : > { %p3369_p5 = scmp.ne.s32.totalorder %s449_s19, %s3368_s17  ;;  %p3377_p11 = scmp.lt.s32.totalorder %s3368_s17, %s3368_s17 }
  0x87   : > { %p3371_p7 = pnand %p3369_p5, %p3855_p8  ;;  %p3378_p12 = por %p3377_p11, %p3376_p10 }
  0x89   : > { %p3372_p9 = pneg %p3371_p7 }
  0x8b   : > { %p3379_p4 = pnand %p3378_p12, %p3372_p9 }
  0x8d   : > { %3382 = shalt.err (!%p3379_p4)
}
  0x8e   : > { %s3710_s24 = smov 256   ;;  %s3711_s20 = smov 16  }
  0x8f   : > { %2960 = dma.hbm_to_vmem [thread:$0]  (!%p3841_p6), %s4477_s9, 4096, %s449_s19, [#allocation22], %s3710_s24, %s3710_s24, %s3711_s20  }
  0x90   : > { %s3712_s13 = smov [#allocation24]   ;;  %s3713_s14 = smov [#allocation11]  }
  0x91   : > { %s472_s25 = sshll.u32 %s3712_s13, 4  ;;  %s368_s23 = sshll.u32 %s3713_s14, 4  ;;  %s473_s25 = int_to_ptr.vmem [resolvable:$true] %s472_s25  ;;  %s369_s23 = int_to_ptr.vmem [resolvable:$true] %s368_s23 }
  0x92   : > { %s3383_s22 = scalar_lea.hbm %s4479_s11, 4096 }
  0x93   : > { %p3384_p13 = scmp.ne.s32.totalorder %s4479_s11, %s3383_s22  ;;  %p3390_p3 = scmp.lt.u32.totalorder %s3383_s22, %s4479_s11 }
  0x95   : > { %p3386_p0 = pnand %p3384_p13, %p3855_p8 }
  0x97   : > { %p3387_p1 = pneg %p3386_p0 }
  0x99   : > { %p3392_p2 = pnand %p3390_p3, %p3387_p1 }
  0x9b   : > { %3395 = shalt.err (!%p3392_p2)
}
  0x9c   : > { %s3396_s19 = scalar_lea.vmem %s473_s25, 4096  ;;  %p3404_p10 = scmp.lt.s32.totalorder %s473_s25, %s473_s25 }
  0x9d   : > { %p3397_p5 = scmp.ne.s32.totalorder %s473_s25, %s3396_s19  ;;  %p3405_p11 = scmp.lt.s32.totalorder %s3396_s19, %s3396_s19 }
  0x9f   : > { %p3399_p7 = pnand %p3397_p5, %p3855_p8  ;;  %p3406_p12 = por %p3405_p11, %p3404_p10 }
  0xa1   : > { %p3400_p9 = pneg %p3399_p7 }
  0xa3   : > { %p3407_p4 = pnand %p3406_p12, %p3400_p9 }
  0xa5   : > { %3410 = shalt.err (!%p3407_p4)
}
  0xa6   : > { %s4505_s24 = smov 4   ;;  %s4506_s20 = smov 64  }
  0xa7   : > { %2966 = dma.hbm_to_vmem [thread:$0]  (!%p3841_p6), %s4479_s11, 4096, %s473_s25, [#allocation25], %s4506_s20, %s4506_s20, %s4505_s24  }
  0xa8   : > { %s3411_s13 = scalar_lea.hbm %s4470_s2, 16 }
  0xa9   : > { %p3412_p13 = scmp.ne.s32.totalorder %s4470_s2, %s3411_s13  ;;  %p3418_p3 = scmp.lt.u32.totalorder %s3411_s13, %s4470_s2 }
  0xab   : > { %p3414_p0 = pnand %p3412_p13, %p3855_p8 }
  0xad   : > { %p3415_p1 = pneg %p3414_p0 }
  0xaf   : > { %p3420_p2 = pnand %p3418_p3, %p3415_p1 }
  0xb1   : > { %3423 = shalt.err (!%p3420_p2)
}
  0xb2   : > { %s3424_s30 = scalar_lea.vmem %s369_s23, 16  ;;  %s3431_s25 = scalar_lea.vmem %s369_s23, 32 }
  0xb3   : > { %p3425_p5 = scmp.ne.s32.totalorder %s369_s23, %s3424_s30  ;;  %p3432_p10 = scmp.lt.s32.totalorder %s369_s23, %s369_s23 }
  0xb4   : > { %p3433_p11 = scmp.lt.s32.totalorder %s3431_s25, %s3424_s30 }
  0xb5   : > { %p3427_p7 = pnand %p3425_p5, %p3855_p8 }
  0xb6   : > { %p3434_p12 = por %p3433_p11, %p3432_p10 }
  0xb7   : > { %p3428_p9 = pneg %p3427_p7 }
  0xb9   : > { %p3435_p4 = pnand %p3434_p12, %p3428_p9 }
  0xbb   : > { %3438 = shalt.err (!%p3435_p4)
}
  0xbc   : > { %2939 = dma.hbm_to_vmem [thread:$0]  (!%p3841_p6), %s4470_s2, 16, %s369_s23, [#allocation10]  }
  0xbd   : > { %s3714_s24 = smov [#allocation14]   ;;  %s3715_s0 = smov [#allocation17]  }
  0xbe   : > { %s392_s20 = sshll.u32 %s3714_s24, 4  ;;  %s416_s1 = sshll.u32 %s3715_s0, 4  ;;  %s393_s20 = int_to_ptr.vmem [resolvable:$true] %s392_s20  ;;  %s417_s1 = int_to_ptr.vmem [resolvable:$true] %s416_s1 }
  0xbf   : > { %s3439_s13 = scalar_lea.hbm %s4472_s4, 48 }
  0xc0   : > { %p3440_p13 = scmp.ne.s32.totalorder %s4472_s4, %s3439_s13  ;;  %p3446_p3 = scmp.lt.u32.totalorder %s3439_s13, %s4472_s4 }
  0xc2   : > { %p3442_p0 = pnand %p3440_p13, %p3855_p8 }
  0xc4   : > { %p3443_p1 = pneg %p3442_p0 }
  0xc6   : > { %p3448_p2 = pnand %p3446_p3, %p3443_p1 }
  0xc8   : > { %3451 = shalt.err (!%p3448_p2)
}
  0xc9   : > { %s3452_s23 = scalar_lea.vmem %s393_s20, 48  ;;  %s3459_s30 = scalar_lea.vmem %s393_s20, 64 }
  0xca   : > { %p3453_p5 = scmp.ne.s32.totalorder %s393_s20, %s3452_s23  ;;  %p3460_p10 = scmp.lt.s32.totalorder %s393_s20, %s393_s20 }
  0xcb   : > { %p3461_p11 = scmp.lt.s32.totalorder %s3459_s30, %s3452_s23 }
  0xcc   : > { %p3455_p7 = pnand %p3453_p5, %p3855_p8 }
  0xcd   : > { %p3462_p12 = por %p3461_p11, %p3460_p10 }
  0xce   : > { %p3456_p9 = pneg %p3455_p7 }
  0xd0   : > { %p3463_p4 = pnand %p3462_p12, %p3456_p9 }
  0xd2   : > { %3466 = shalt.err (!%p3463_p4)
}
  0xd3   : > { %2945 = dma.hbm_to_vmem [thread:$0]  (!%p3841_p6), %s4472_s4, 48, %s393_s20, [#allocation13]  }
  0xd4   : > { %s3467_s0 = scalar_lea.hbm %s4474_s6, 16 }
  0xd5   : > { %p3468_p13 = scmp.ne.s32.totalorder %s4474_s6, %s3467_s0  ;;  %p3474_p3 = scmp.lt.u32.totalorder %s3467_s0, %s4474_s6 }
  0xd7   : > { %p3470_p0 = pnand %p3468_p13, %p3855_p8 }
  0xd9   : > { %p3471_p1 = pneg %p3470_p0 }
  0xdb   : > { %p3476_p2 = pnand %p3474_p3, %p3471_p1 }
  0xdd   : > { %3479 = shalt.err (!%p3476_p2)
}
  0xde   : > { %s3480_s29 = scalar_lea.vmem %s417_s1, 16  ;;  %s3487_s20 = scalar_lea.vmem %s417_s1, 32 }
  0xdf   : > { %p3481_p5 = scmp.ne.s32.totalorder %s417_s1, %s3480_s29  ;;  %p3488_p10 = scmp.lt.s32.totalorder %s417_s1, %s417_s1 }
  0xe0   : > { %p3489_p11 = scmp.lt.s32.totalorder %s3487_s20, %s3480_s29 }
  0xe1   : > { %p3483_p7 = pnand %p3481_p5, %p3855_p8 }
  0xe2   : > { %p3490_p12 = por %p3489_p11, %p3488_p10 }
  0xe3   : > { %p3484_p9 = pneg %p3483_p7 }
  0xe5   : > { %p3491_p4 = pnand %p3490_p12, %p3484_p9 }
  0xe7   : > { %3494 = shalt.err (!%p3491_p4)
}
  0xe8   : > { %2951 = dma.hbm_to_vmem [thread:$0]  (!%p3841_p6), %s4474_s6, 16, %s417_s1, [#allocation16]  }
  0xe9   : > { %s3716_s23 = smov [#allocation20]   ;;  %s3717_s25 = smov [#allocation23]  }
  0xea   : > { %s438_s30 = sshll.u32 %s3716_s23, 4  ;;  %s462_s17 = sshll.u32 %s3717_s25, 4  ;;  %s439_s30 = int_to_ptr.vmem [resolvable:$true] %s438_s30  ;;  %s463_s17 = int_to_ptr.vmem [resolvable:$true] %s462_s17 }
  0xeb   : > { %s3495_s0 = scalar_lea.hbm %s4476_s8, 16 }
  0xec   : > { %p3496_p13 = scmp.ne.s32.totalorder %s4476_s8, %s3495_s0  ;;  %p3502_p3 = scmp.lt.u32.totalorder %s3495_s0, %s4476_s8 }
  0xee   : > { %p3498_p0 = pnand %p3496_p13, %p3855_p8 }
  0xf0   : > { %p3499_p1 = pneg %p3498_p0 }
  0xf2   : > { %p3504_p2 = pnand %p3502_p3, %p3499_p1 }
  0xf4   : > { %3507 = shalt.err (!%p3504_p2)
}
  0xf5   : > { %s3508_s1 = scalar_lea.vmem %s439_s30, 16  ;;  %s3515_s29 = scalar_lea.vmem %s439_s30, 32 }
  0xf6   : > { %p3509_p5 = scmp.ne.s32.totalorder %s439_s30, %s3508_s1  ;;  %p3516_p10 = scmp.lt.s32.totalorder %s439_s30, %s439_s30 }
  0xf7   : > { %p3517_p11 = scmp.lt.s32.totalorder %s3515_s29, %s3508_s1 }
  0xf8   : > { %p3511_p7 = pnand %p3509_p5, %p3855_p8 }
  0xf9   : > { %p3518_p12 = por %p3517_p11, %p3516_p10 }
  0xfa   : > { %p3512_p9 = pneg %p3511_p7 }
  0xfc   : > { %p3519_p4 = pnand %p3518_p12, %p3512_p9 }
  0xfe   : > { %3522 = shalt.err (!%p3519_p4)
}
  0xff   : > { %2957 = dma.hbm_to_vmem [thread:$0]  (!%p3841_p6), %s4476_s8, 16, %s439_s30, [#allocation19]  }
 0x100   : > { %s3523_s25 = scalar_lea.hbm %s4478_s10, 64 }
 0x101   : > { %p3524_p13 = scmp.ne.s32.totalorder %s4478_s10, %s3523_s25  ;;  %p3530_p3 = scmp.lt.u32.totalorder %s3523_s25, %s4478_s10 }
 0x103   : > { %p3526_p0 = pnand %p3524_p13, %p3855_p8 }
 0x105   : > { %p3527_p1 = pneg %p3526_p0 }
 0x107   : > { %p3532_p2 = pnand %p3530_p3, %p3527_p1 }
 0x109   : > { %3535 = shalt.err (!%p3532_p2)
}
 0x10a   : > { %s3536_s3 = scalar_lea.vmem %s463_s17, 64  ;;  %p3544_p10 = scmp.lt.s32.totalorder %s463_s17, %s463_s17 }
 0x10b   : > { %p3537_p5 = scmp.ne.s32.totalorder %s463_s17, %s3536_s3  ;;  %p3545_p11 = scmp.lt.s32.totalorder %s3536_s3, %s3536_s3 }
 0x10d   : > { %p3539_p7 = pnand %p3537_p5, %p3855_p8  ;;  %p3546_p12 = por %p3545_p11, %p3544_p10 }
 0x10f   : > { %p3540_p9 = pneg %p3539_p7 }
 0x111   : > { %p3547_p4 = pnand %p3546_p12, %p3540_p9 }
 0x113   : > { %3550 = shalt.err (!%p3547_p4)
}
 0x114   : > { %2963 = dma.hbm_to_vmem [thread:$0]  (!%p3841_p6), %s4478_s10, 64, %s463_s17, [#allocation22]  }
 0x115   : > { %s3718_s14 = smov [#allocation26]   ;;  %s3551_s21 = scalar_lea.hbm %s4480_s12, 16 }
 0x116   : > { %s486_s1 = sshll.u32 %s3718_s14, 4  ;;  %p3552_p13 = scmp.ne.s32.totalorder %s4480_s12, %s3551_s21  ;;  %s487_s1 = int_to_ptr.vmem [resolvable:$true] %s486_s1 }
 0x117   : > { %p3558_p3 = scmp.lt.u32.totalorder %s3551_s21, %s4480_s12 }
 0x118   : > { %p3554_p0 = pnand %p3552_p13, %p3855_p8 }
 0x11a   : > { %p3555_p1 = pneg %p3554_p0 }
 0x11c   : > { %p3560_p2 = pnand %p3558_p3, %p3555_p1 }
 0x11e   : > { %3563 = shalt.err (!%p3560_p2)
}
 0x11f   : > { %s3564_s17 = scalar_lea.vmem %s487_s1, 16  ;;  %s3571_s24 = scalar_lea.vmem %s487_s1, 32 }
 0x120   : > { %p3565_p5 = scmp.ne.s32.totalorder %s487_s1, %s3564_s17  ;;  %p3572_p10 = scmp.lt.s32.totalorder %s487_s1, %s487_s1 }
 0x121   : > { %p3573_p11 = scmp.lt.s32.totalorder %s3571_s24, %s3564_s17 }
 0x122   : > { %p3567_p7 = pnand %p3565_p5, %p3855_p8 }
 0x123   : > { %p3574_p12 = por %p3573_p11, %p3572_p10 }
 0x124   : > { %p3568_p9 = pneg %p3567_p7 }
 0x126   : > { %p3575_p4 = pnand %p3574_p12, %p3568_p9 }
 0x128   : > { %3578 = shalt.err (!%p3575_p4)
}
 0x129   : > { %s4507_s16 = sld [smem:[#allocation36_spill]]  ;;  %s4508_s3 = sld [smem:[#allocation37_spill]] }
 0x12a   : > { %2969 = dma.hbm_to_vmem [thread:$0]  (!%p3841_p6), %s4480_s12, 16, %s487_s1, [#allocation25]  }
 0x12b   : > { %s2565_s30 = sadd.s32 4294967294, %s3699_s28   ;;  %s4093_s18 = sadd.s32 1, %s3699_s28  }
 0x12c   : > { %s39_s13 = ssub.s32 %s3699_s28, %s4093_s18  ;;  %s42_s14 = sadd.s32 1, %s3695_s27 }
 0x12d   : > { %p40_p8 = scmp.eq.s32.totalorder %s39_s13, 0  ;;  %p49_p13 = scmp.ne.s32.totalorder %s3695_s27, %s3691_s26 }
 0x12e   : > { %p50_p0 = scmp.eq.s32.totalorder %s3699_s28, 0  ;;  %p337_p7 = scmp.eq.s32.totalorder %s2565_s30, 1 }
 0x12f   : > { %p55_p1 = scmp.ne.s32.totalorder %s3691_s26, %s4507_s16  ;;  %p4510_p2 = scmp.eq.s32.totalorder %s4508_s3, 0 }
 0x130   : > { %s4104_s29 = scalar_select %p40_p8, %s3695_s27, %s42_s14  }
 0x131   : > { %p4106_p3 = por %p50_p0, %p49_p13  ;;  %p4112_p6 = por %p4510_p2, %p55_p1 }
 0x132   : > { %p331_p5 = scmp.eq.s32.totalorder %s4508_s3, 1  ;;  %p2990_p9 = scmp.lt.s32.totalorder %s3699_s28, 2 }
 0x133   : > { %s497_s21 = sand.u32 1, %s3695_s27   ;;  %p4123_p11 = por %p337_p7, %p55_p1 }
 0x134   : > { %p4119_p10 = por %p331_p5, %p49_p13  ;;  %s2580_s25 = sshll.u32 %s497_s21, 4 }
 0x135   : > { %s4513_s23 = scalar_select %p4123_p11, 1, 0 }
 0x136   : > { %s4512_s22 = scalar_select %p4119_p10, 1, 0 }
 0x137   : > { %s2713_s19 = sshll.u32 %s3699_s28, 8  ;;  %s4514_s0 = sld [smem:[#allocation39_spill]] }
 0x138   : > { %s501_s16 = scalar_lea.vmem [#allocation6], %s2580_s25  ;;  %p4137_p12 = pnand %p2990_p9, %p4106_p3 }
 0x139   : > { %s508_s3 = sshll.u32 %s501_s16, 4  ;;  %s4141_s13 = scalar_lea.sflag [#allocation7], %s497_s21  ;;  %s4133_s3 = int_to_ptr.vmem [resolvable:$true] %s508_s3 }
 0x13a   : > { %p3581_p8 = pneg %p4137_p12 }
 0x13d   : > { %s4131_s15 = scalar_lea.hbm %s4514_s0, %s2713_s19  ;;  %s3584_s20 = scalar_lea.hbm %s4514_s0, 512 }
 0x13e   : > { %s3579_s14 = scalar_lea.hbm %s4131_s15, 256  ;;  %p3585_p1 = scmp.lt.u32.totalorder %s4131_s15, %s4514_s0 }
 0x13f   : > { %p3580_p4 = scmp.ne.s32.totalorder %s4131_s15, %s3579_s14  ;;  %p3586_p3 = scmp.lt.u32.totalorder %s3584_s20, %s3579_s14 }
 0x140   : > { %p3588_p5 = scmp.lt.u32.totalorder %s3579_s14, %s4131_s15 }
 0x141   : > { %p3582_p13 = pnand %p3581_p8, %p3580_p4  ;;  %p3587_p2 = por %p3586_p3, %p3585_p1 }
 0x143   : > { %p3583_p0 = pneg %p3582_p13  ;;  %p3589_p7 = por %p3588_p5, %p3587_p2 }
 0x145   : > { %p3590_p9 = pnand %p3589_p7, %p3583_p0 }
 0x147   : > { %3593 = shalt.err (!%p3590_p9)
}
 0x148   : > { %s3594_s21 = scalar_lea.vmem %s4133_s3, 256  ;;  %s3719_s16 = smov [#allocation6]  }
 0x149   : > { %p3595_p4 = scmp.ne.s32.totalorder %s4133_s3, %s3594_s21  ;;  %s3599_s25 = sshll.u32 %s3719_s16, 4  ;;  %s3600_s25 = int_to_ptr.vmem [resolvable:$false] %s3599_s25 }
 0x14a   : > { %s3601_s19 = scalar_lea.vmem %s3600_s25, 512  ;;  %p3602_p10 = scmp.lt.s32.totalorder %s4133_s3, %s3600_s25 }
 0x14b   : > { %p3597_p13 = pnand %p3595_p4, %p3581_p8  ;;  %p3603_p1 = scmp.lt.s32.totalorder %s3601_s19, %s3594_s21 }
 0x14d   : > { %p3598_p11 = pneg %p3597_p13  ;;  %p3604_p3 = por %p3603_p1, %p3602_p10 }
 0x14f   : > { %p3605_p2 = pnand %p3604_p3, %p3598_p11 }
 0x151   : > { %3608 = shalt.err (!%p3605_p2)
}
 0x152   : > { %s3720_s14 = smov 128   ;;  %s3721_s20 = smov 8  }
 0x153   : > { %2973 = dma.hbm_to_vmem [thread:$0]  (!%p4137_p12), %s4131_s15, 256, %s4133_s3, %s4141_s13, %s3720_s14, %s3720_s14, %s3721_s20  }
 0x154   : > { %s4516_s17 = sld [smem:[#allocation38_spill]] }
 0x15a   : > { %p4517_p8 = scmp.ne.s32.totalorder %s4516_s17, 0 }
 0x15b   : > { %s4172_s24 = sand.u32 (!%p4517_p8), 1, %s3691_s26  }
 0x15c   : > { %520 = sbr.rel (%p4517_p8) target bundleno = 2845 (0xb1d), region = 72  ;;  %s2584_s21 = sshll.u32 (!%p4517_p8), %s4172_s24, 4 }
 0x15d   : > { %s523_s16 = scalar_lea.sflag (!%p4517_p8), [#allocation7], %s4172_s24  ;;  %s4178_s25 = scalar_lea.vmem (!%p4517_p8), [#allocation6], %s2584_s21 }
 0x163   : > { %3654 = dma.done.wait (%p4112_p6), %s523_s16, 256  }
 0x164   : > { %3656 = vsyncadd (%p4112_p6), %s523_s16, 4294967040  ;;  %s4518_s15 = sld [smem:[#allocation37_spill]] }
 0x16a   : > { %p4519_p10 = scmp.eq.s32.totalorder %s4518_s15, 0 }
 0x16c   : > { %3658 = dma.done.wait (%p4519_p10), [#allocation10], 32   ;;  %p4520_p11 = pmov %p4519_p10 }
 0x16d   : > { %p4521_p12 = pmov %p4519_p10 }
 0x16e   : > { %3660 = vsyncadd (%p4520_p11), [#allocation10], 4294967264 }
 0x16f   : > { %3662 = dma.done.wait (%p4521_p12), [#allocation13], 3120   ;;  %p4522_p0 = pmov %p4519_p10 }
 0x171   : > { %3664 = vsyncadd (%p4522_p0), [#allocation13], 4294964176  ;;  %p4523_p5 = pmov %p4522_p0 }
 0x172   : > { %p4524_p7 = pmov %p4522_p0 }
 0x173   : > { %3666 = dma.done.wait (%p4523_p5), [#allocation16], 1040  }
 0x174   : > { %3668 = vsyncadd (%p4524_p7), [#allocation16], 4294966256  ;;  %p4525_p6 = pmov %p4522_p0 }
 0x175   : > { %p4526_p9 = pmov %p4522_p0 }
 0x176   : > { %3670 = dma.done.wait (%p4525_p6), [#allocation19], 32  }
 0x177   : > { %3672 = vsyncadd (%p4526_p9), [#allocation19], 4294967264  ;;  %p4527_p4 = pmov %p4522_p0 }
 0x178   : > { %p4528_p13 = pmov %p4522_p0 }
 0x179   : > { %3674 = dma.done.wait (%p4527_p4), [#allocation22], 4160  }
 0x17a   : > { %3676 = vsyncadd (%p4528_p13), [#allocation22], 4294963136  ;;  %p4529_p1 = pmov %p4522_p0 }
 0x17b   : > { %p4530_p3 = pmov %p4522_p0 }
 0x17c   : > { %3678 = dma.done.wait (%p4529_p1), [#allocation25], 4112  }
 0x17d   : > { %3680 = vsyncadd (%p4530_p3), [#allocation25], 4294963184  ;;  %v618_v0 = vld [vmem:[%s4178_s25] sm:$0xff]  ;;  %v619_v1 = vld [vmem:[%s4178_s25 + $0x8] sm:$0xff]  ;;  %v3722_v4 = vmov 0.0   ;;  %v3723_v30 = vmov 0   ;;  %v696_v53 = vlaneseq }
 0x17e   : > { %622 = vadd.xlane.f32.xlu0 %v618_v0  ;;  %v3065_v2 = vld [vmem:[#allocation12 + $0x4] ss:$12 sps:$4 sm:$0xff]   ;;  %v3067_v3 = vld [vmem:[#allocation12] ss:$12 sps:$4 sm:$0xff]   ;;  %2793 = vmatprep.subr.bf16.mxu1 %v3722_v4  ;;  %v3068_v5 = vld [vmem:[#allocation12 + $0x8] ss:$12 sps:$4 sm:$0xff]  }
 0x17f   : > { %v3069_v6 = vld [vmem:[#allocation12 + $0x1c] ss:$12 sps:$4 sm:$0xff]   ;;  %839 = vmatprep.subr.bf16.mxu0 %v3065_v2  ;;  %2794 = vmatpush3.bf16.msra.mxu1 %v3068_v5  ;;  %v3071_v15 = vld [vmem:[#allocation12 + $0x18] ss:$12 sps:$4 sm:$0xff]   ;;  %v3072_v16 = vld [vmem:[#allocation12 + $0x20] ss:$12 sps:$4 sm:$0xff]  }
 0x180   : > { %840 = vmatpush1.bf16.msra.mxu0 %v3067_v3  ;;  %2795 = vmatprep.subr.bf16.mxu1 %v3722_v4  ;;  %v3073_v17 = vld [vmem:[#allocation12 + $0x34] ss:$12 sps:$4 sm:$0xff]   ;;  %v3075_v18 = vld [vmem:[#allocation12 + $0x30] ss:$12 sps:$4 sm:$0xff]   ;;  %v3076_v19 = vld [vmem:[#allocation12 + $0x38] ss:$12 sps:$4 sm:$0xff]  }
 0x181   : > { %841 = vmatprep.subr.bf16.mxu0 %v3069_v6  ;;  %v3077_v20 = vld [vmem:[#allocation12 + $0x4c] ss:$12 sps:$4 sm:$0xff]   ;;  %v3079_v21 = vld [vmem:[#allocation12 + $0x48] ss:$12 sps:$4 sm:$0xff]   ;;  %v3080_v22 = vld [vmem:[#allocation12 + $0x50] ss:$12 sps:$4 sm:$0xff]   ;;  %871 = vmatprep.mubr.bf16.mxu0 %v3723_v30 }
 0x182   : > { %624 = vadd.xlane.f32.xlu0 %v619_v1  ;;  %v3081_v23 = vld [vmem:[#allocation12 + $0x64] ss:$12 sps:$4 sm:$0xff]   ;;  %v3083_v24 = vld [vmem:[#allocation12 + $0x60] ss:$12 sps:$4 sm:$0xff]   ;;  %v3084_v25 = vld [vmem:[#allocation12 + $0x68] ss:$12 sps:$4 sm:$0xff]  }
 0x183   : > { %2796 = vmatpush3.bf16.msra.mxu1 %v3072_v16  ;;  %v3085_v26 = vld [vmem:[#allocation12 + $0x7c] ss:$12 sps:$4 sm:$0xff]   ;;  %v3087_v27 = vld [vmem:[#allocation12 + $0x78] ss:$12 sps:$4 sm:$0xff]   ;;  %v3088_v28 = vld [vmem:[#allocation12 + $0x80] ss:$12 sps:$4 sm:$0xff]  }
 0x184   : > { %842 = vmatpush1.bf16.msra.mxu0 %v3071_v15  ;;  %2797 = vmatprep.subr.bf16.mxu1 %v3722_v4  ;;  %v3089_v29 = vld [vmem:[#allocation12 + $0x94] ss:$12 sps:$4 sm:$0xff]   ;;  %vm3724_vm0 = vmmov 0   ;;  %v3091_v31 = vld [vmem:[#allocation12 + $0x90] ss:$12 sps:$4 sm:$0xff]   ;;  %v4238_v54 = vshrl.u32 %v696_v53, 7 }
 0x185   : > { %843 = vmatprep.subr.bf16.mxu0 %v3073_v17  ;;  %2809 = vmatprep.mubr.msk.bf16.mxu1 %vm3724_vm0, %v3722_v4  ;;  %v3092_v32 = vld [vmem:[#allocation12 + $0x98] ss:$12 sps:$4 sm:$0xff]   ;;  %v3095_v34 = vld [vmem:[#allocation12 + $0xa8] ss:$12 sps:$4 sm:$0xff]   ;;  %v3096_v35 = vld [vmem:[#allocation12 + $0xb0] ss:$12 sps:$4 sm:$0xff]  }
 0x186   : > { %v3093_v33 = vld [vmem:[#allocation12 + $0xac] ss:$12 sps:$4 sm:$0xff]   ;;  %v2598_v44 = vld [vmem:[#allocation9] ss:$0 sm:$0xff]  ;;  %v2599_v48 = vld [vmem:[#allocation11] ss:$0 sm:$0xff] }
 0x187   : > { %2798 = vmatpush3.bf16.msra.mxu1 %v3076_v19  ;;  %v698_v55 = vsub.s32 0, %v4238_v54  ;;  %v694_v56 = vld [vmem:[#allocation14] sm:$0x7]  ;;  %v706_v57 = vsub.s32 2, %v4238_v54  ;;  %v702_v58 = vsub.s32 1, %v4238_v54  ;;  %vm926_vm1 = vcmask 261120  }
 0x188   : > { %844 = vmatpush1.bf16.msra.mxu0 %v3075_v18  ;;  %2799 = vmatprep.subr.bf16.mxu1 %v3722_v4  ;;  %s3725_s1 = smov 96   ;;  %s3726_s3 = smov 32   ;;  %vm1189_vm4 = vcmask 130048   ;;  %vm1465_vm5 = vcmask 523520   ;;  %vm1472_vm6 = vcmask 785920   ;;  %vm1479_vm7 = vcmask 1048320  }
 0x189   : > { %845 = vmatprep.subr.bf16.mxu0 %v3077_v20  ;;  %v699_v59 = vrot.slane %v694_v56, %v698_v55  ;;  %v707_v60 = vrot.slane %v694_v56, %v706_v57  ;;  %v703_v63 = vrot.slane %v694_v56, %v702_v58  ;;  %s3727_s30 = smov 64   ;;  %s616_s13 = scalar_lea.vmem [#allocation27], %s2584_s21 }
 0x18a   : > { %s2378_s19 = sshll.u32 %s616_s13, 4  ;;  %s2714_s14 = sshll.u32 %s4518_s15, 8  ;;  %s4424_s19 = int_to_ptr.vmem [resolvable:$true] %s2378_s19 }
 0x18b   : > { %2800 = vmatpush3.bf16.msra.mxu1 %v3080_v22  ;;  %s4531_s16 = sld [smem:[#allocation42_spill]]  ;;  %s2365_s21 = scalar_lea.sflag [#allocation8], %s4172_s24 }
 0x18c   : > { %846 = vmatpush1.bf16.msra.mxu0 %v3079_v21  ;;  %2801 = vmatprep.subr.bf16.mxu1 %v3722_v4  ;;  %p4532_p8 = scmp.ne.s32.totalorder %s4512_s22, 0  ;;  %s3729_s15 = smov [#allocation27]  }
 0x18d   : > { %847 = vmatprep.subr.bf16.mxu0 %v3081_v23 }
 0x18f   : > { %2802 = vmatpush3.bf16.msra.mxu1 %v3084_v25 }
 0x190   : > { %848 = vmatpush1.bf16.msra.mxu0 %v3083_v24  ;;  %2803 = vmatprep.subr.bf16.mxu1 %v3722_v4 }
 0x191   : > { %849 = vmatprep.subr.bf16.mxu0 %v3085_v26 }
 0x193   : > { %2804 = vmatpush3.bf16.msra.mxu1 %v3088_v28 }
 0x194   : > { %850 = vmatpush1.bf16.msra.mxu0 %v3087_v27  ;;  %2805 = vmatprep.subr.bf16.mxu1 %v3722_v4 }
 0x195   : > { %851 = vmatprep.subr.bf16.mxu0 %v3089_v29 }
 0x197   : > { %2806 = vmatpush3.bf16.msra.mxu1 %v3092_v32 }
 0x198   : > { %852 = vmatpush1.bf16.msra.mxu0 %v3091_v31  ;;  %2807 = vmatprep.subr.bf16.mxu1 %v3722_v4 }
 0x199   : > { %853 = vmatprep.subr.bf16.mxu0 %v3093_v33 }
 0x19b   : > { %2808 = vmatpush3.bf16.msra.mxu1 %v3096_v35 }
 0x19c   : > { %854 = vmatpush1.bf16.msra.mxu0 %v3095_v34  ;;  %2813 = vmatprep.subr.bf16.mxu1 %v3722_v4 }
 0x19d   : > { %2837 = vmatprep.subr.bf16.mxu0 %v3722_v4 }
 0x20b   : > { %v623_v7 = vpop.xlane.xlu0 %622 }
 0x20c   : > { %v627_v8 = vmul.f32 0.0078125, %v623_v7 }
 0x20e   : > { %v4212_v9 = vsub.f32 %v618_v0, %v627_v8 }
 0x20f   : > { %v625_v10 = vpop.xlane.xlu0 %624 }
 0x210   : > { %v628_v11 = vmul.f32 0.0078125, %v625_v10  ;;  %v631_v12 = vmul.f32 %v4212_v9, %v4212_v9 }
 0x212   : > { %v4216_v13 = vsub.f32 %v619_v1, %v628_v11  ;;  %633 = vadd.xlane.f32.xlu1 %v631_v12 }
 0x214   : > { %v632_v14 = vmul.f32 %v4216_v13, %v4216_v13 }
 0x216   : > { %635 = vadd.xlane.f32.xlu1 %v632_v14 }
 0x29f   : > { %v634_v36 = vpop.xlane.xlu1 %633 }
 0x2a0   : > { %v637_v37 = vmul.f32 0.0078125, %v634_v36 }
 0x2a2   : > { %v639_v38 = vadd.f32 1e-05, %v637_v37 }
 0x2a3   : > { %v636_v39 = vpop.xlane.xlu1 %635 }
 0x2a4   : > { %3185 = vrsqrt.f32 %v639_v38  ;;  %v638_v40 = vmul.f32 0.0078125, %v636_v39  ;;  %v984_v38 = vand.u32 127, %v696_v53  ;;  %v982_v39 = vadd.s32 8, %v4238_v54 }
 0x2a6   : > { %v640_v41 = vadd.f32 1e-05, %v638_v40  ;;  %vm985_vm2 = vcmp.le.s32.totalorder %v984_v38, %v4238_v54  ;;  %vm986_vm3 = vcmp.le.s32.totalorder %v984_v38, %v982_v39  ;;  %v3728_v40 = vmov -1e+09  }
 0x2a8   : > { %3187 = vrsqrt.f32 %v640_v41  ;;  %v987_v41 = vsel %vm985_vm2, 0.0, %v3728_v40 }
 0x2ae   : > { %v3186_v42 = vpop.eup %3185 }
 0x2af   : > { %v643_v43 = vmul.f32 %v3186_v42, %v4212_v9 }
 0x2b1   : > { %v651_v47 = vmul.f32 %v2598_v44, %v643_v43  ;;  %v988_v43 = vsel %vm986_vm3, 0.0, %v3728_v40 }
 0x2b2   : > { %v3188_v45 = vpop.eup %3187 }
 0x2b3   : > { %v644_v46 = vmul.f32 %v3188_v45, %v4216_v13  ;;  %v659_v50 = vadd.f32 %v2599_v48, %v651_v47 }
 0x2b5   : > { %v652_v49 = vmul.f32 %v2598_v44, %v644_v46 }
 0x2b7   : > { %v660_v51 = vadd.f32 %v2599_v48, %v652_v49 }
 0x2b9   : > { %v661_v52 = vpack.c.bf16 %v660_v51, %v659_v50 }
 0x2bb   : > { %872 = vmatmul.mubr.bf16.vlgmr.msra.gmra.mrb[0].mxu0 %v661_v52  ;;  %2810 = vmatmul.mubr.bf16.vlgmr.msra.gmra.mrb[0].mxu1 %v661_v52 }
 0x2bc   : > { %2815 = vmatprep.mubr.msk.bf16.mxu1 %vm3724_vm0, %v3722_v4  ;;  %2839 = vmatprep.mubr.msk.bf16.mxu0 %vm3724_vm0, %v3722_v4 }
 0x38e   : > { %v873_v61 = vpop.f32.mrb[0].mxu0  ;;  %v916_v62 = vpop.f32.mrb[0].mxu1 }
 0x38f   : > { %v874_v0 = vadd.f32 %v873_v61, %v699_v59  ;;  %v875_v1 = vpop.f32.mrb[1].mxu0  ;;  %v2811_v2 = vpop.f32.mrb[1].mxu1  ;;  %v917_v6 = vadd.f32 %v916_v62, %v707_v60 }
 0x390   : > { %v877_v3 = vpop.f32.mrb[2].mxu0  ;;  %v919_v5 = vpop.f32.mrb[2].mxu1  ;;  %v876_v11 = vadd.f32 %v875_v1, %v703_v63 }
 0x391   : > { %v878_v7 = vadd.f32 %v877_v3, %v699_v59  ;;  %v920_v8 = vadd.f32 %v919_v5, %v707_v60  ;;  %v879_v9 = vpop.f32.mrb[3].mxu0  ;;  %v2812_v10 = vpop.f32.mrb[3].mxu1  ;;  %v923_v13 = vmul.f32 0.17677669, %v874_v0 }
 0x392   : > { %v880_v12 = vadd.f32 %v879_v9, %v703_v63 }
 0x393   : > { %v924_v14 = vmul.f32 0.17677669, %v878_v7  ;;  %v4249_v15 = vpack.c.bf16 %v920_v8, %v917_v6 }
 0x394   : > { %v928_v16 = vpack.c.bf16 %v880_v12, %v876_v11 }
 0x395   : > { %v925_v17 = vpack.c.bf16 %v924_v14, %v923_v13  ;;  %931 = vst.msk [vmem:[#allocation4] sm:$0xff] %vm926_vm1, %v4249_v15 }
 0x396   : > { %929 = vst.msk [vmem:[#allocation3] sm:$0xff] %vm926_vm1, %v928_v16  ;;  %939 = vrot.lane.b32.xlu0 %v928_v16, %s3725_s1 }
 0x397   : > { %927 = vst.msk [vmem:[#allocation2] sm:$0xff] %vm926_vm1, %v925_v17  ;;  %933 = vrot.lane.b32.xlu1 %v925_v17, %s3725_s1 }
 0x39a   : > { %970 = vrot.lane.b32.xlu0 %v928_v16, %s3726_s3 }
 0x39b   : > { %955 = vrot.lane.b32.xlu1 %v928_v16, %s3727_s30 }
 0x39c   : > { %v997_v18 = vld [vmem:[#allocation4] sm:$0xff] }
 0x39d   : > { %2838 = vmatpush3.bf16.msra.mxu0 %v997_v18  ;;  %v993_v19 = vld [vmem:[#allocation3] sm:$0xff] }
 0x39e   : > { %v1005_v20 = vsel %vm926_vm1, %v993_v19, 0  ;;  %2849 = vmatprep.subr.bf16.mxu0 %v3722_v4  ;;  %v989_v21 = vld [vmem:[#allocation2] sm:$0xff] }
 0x39f   : > { %2814 = vmatpush3.bf16.xpose.msra.mxu1 %v1005_v20  ;;  %950 = vrot.lane.b32.xlu1 %v925_v17, %s3727_s30 }
 0x3a0   : > { %2819 = vmatprep.subr.bf16.mxu1 %v3722_v4 }
 0x3a3   : > { %965 = vrot.lane.b32.xlu1 %v925_v17, %s3726_s3 }
 0x3a6   : > { %2816 = vmatmul.mubr.msk.bf16.vlgmr.msra.gmra.mrb[4].mxu1 %vm926_vm1, %v989_v21 }
 0x3a7   : > { %2821 = vmatprep.mubr.msk.bf16.mxu1 %vm3724_vm0, %v3722_v4 }
 0x408   : > { %v940_v22 = vpop.permute.xlu0 %939 }
 0x409   : > { %943 = vst.msk [vmem:[#allocation3 + $0x8] sm:$0xff] %vm926_vm1, %v940_v22  ;;  %v934_v23 = vpop.permute.xlu1 %933 }
 0x40a   : > { %937 = vst.msk [vmem:[#allocation2 + $0x8] sm:$0xff] %vm926_vm1, %v934_v23 }
 0x40c   : > { %v971_v24 = vpop.permute.xlu0 %970 }
 0x40d   : > { %974 = vst.msk [vmem:[#allocation3 + $0x18] sm:$0xff] %vm926_vm1, %v971_v24  ;;  %v956_v25 = vpop.permute.xlu1 %955 }
 0x40e   : > { %959 = vst.msk [vmem:[#allocation3 + $0x10] sm:$0xff] %vm926_vm1, %v956_v25 }
 0x410   : > { %v994_v26 = vld [vmem:[#allocation3 + $0x8] sm:$0xff] }
 0x411   : > { %v951_v27 = vpop.permute.xlu1 %950  ;;  %v1052_v28 = vsel %vm926_vm1, %v994_v26, 0  ;;  %v990_v32 = vld [vmem:[#allocation2 + $0x8] sm:$0xff] }
 0x412   : > { %954 = vst.msk [vmem:[#allocation2 + $0x10] sm:$0xff] %vm926_vm1, %v951_v27  ;;  %2820 = vmatpush3.bf16.xpose.msra.mxu1 %v1052_v28 }
 0x413   : > { %2825 = vmatprep.subr.bf16.mxu1 %v3722_v4 }
 0x414   : > { %v996_v34 = vld [vmem:[#allocation3 + $0x18] sm:$0xff] }
 0x415   : > { %v966_v29 = vpop.permute.xlu1 %965  ;;  %v995_v31 = vld [vmem:[#allocation3 + $0x10] sm:$0xff]  ;;  %v1146_v36 = vsel %vm926_vm1, %v996_v34, 0 }
 0x416   : > { %969 = vst.msk [vmem:[#allocation2 + $0x18] sm:$0xff] %vm926_vm1, %v966_v29  ;;  %v1099_v33 = vsel %vm926_vm1, %v995_v31, 0 }
 0x419   : > { %2822 = vmatmul.mubr.msk.bf16.vlgmr.msra.gmra.mrb[8].mxu1 %vm926_vm1, %v990_v32  ;;  %v991_v35 = vld [vmem:[#allocation2 + $0x10] sm:$0xff] }
 0x41a   : > { %2826 = vmatpush3.bf16.xpose.msra.mxu1 %v1099_v33  ;;  %2827 = vmatprep.mubr.msk.bf16.mxu1 %vm3724_vm0, %v3722_v4 }
 0x41b   : > { %2831 = vmatprep.subr.bf16.mxu1 %v3722_v4 }
 0x41d   : > { %v992_v37 = vld [vmem:[#allocation2 + $0x18] sm:$0xff] }
 0x421   : > { %2828 = vmatmul.mubr.msk.bf16.vlgmr.msra.gmra.mrb[12].mxu1 %vm926_vm1, %v991_v35 }
 0x422   : > { %2832 = vmatpush3.bf16.xpose.msra.mxu1 %v1146_v36  ;;  %2833 = vmatprep.mubr.msk.bf16.mxu1 %vm3724_vm0, %v3722_v4 }
 0x423   : > { %2843 = vmatprep.subr.bf16.mxu1 %v3722_v4 }
 0x429   : > { %2834 = vmatmul.mubr.msk.bf16.vlgmr.msra.gmra.mrb[16].mxu1 %vm926_vm1, %v992_v37 }
 0x42a   : > { %2845 = vmatprep.mubr.msk.bf16.mxu1 %vm3724_vm0, %v3722_v4 }
 0x479   : > { %v1041_v42 = vpop.f32.mrb[4].mxu1 }
 0x47a   : > { %v1042_v44 = vadd.f32 %v1041_v42, %v987_v41  ;;  %v2817_v45 = vpop.f32.mrb[5].mxu1 }
 0x47b   : > { %v1044_v46 = vpop.f32.mrb[6].mxu1 }
 0x47c   : > { %v1045_v47 = vadd.f32 %v1044_v46, %v988_v43  ;;  %v2818_v48 = vpop.f32.mrb[7].mxu1  ;;  %v1190_v49 = vsel %vm1189_vm4, %v1042_v44, -inf }
 0x47d   : > { %1191 = vmax.xlane.f32.xlu0 %v1190_v49 }
 0x47e   : > { %v1193_v50 = vsel %vm1189_vm4, %v1045_v47, -inf }
 0x47f   : > { %1194 = vmax.xlane.f32.xlu1 %v1193_v50 }
 0x4ec   : > { %v1088_v51 = vpop.f32.mrb[8].mxu1 }
 0x4ed   : > { %v1089_v52 = vadd.f32 %v1088_v51, %v987_v41  ;;  %v2823_v53 = vpop.f32.mrb[9].mxu1 }
 0x4ee   : > { %v1091_v56 = vpop.f32.mrb[10].mxu1 }
 0x4ef   : > { %v1092_v59 = vadd.f32 %v1091_v56, %v988_v43  ;;  %v2824_v60 = vpop.f32.mrb[11].mxu1  ;;  %v1196_v61 = vsel %vm1189_vm4, %v1089_v52, -inf }
 0x4f0   : > { %1197 = vmax.xlane.f32.xlu0 %v1196_v61 }
 0x4f1   : > { %v1199_v62 = vsel %vm1189_vm4, %v1092_v59, -inf }
 0x4f4   : > { %1200 = vmax.xlane.f32.xlu0 %v1199_v62  ;;  %v1135_v63 = vpop.f32.mrb[12].mxu1 }
 0x4f5   : > { %v1136_v0 = vadd.f32 %v1135_v63, %v987_v41  ;;  %v2829_v1 = vpop.f32.mrb[13].mxu1 }
 0x4f6   : > { %v1138_v2 = vpop.f32.mrb[14].mxu1 }
 0x4f7   : > { %v1139_v3 = vadd.f32 %v1138_v2, %v988_v43  ;;  %v2830_v5 = vpop.f32.mrb[15].mxu1  ;;  %v1202_v6 = vsel %vm1189_vm4, %v1136_v0, -inf }
 0x4f8   : > { %1203 = vmax.xlane.f32.xlu0 %v1202_v6 }
 0x4f9   : > { %v1205_v7 = vsel %vm1189_vm4, %v1139_v3, -inf }
 0x4fa   : > { %1206 = vmax.xlane.f32.xlu1 %v1205_v7 }
 0x4fc   : > { %v1182_v8 = vpop.f32.mrb[16].mxu1 }
 0x4fd   : > { %v1183_v9 = vadd.f32 %v1182_v8, %v987_v41  ;;  %v2835_v10 = vpop.f32.mrb[17].mxu1 }
 0x4fe   : > { %v1185_v11 = vpop.f32.mrb[18].mxu1 }
 0x4ff   : > { %v2836_v12 = vpop.f32.mrb[19].mxu1  ;;  %v1208_v13 = vsel %vm1189_vm4, %v1183_v9, -inf  ;;  %v1186_v24 = vadd.f32 %v1185_v11, %v988_v43 }
 0x500   : > { %1209 = vmax.xlane.f32.xlu0 %v1208_v13 }
 0x501   : > { %v1211_v25 = vsel %vm1189_vm4, %v1186_v24, -inf }
 0x50a   : > { %v1192_v14 = vpop.xlane.xlu0 %1191 }
 0x50b   : > { %v1214_v16 = vsub.f32 %v1042_v44, %v1192_v14  ;;  %960 = vrot.lane.b32.xlu1 %v4249_v15, %s3727_s30 }
 0x50c   : > { %v1195_v17 = vpop.xlane.xlu1 %1194 }
 0x50d   : > { %v1222_v18 = vmul.f32 1.442695, %v1214_v16  ;;  %v1215_v19 = vsub.f32 %v1045_v47, %v1195_v17 }
 0x50f   : > { %v1224_v20 = vmul.f32 1.442695, %v1215_v19  ;;  %3189 = vpow2.f32 %v1222_v18 }
 0x511   : > { %3191 = vpow2.f32 %v1224_v20 }
 0x516   : > { %945 = vrot.lane.b32.xlu0 %v4249_v15, %s3725_s1 }
 0x519   : > { %v3190_v21 = vpop.eup %3189 }
 0x51a   : > { %v1238_v61 = vsel %vm1189_vm4, %v3190_v21, 0.0 }
 0x51b   : > { %v4302_v22 = vpop.eup %3191 }
 0x51c   : > { %v1270_v23 = vpack.c.bf16 %v4302_v22, %v3190_v21  ;;  %v1241_v7 = vsel %vm1189_vm4, %v4302_v22, 0.0 }
 0x51e   : > { %2840 = vmatmul.mubr.msk.bf16.vlgmr.msra.gmra.mrb[4].mxu0 %vm1189_vm4, %v1270_v23 }
 0x51f   : > { %2851 = vmatprep.mubr.msk.bf16.mxu0 %vm3724_vm0, %v3722_v4 }
 0x52f   : > { %1212 = vmax.xlane.f32.xlu1 %v1211_v25  ;;  %v3097_v25 = vld [vmem:[#allocation15] sm:$0xff]  }
 0x540   : > { %975 = vrot.lane.b32.xlu1 %v4249_v15, %s3726_s3 }
 0x57d   : > { %v1198_v26 = vpop.xlane.xlu0 %1197 }
 0x57e   : > { %v1216_v27 = vsub.f32 %v1089_v52, %v1198_v26 }
 0x580   : > { %v1226_v28 = vmul.f32 1.442695, %v1216_v27 }
 0x581   : > { %v1201_v29 = vpop.xlane.xlu0 %1200 }
 0x582   : > { %3193 = vpow2.f32 %v1226_v28  ;;  %v1217_v31 = vsub.f32 %v1092_v59, %v1201_v29  ;;  %v3098_v28 = vld [vmem:[#allocation15 + $0x8] sm:$0xff]  }
 0x584   : > { %v1228_v32 = vmul.f32 1.442695, %v1217_v31 }
 0x585   : > { %v1204_v33 = vpop.xlane.xlu0 %1203 }
 0x586   : > { %3195 = vpow2.f32 %v1228_v32  ;;  %v1218_v34 = vsub.f32 %v1136_v0, %v1204_v33 }
 0x587   : > { %v1207_v35 = vpop.xlane.xlu1 %1206 }
 0x588   : > { %v1230_v36 = vmul.f32 1.442695, %v1218_v34  ;;  %v1219_v37 = vsub.f32 %v1139_v3, %v1207_v35 }
 0x58a   : > { %3197 = vpow2.f32 %v1230_v36  ;;  %v1232_v38 = vmul.f32 1.442695, %v1219_v37 }
 0x58b   : > { %v961_v39 = vpop.permute.xlu1 %960 }
 0x58c   : > { %v3194_v40 = vpop.eup %3193  ;;  %3199 = vpow2.f32 %v1232_v38  ;;  %964 = vst.msk [vmem:[#allocation4 + $0x10] sm:$0xff] %vm926_vm1, %v961_v39  ;;  %v3099_v38 = vld [vmem:[#allocation15 + $0x10] sm:$0xff]  }
 0x58d   : > { %v1210_v15 = vpop.xlane.xlu0 %1209  ;;  %v1244_v41 = vsel %vm1189_vm4, %v3194_v40, 0.0 }
 0x58e   : > { %v1220_v42 = vsub.f32 %v1183_v9, %v1210_v15  ;;  %1245 = vadd.xlane.f32.xlu1 %v1244_v41 }
 0x590   : > { %v3196_v43 = vpop.eup %3195  ;;  %v1234_v44 = vmul.f32 1.442695, %v1220_v42 }
 0x591   : > { %v946_v45 = vpop.permute.xlu0 %945  ;;  %v1247_v46 = vsel %vm1189_vm4, %v3196_v43, 0.0  ;;  %v1271_v56 = vpack.c.bf16 %v3196_v43, %v3194_v40 }
 0x592   : > { %3201 = vpow2.f32 %v1234_v44  ;;  %949 = vst.msk [vmem:[#allocation4 + $0x8] sm:$0xff] %vm926_vm1, %v946_v45  ;;  %1248 = vadd.xlane.f32.xlu0 %v1247_v46  ;;  %v3100_v46 = vld [vmem:[#allocation15 + $0x18] sm:$0xff]  }
 0x593   : > { %v999_v47 = vld [vmem:[#allocation4 + $0x10] sm:$0xff] }
 0x594   : > { %v3198_v48 = vpop.eup %3197  ;;  %2850 = vmatpush3.bf16.msra.mxu0 %v999_v47 }
 0x595   : > { %v1250_v49 = vsel %vm1189_vm4, %v3198_v48, 0.0  ;;  %2861 = vmatprep.subr.bf16.mxu0 %v3722_v4 }
 0x596   : > { %v3200_v50 = vpop.eup %3199  ;;  %1251 = vadd.xlane.f32.xlu0 %v1250_v49  ;;  %v3102_v49 = vld [vmem:[#allocation15 + $0x28] sm:$0xff]  }
 0x597   : > { %v1272_v51 = vpack.c.bf16 %v3200_v50, %v3198_v48  ;;  %v1253_v52 = vsel %vm1189_vm4, %v3200_v50, 0.0  ;;  %v3101_v48 = vld [vmem:[#allocation15 + $0x20] sm:$0xff]   ;;  %v3103_v50 = vld [vmem:[#allocation15 + $0x30] sm:$0xff]  }
 0x599   : > { %2852 = vmatmul.mubr.msk.bf16.vlgmr.msra.gmra.mrb[8].mxu0 %vm1189_vm4, %v1272_v51  ;;  %v998_v53 = vld [vmem:[#allocation4 + $0x8] sm:$0xff] }
 0x59a   : > { %1254 = vadd.xlane.f32.xlu0 %v1253_v52  ;;  %2844 = vmatpush3.bf16.msra.mxu1 %v998_v53  ;;  %v3104_v51 = vld [vmem:[#allocation15 + $0x38] sm:$0xff]  }
 0x59b   : > { %2855 = vmatprep.subr.bf16.mxu1 %v3722_v4  ;;  %2877 = vmatprep.mubr.msk.bf16.mxu0 %vm3724_vm0, %v3722_v4 }
 0x59c   : > { %v3202_v59 = vpop.eup %3201  ;;  %2862 = vmatpush3.bf16.msra.mxu0 %v3097_v25 }
 0x59d   : > { %2846 = vmatmul.mubr.msk.bf16.vlgmr.msra.gmra.mrb[20].mxu1 %vm1189_vm4, %v1271_v56  ;;  %v1256_v60 = vsel %vm1189_vm4, %v3202_v59, 0.0  ;;  %2863 = vmatprep.subr.bf16.mxu0 %v3722_v4 }
 0x59e   : > { %1257 = vadd.xlane.f32.xlu1 %v1256_v60  ;;  %2857 = vmatprep.mubr.msk.bf16.mxu1 %vm3724_vm0, %v3722_v4 }
 0x5a0   : > { %2864 = vmatpush3.bf16.msra.mxu0 %v3098_v28 }
 0x5a1   : > { %2865 = vmatprep.subr.bf16.mxu0 %v3722_v4 }
 0x5a2   : > { %1239 = vadd.xlane.f32.xlu1 %v1238_v61 }
 0x5a4   : > { %2866 = vmatpush3.bf16.msra.mxu0 %v3099_v38  ;;  %v3128_v38 = vld [vmem:[#allocation21 + $0x6c] ss:$16 sps:$4 sm:$0xff]  }
 0x5a5   : > { %2867 = vmatprep.subr.bf16.mxu0 %v3722_v4 }
 0x5a8   : > { %2868 = vmatpush3.bf16.msra.mxu0 %v3100_v46  ;;  %v3135_v46 = vld [vmem:[#allocation21 + $0xa0] ss:$16 sps:$4 sm:$0xff]  }
 0x5a9   : > { %2869 = vmatprep.subr.bf16.mxu0 %v3722_v4 }
 0x5ac   : > { %2870 = vmatpush3.bf16.msra.mxu0 %v3101_v48  ;;  %v3143_v48 = vld [vmem:[#allocation21 + $0xc4] ss:$16 sps:$4 sm:$0xff]  }
 0x5ad   : > { %2871 = vmatprep.subr.bf16.mxu0 %v3722_v4 }
 0x5b0   : > { %2872 = vmatpush3.bf16.msra.mxu0 %v3102_v49  ;;  %v3146_v49 = vld [vmem:[#allocation21 + $0xcc] ss:$16 sps:$4 sm:$0xff]  }
 0x5b1   : > { %2873 = vmatprep.subr.bf16.mxu0 %v3722_v4 }
 0x5b4   : > { %2874 = vmatpush3.bf16.msra.mxu0 %v3103_v50  ;;  %v3141_v50 = vld [vmem:[#allocation21 + $0xc0] ss:$16 sps:$4 sm:$0xff]  }
 0x5b5   : > { %2875 = vmatprep.subr.bf16.mxu0 %v3722_v4 }
 0x5b8   : > { %2876 = vmatpush3.bf16.msra.mxu0 %v3104_v51  ;;  %v3144_v51 = vld [vmem:[#allocation21 + $0xc8] ss:$16 sps:$4 sm:$0xff]  }
 0x5bc   : > { %v1213_v62 = vpop.xlane.xlu1 %1212 }
 0x5bd   : > { %v1221_v63 = vsub.f32 %v1186_v24, %v1213_v62 }
 0x5bf   : > { %v1236_v0 = vmul.f32 1.442695, %v1221_v63 }
 0x5c0   : > { %v976_v1 = vpop.permute.xlu1 %975 }
 0x5c1   : > { %3203 = vpow2.f32 %v1236_v0  ;;  %979 = vst.msk [vmem:[#allocation4 + $0x18] sm:$0xff] %vm926_vm1, %v976_v1 }
 0x5c8   : > { %v1000_v2 = vld [vmem:[#allocation4 + $0x18] sm:$0xff] }
 0x5c9   : > { %2856 = vmatpush3.bf16.msra.mxu1 %v1000_v2 }
 0x5cb   : > { %v3204_v3 = vpop.eup %3203 }
 0x5cc   : > { %v1259_v5 = vsel %vm1189_vm4, %v3204_v3, 0.0  ;;  %v1273_v6 = vpack.c.bf16 %v3204_v3, %v3202_v59 }
 0x5cd   : > { %1260 = vadd.xlane.f32.xlu0 %v1259_v5  ;;  %v2632_v5 = vld [vmem:[#allocation17] ss:$0 sm:$0xff] }
 0x5ce   : > { %2858 = vmatmul.mubr.msk.bf16.vlgmr.msra.gmra.mrb[24].mxu1 %vm1189_vm4, %v1273_v6 }
 0x5cf   : > { %1883 = vmatprep.mubr.bf16.mxu1 %v3723_v30 }
 0x5d1   : > { %1242 = vadd.xlane.f32.xlu0 %v1241_v7 }
 0x5f1   : > { %v1311_v8 = vpop.f32.mrb[4].mxu0 }
 0x5f2   : > { %v2841_v9 = vpop.f32.mrb[5].mxu0 }
 0x5f3   : > { %v1314_v10 = vpop.f32.mrb[6].mxu0 }
 0x5f4   : > { %v2842_v11 = vpop.f32.mrb[7].mxu0 }
 0x61b   : > { %v1246_v13 = vpop.xlane.xlu1 %1245 }
 0x61f   : > { %v1249_v12 = vpop.xlane.xlu0 %1248 }
 0x623   : > { %v1252_v14 = vpop.xlane.xlu0 %1251 }
 0x627   : > { %v1255_v17 = vpop.xlane.xlu0 %1254 }
 0x62b   : > { %v1258_v16 = vpop.xlane.xlu1 %1257 }
 0x62f   : > { %v1240_v18 = vpop.xlane.xlu1 %1239 }
 0x630   : > { %3205 = vrcp.f32 %v1240_v18  ;;  %v3107_v18 = vld [vmem:[#allocation21 + $0x4] ss:$16 sps:$4 sm:$0xff]  }
 0x631   : > { %1851 = vmatprep.subr.bf16.mxu1 %v3107_v18  ;;  %v3155_v18 = vld [vmem:[#allocation24] sm:$0xff]  }
 0x63a   : > { %v3206_v21 = vpop.eup %3205 }
 0x63b   : > { %v1450_v23 = vmul.f32 %v3206_v21, %v1311_v8  ;;  %v3116_v21 = vld [vmem:[#allocation21 + $0x2c] ss:$16 sps:$4 sm:$0xff]  }
 0x65a   : > { %v1261_v19 = vpop.xlane.xlu0 %1260 }
 0x65e   : > { %v1243_v20 = vpop.xlane.xlu0 %1242 }
 0x65f   : > { %3207 = vrcp.f32 %v1243_v20  ;;  %v3113_v20 = vld [vmem:[#allocation21 + $0x24] ss:$16 sps:$4 sm:$0xff]  }
 0x660   : > { %3209 = vrcp.f32 %v1252_v14  ;;  %v3242_v14 = vld [vmem:[%s4178_s25 + $0x8] sm:$0xff] }
 0x661   : > { %3211 = vrcp.f32 %v1255_v17  ;;  %v3105_v17 = vld [vmem:[#allocation21] ss:$16 sps:$4 sm:$0xff]  }
 0x662   : > { %3213 = vrcp.f32 %v1246_v13  ;;  %1852 = vmatpush1.bf16.msra.mxu1 %v3105_v17  ;;  %v3154_v17 = vld [vmem:[#allocation24 + $0xc0] sm:$0xff]  }
 0x663   : > { %3215 = vrcp.f32 %v1249_v12  ;;  %1853 = vmatprep.subr.bf16.mxu1 %v3113_v20  ;;  %v3158_v20 = vld [vmem:[#allocation24 + $0xc8] sm:$0xff]  }
 0x664   : > { %3217 = vrcp.f32 %v1258_v16 }
 0x665   : > { %3219 = vrcp.f32 %v1261_v19  ;;  %v3110_v19 = vld [vmem:[#allocation21 + $0xc] ss:$16 sps:$4 sm:$0xff]  }
 0x666   : > { %1894 = vmatprep.subr.bf16.mxu0 %v3110_v19  ;;  %v3157_v19 = vld [vmem:[#allocation24 + $0x48] sm:$0xff]  }
 0x669   : > { %v3208_v22 = vpop.eup %3207 }
 0x66a   : > { %v1451_v24 = vmul.f32 %v3208_v22, %v1314_v10  ;;  %v3210_v29 = vpop.eup %3209  ;;  %v3241_v10 = vld [vmem:[%s4178_s25] sm:$0xff]  ;;  %s4422_s25 = scalar_lea.hbm %s4531_s16, %s2714_s14 }
 0x66b   : > { %v3212_v32 = vpop.eup %3211  ;;  %v3111_v22 = vld [vmem:[#allocation21 + $0x20] ss:$16 sps:$4 sm:$0xff]  }
 0x66c   : > { %v1399_v26 = vpop.f32.mrb[8].mxu0  ;;  %v1458_v27 = vpack.c.bf16 %v1451_v24, %v1450_v23  ;;  %v3214_v39 = vpop.eup %3213  ;;  %v3114_v23 = vld [vmem:[#allocation21 + $0x28] ss:$16 sps:$4 sm:$0xff]   ;;  %1854 = vmatpush1.bf16.msra.mxu1 %v3111_v22  ;;  %v3160_v22 = vld [vmem:[#allocation24 + $0x88] sm:$0xff]  }
 0x66d   : > { %v2853_v31 = vpop.f32.mrb[9].mxu0  ;;  %v1454_v34 = vmul.f32 %v3210_v29, %v1399_v26  ;;  %v3216_v41 = vpop.eup %3215 }
 0x66e   : > { %v1402_v33 = vpop.f32.mrb[10].mxu0  ;;  %1459 = vst.msk [vmem:[#allocation5] sm:$0xff] %vm926_vm1, %v1458_v27  ;;  %v3218_v53 = vpop.eup %3217 }
 0x66f   : > { %v1455_v35 = vmul.f32 %v3212_v32, %v1402_v33  ;;  %v2854_v36 = vpop.f32.mrb[11].mxu0  ;;  %v3220_v59 = vpop.eup %3219  ;;  %v3119_v33 = vld [vmem:[#allocation21 + $0x44] ss:$16 sps:$4 sm:$0xff]  }
 0x670   : > { %v1355_v37 = vpop.f32.mrb[20].mxu1  ;;  %v3120_v36 = vld [vmem:[#allocation21 + $0x48] ss:$16 sps:$4 sm:$0xff]   ;;  %1855 = vmatprep.subr.bf16.mxu1 %v3119_v33 }
 0x671   : > { %v1467_v40 = vpack.c.bf16 %v1455_v35, %v1454_v34  ;;  %v2847_v15 = vpop.f32.mrb[21].mxu1  ;;  %v1452_v43 = vmul.f32 %v3214_v39, %v1355_v37  ;;  %v3122_v34 = vld [vmem:[#allocation21 + $0x4c] ss:$16 sps:$4 sm:$0xff]   ;;  %v3117_v35 = vld [vmem:[#allocation21 + $0x40] ss:$16 sps:$4 sm:$0xff]   ;;  %v3170_v33 = vld [vmem:[#allocation24 + $0xe0] sm:$0xff]  }
 0x672   : > { %v1358_v42 = vpop.f32.mrb[22].mxu1  ;;  %1856 = vmatpush1.bf16.msra.mxu1 %v3117_v35  ;;  %v3125_v37 = vld [vmem:[#allocation21 + $0x64] ss:$16 sps:$4 sm:$0xff]   ;;  %v3123_v39 = vld [vmem:[#allocation21 + $0x60] ss:$16 sps:$4 sm:$0xff]  }
 0x673   : > { %v1453_v44 = vmul.f32 %v3216_v41, %v1358_v42  ;;  %1469 = vrot.lane.b32.xlu0 %v1467_v40, %s3727_s30  ;;  %v2848_v45 = vpop.f32.mrb[23].mxu1  ;;  %v3126_v40 = vld [vmem:[#allocation21 + $0x68] ss:$16 sps:$4 sm:$0xff]   ;;  %1857 = vmatprep.subr.bf16.mxu1 %v3125_v37  ;;  %v3131_v15 = vld [vmem:[#allocation21 + $0x84] ss:$16 sps:$4 sm:$0xff]   ;;  %v3174_v37 = vld [vmem:[#allocation24 + $0xe8] sm:$0xff]  }
 0x674   : > { %v3134_v41 = vld [vmem:[#allocation21 + $0x8c] ss:$16 sps:$4 sm:$0xff]   ;;  %v3129_v42 = vld [vmem:[#allocation21 + $0x80] ss:$16 sps:$4 sm:$0xff]   ;;  %v3172_v35 = vld [vmem:[#allocation24 + $0xa0] sm:$0xff]  }
 0x675   : > { %v1460_v47 = vpack.c.bf16 %v1453_v44, %v1452_v43  ;;  %v3132_v43 = vld [vmem:[#allocation21 + $0x88] ss:$16 sps:$4 sm:$0xff]   ;;  %v3137_v44 = vld [vmem:[#allocation21 + $0xa4] ss:$16 sps:$4 sm:$0xff]   ;;  %v3140_v45 = vld [vmem:[#allocation21 + $0xac] ss:$16 sps:$4 sm:$0xff]  }
 0x676   : > { %1858 = vmatpush1.bf16.msra.mxu1 %v3123_v39  ;;  %v3176_v39 = vld [vmem:[#allocation24 + $0xa8] sm:$0xff]  }
 0x677   : > { %1462 = vrot.lane.b32.xlu1 %v1460_v47, %s3726_s3  ;;  %1859 = vmatprep.subr.bf16.mxu1 %v3131_v15  ;;  %v3138_v47 = vld [vmem:[#allocation21 + $0xa8] ss:$16 sps:$4 sm:$0xff]   ;;  %s3613_s3 = sshll.u32 %s3729_s15, 4  ;;  %s3614_s3 = int_to_ptr.vmem [resolvable:$false] %s3613_s3 }
 0x678   : > { %v3178_v15 = vld [vmem:[#allocation24 + $0xf0] sm:$0xff]   ;;  %s3615_s30 = scalar_lea.vmem %s3614_s3, 512  ;;  %p3616_p12 = scmp.lt.s32.totalorder %s4424_s19, %s3614_s3 }
 0x67a   : > { %1860 = vmatpush1.bf16.msra.mxu1 %v3129_v42  ;;  %v3180_v42 = vld [vmem:[#allocation24 + $0xb0] sm:$0xff]  }
 0x67b   : > { %1861 = vmatprep.subr.bf16.mxu1 %v3137_v44  ;;  %v3182_v44 = vld [vmem:[#allocation24 + $0xf8] sm:$0xff]  }
 0x67e   : > { %1862 = vmatpush1.bf16.msra.mxu1 %v3135_v46  ;;  %v3184_v46 = vld [vmem:[#allocation24 + $0xb8] sm:$0xff]  }
 0x67f   : > { %1863 = vmatprep.subr.bf16.mxu1 %v3143_v48  ;;  %v1685_v48 = vsub.s32 3, %v4238_v54 }
 0x682   : > { %1864 = vmatpush1.bf16.msra.mxu1 %v3141_v50 }
 0x6a1   : > { %v1443_v52 = vpop.f32.mrb[24].mxu1 }
 0x6a2   : > { %v2859_v56 = vpop.f32.mrb[25].mxu1  ;;  %v1456_v61 = vmul.f32 %v3218_v53, %v1443_v52  ;;  %v3149_v52 = vld [vmem:[#allocation21 + $0xe4] ss:$16 sps:$4 sm:$0xff]   ;;  %v3147_v53 = vld [vmem:[#allocation21 + $0xe0] ss:$16 sps:$4 sm:$0xff]  }
 0x6a3   : > { %v1446_v60 = vpop.f32.mrb[26].mxu1  ;;  %v3150_v56 = vld [vmem:[#allocation21 + $0xe8] ss:$16 sps:$4 sm:$0xff]   ;;  %1865 = vmatprep.subr.bf16.mxu1 %v3149_v52 }
 0x6a4   : > { %v1457_v62 = vmul.f32 %v3220_v59, %v1446_v60  ;;  %v2860_v63 = vpop.f32.mrb[27].mxu1  ;;  %v3152_v59 = vld [vmem:[#allocation21 + $0xec] ss:$16 sps:$4 sm:$0xff]   ;;  %1866 = vmatpush1.bf16.msra.mxu1 %v3147_v53 }
 0x6a6   : > { %v1474_v0 = vpack.c.bf16 %v1457_v62, %v1456_v61 }
 0x6a8   : > { %1476 = vrot.lane.b32.xlu1 %v1474_v0, %s3725_s1  ;;  %s3609_s1 = scalar_lea.vmem %s4424_s19, 256 }
 0x6a9   : > { %p3610_p2 = scmp.ne.s32.totalorder %s4424_s19, %s3609_s1  ;;  %p3617_p0 = scmp.lt.s32.totalorder %s3615_s30, %s3609_s1 }
 0x6ab   : > { %p3611_p10 = pnand %p3610_p2, %p4532_p8  ;;  %p3618_p5 = por %p3617_p0, %p3616_p12 }
 0x6ad   : > { %p3612_p11 = pneg %p3611_p10 }
 0x6af   : > { %p3619_p7 = pnand %p3618_p5, %p3612_p11 }
 0x6e5   : > { %v1470_v2 = vpop.permute.xlu0 %1469 }
 0x6e9   : > { %v1463_v1 = vpop.permute.xlu1 %1462 }
 0x6ea   : > { %1466 = vst.msk [vmem:[#allocation5] sm:$0xff] %vm1465_vm5, %v1463_v1 }
 0x6eb   : > { %1473 = vst.msk [vmem:[#allocation5] sm:$0xff] %vm1472_vm6, %v1470_v2 }
 0x71a   : > { %v1477_v4 = vpop.permute.xlu1 %1476 }
 0x71b   : > { %1480 = vst.msk [vmem:[#allocation5] sm:$0xff] %vm1479_vm7, %v1477_v4  ;;  %v2641_v4 = vld [vmem:[#allocation18] ss:$0 sm:$0xff] }
 0x722   : > { %v1481_v3 = vld [vmem:[#allocation5] sm:$0xff] }
 0x723   : > { %2878 = vmatmul.mubr.bf16.vlgmr.msra.gmra.mrb[12].mxu0 %v1481_v3 }
 0x724   : > { %1926 = vmatprep.mubr.bf16.mxu0 %v3723_v30  ;;  %v3108_v30 = vld [vmem:[#allocation21 + $0x8] ss:$16 sps:$4 sm:$0xff]  }
 0x725   : > { %1895 = vmatpush1.bf16.msra.mxu0 %v3108_v30  ;;  %v3156_v30 = vld [vmem:[#allocation24 + $0x80] sm:$0xff]  }
 0x726   : > { %1896 = vmatprep.subr.bf16.mxu0 %v3116_v21  ;;  %v3159_v21 = vld [vmem:[#allocation24 + $0x8] sm:$0xff]  }
 0x729   : > { %1897 = vmatpush1.bf16.msra.mxu0 %v3114_v23  ;;  %v3161_v23 = vld [vmem:[#allocation24 + $0x50] sm:$0xff]  }
 0x72a   : > { %1898 = vmatprep.subr.bf16.mxu0 %v3122_v34  ;;  %v3171_v34 = vld [vmem:[#allocation24 + $0x20] sm:$0xff]  }
 0x72d   : > { %1899 = vmatpush1.bf16.msra.mxu0 %v3120_v36  ;;  %v3173_v36 = vld [vmem:[#allocation24 + $0x68] sm:$0xff]  }
 0x72e   : > { %1900 = vmatprep.subr.bf16.mxu0 %v3128_v38  ;;  %v3175_v38 = vld [vmem:[#allocation24 + $0x28] sm:$0xff]  }
 0x731   : > { %1901 = vmatpush1.bf16.msra.mxu0 %v3126_v40  ;;  %v3177_v40 = vld [vmem:[#allocation24 + $0x70] sm:$0xff]  }
 0x732   : > { %1902 = vmatprep.subr.bf16.mxu0 %v3134_v41  ;;  %v3179_v41 = vld [vmem:[#allocation24 + $0x30] sm:$0xff]  }
 0x735   : > { %1903 = vmatpush1.bf16.msra.mxu0 %v3132_v43  ;;  %v3181_v43 = vld [vmem:[#allocation24 + $0x78] sm:$0xff]  }
 0x736   : > { %1904 = vmatprep.subr.bf16.mxu0 %v3140_v45  ;;  %v3183_v45 = vld [vmem:[#allocation24 + $0x38] sm:$0xff]  }
 0x739   : > { %1905 = vmatpush1.bf16.msra.mxu0 %v3138_v47  ;;  %v1669_v47 = vld [vmem:[#allocation23] sm:$0xf] }
 0x73a   : > { %1906 = vmatprep.subr.bf16.mxu0 %v3146_v49  ;;  %v1674_v49 = vrot.slane %v1669_v47, %v698_v55  ;;  %v1682_v50 = vrot.slane %v1669_v47, %v706_v57  ;;  %v1686_v52 = vrot.slane %v1669_v47, %v1685_v48 }
 0x73d   : > { %1907 = vmatpush1.bf16.msra.mxu0 %v3144_v51  ;;  %v1678_v51 = vrot.slane %v1669_v47, %v702_v58 }
 0x73e   : > { %1908 = vmatprep.subr.bf16.mxu0 %v3152_v59 }
 0x741   : > { %1909 = vmatpush1.bf16.msra.mxu0 %v3150_v56 }
 0x742   : > { %2771 = vmatprep.subr.bf16.mxu0 %v3154_v17 }
 0x7f6   : > { %v1587_v6 = vpop.f32.mrb[12].mxu0 }
 0x7f7   : > { %v1588_v7 = vadd.f32 %v2632_v5, %v1587_v6  ;;  %v2879_v8 = vpop.f32.mrb[13].mxu0 }
 0x7f8   : > { %v1590_v9 = vpop.f32.mrb[14].mxu0  ;;  %v2642_v8 = vld [vmem:[#allocation20] ss:$0 sm:$0xff] }
 0x7f9   : > { %v4346_v11 = vadd.f32 %v3241_v10, %v1588_v7  ;;  %v1591_v12 = vadd.f32 %v2632_v5, %v1590_v9  ;;  %v2880_v13 = vpop.f32.mrb[15].mxu0 }
 0x7fb   : > { %v4349_v16 = vadd.f32 %v3242_v14, %v1591_v12  ;;  %1598 = vadd.xlane.f32.xlu1 %v4346_v11  ;;  %v3153_v14 = vld [vmem:[#allocation24 + $0x40] sm:$0xff]  }
 0x7fc   : > { %2749 = vmatprep.subr.bf16.mxu1 %v3153_v14 }
 0x7fd   : > { %1600 = vadd.xlane.f32.xlu0 %v4349_v16 }
 0x888   : > { %v1599_v24 = vpop.xlane.xlu1 %1598 }
 0x889   : > { %v1602_v25 = vmul.f32 0.0078125, %v1599_v24  ;;  %v3162_v24 = vld [vmem:[#allocation24 + $0xd0] sm:$0xff]  }
 0x88a   : > { %v1601_v26 = vpop.xlane.xlu0 %1600 }
 0x88b   : > { %v4354_v27 = vsub.f32 %v4346_v11, %v1602_v25  ;;  %v1603_v28 = vmul.f32 0.0078125, %v1601_v26  ;;  %v3163_v25 = vld [vmem:[#allocation24 + $0x10] sm:$0xff]  }
 0x88c   : > { %v3164_v26 = vld [vmem:[#allocation24 + $0x90] sm:$0xff]  }
 0x88d   : > { %v4357_v29 = vsub.f32 %v4349_v16, %v1603_v28  ;;  %v1606_v31 = vmul.f32 %v4354_v27, %v4354_v27  ;;  %v3166_v28 = vld [vmem:[#allocation24 + $0xd8] sm:$0xff]  }
 0x88f   : > { %1608 = vadd.xlane.f32.xlu0 %v1606_v31  ;;  %v1607_v32 = vmul.f32 %v4357_v29, %v4357_v29  ;;  %v3168_v31 = vld [vmem:[#allocation24 + $0x98] sm:$0xff]  }
 0x891   : > { %1610 = vadd.xlane.f32.xlu1 %v1607_v32  ;;  %v3169_v32 = vld [vmem:[#allocation24 + $0x60] sm:$0xff]  }
 0x91c   : > { %v1609_v60 = vpop.xlane.xlu0 %1608 }
 0x91d   : > { %v1612_v61 = vmul.f32 0.0078125, %v1609_v60 }
 0x91e   : > { %v1611_v62 = vpop.xlane.xlu1 %1610 }
 0x91f   : > { %v1614_v63 = vadd.f32 1e-05, %v1612_v61  ;;  %v1613_v0 = vmul.f32 0.0078125, %v1611_v62 }
 0x921   : > { %3221 = vrsqrt.f32 %v1614_v63  ;;  %v1615_v1 = vadd.f32 1e-05, %v1613_v0 }
 0x923   : > { %3223 = vrsqrt.f32 %v1615_v1 }
 0x92b   : > { %v3222_v2 = vpop.eup %3221 }
 0x92c   : > { %v1618_v3 = vmul.f32 %v3222_v2, %v4354_v27  ;;  %v3165_v27 = vld [vmem:[#allocation24 + $0x58] sm:$0xff]  }
 0x92d   : > { %v3224_v5 = vpop.eup %3223 }
 0x92e   : > { %v1619_v6 = vmul.f32 %v3224_v5, %v4357_v29  ;;  %v1626_v7 = vmul.f32 %v2641_v4, %v1618_v3  ;;  %v3167_v29 = vld [vmem:[#allocation24 + $0x18] sm:$0xff]  }
 0x930   : > { %v1627_v9 = vmul.f32 %v2641_v4, %v1619_v6  ;;  %v1634_v10 = vadd.f32 %v2642_v8, %v1626_v7 }
 0x932   : > { %v1635_v12 = vadd.f32 %v2642_v8, %v1627_v9 }
 0x934   : > { %v1636_v13 = vpack.c.bf16 %v1635_v12, %v1634_v10 }
 0x936   : > { %1884 = vmatmul.mubr.bf16.vlgmr.msra.gmra.mrb[28].mxu1 %v1636_v13  ;;  %1927 = vmatmul.mubr.bf16.vlgmr.msra.gmra.mrb[16].mxu0 %v1636_v13 }
 0x937   : > { %2750 = vmatpush3.bf16.msra.mxu1 %v3155_v18  ;;  %2772 = vmatpush3.bf16.msra.mxu0 %v3156_v30 }
 0x938   : > { %2751 = vmatprep.subr.bf16.mxu1 %v3157_v19  ;;  %2773 = vmatprep.subr.bf16.mxu0 %v3158_v20 }
 0x93b   : > { %2752 = vmatpush3.bf16.msra.mxu1 %v3159_v21  ;;  %2774 = vmatpush3.bf16.msra.mxu0 %v3160_v22 }
 0x93c   : > { %2753 = vmatprep.subr.bf16.mxu1 %v3161_v23  ;;  %2775 = vmatprep.subr.bf16.mxu0 %v3162_v24 }
 0x93f   : > { %2754 = vmatpush3.bf16.msra.mxu1 %v3163_v25  ;;  %2776 = vmatpush3.bf16.msra.mxu0 %v3164_v26 }
 0x940   : > { %2755 = vmatprep.subr.bf16.mxu1 %v3165_v27  ;;  %2777 = vmatprep.subr.bf16.mxu0 %v3166_v28 }
 0x943   : > { %2756 = vmatpush3.bf16.msra.mxu1 %v3167_v29  ;;  %2778 = vmatpush3.bf16.msra.mxu0 %v3168_v31 }
 0x944   : > { %2757 = vmatprep.subr.bf16.mxu1 %v3169_v32  ;;  %2779 = vmatprep.subr.bf16.mxu0 %v3170_v33 }
 0x947   : > { %2758 = vmatpush3.bf16.msra.mxu1 %v3171_v34  ;;  %2780 = vmatpush3.bf16.msra.mxu0 %v3172_v35 }
 0x948   : > { %2759 = vmatprep.subr.bf16.mxu1 %v3173_v36  ;;  %2781 = vmatprep.subr.bf16.mxu0 %v3174_v37 }
 0x94b   : > { %2760 = vmatpush3.bf16.msra.mxu1 %v3175_v38  ;;  %2782 = vmatpush3.bf16.msra.mxu0 %v3176_v39 }
 0x94c   : > { %2761 = vmatprep.subr.bf16.mxu1 %v3177_v40  ;;  %2783 = vmatprep.subr.bf16.mxu0 %v3178_v15 }
 0x94f   : > { %2762 = vmatpush3.bf16.msra.mxu1 %v3179_v41  ;;  %2784 = vmatpush3.bf16.msra.mxu0 %v3180_v42 }
 0x950   : > { %2763 = vmatprep.subr.bf16.mxu1 %v3181_v43  ;;  %2785 = vmatprep.subr.bf16.mxu0 %v3182_v44 }
 0x953   : > { %2764 = vmatpush3.bf16.msra.mxu1 %v3183_v45  ;;  %2786 = vmatpush3.bf16.msra.mxu0 %v3184_v46 }
 0xa09   : > { %v1885_v53 = vpop.f32.mrb[28].mxu1  ;;  %v1928_v56 = vpop.f32.mrb[16].mxu0 }
 0xa0a   : > { %v4372_v59 = vadd.f32 %v1885_v53, %v1674_v49  ;;  %v4374_v60 = vadd.f32 %v1928_v56, %v1682_v50  ;;  %v1887_v61 = vpop.f32.mrb[29].mxu1  ;;  %v1930_v62 = vpop.f32.mrb[17].mxu0 }
 0xa0b   : > { %v4376_v63 = vadd.f32 %v1887_v61, %v1678_v51  ;;  %v4378_v0 = vadd.f32 %v1930_v62, %v1686_v52  ;;  %v1889_v55 = vpop.f32.mrb[30].mxu1  ;;  %v1932_v1 = vpop.f32.mrb[18].mxu0 }
 0xa0c   : > { %v1945_v57 = vmul.f32 0.044715, %v4372_v59  ;;  %v1947_v54 = vmul.f32 0.044715, %v4374_v60  ;;  %v1890_v58 = vadd.f32 %v1889_v55, %v1674_v49  ;;  %v1933_v2 = vadd.f32 %v1932_v1, %v1682_v50  ;;  %v1891_v4 = vpop.f32.mrb[31].mxu1  ;;  %v1934_v3 = vpop.f32.mrb[19].mxu0 }
 0xa0d   : > { %v1946_v5 = vmul.f32 0.044715, %v4376_v63  ;;  %v1948_v6 = vmul.f32 0.044715, %v4378_v0  ;;  %v4384_v7 = vadd.f32 %v1891_v4, %v1678_v51  ;;  %v4386_v8 = vadd.f32 %v1934_v3, %v1686_v52 }
 0xa0e   : > { %v1953_v9 = vmul.f32 %v1945_v57, %v4372_v59  ;;  %v1955_v10 = vmul.f32 %v1947_v54, %v4374_v60  ;;  %v1949_v12 = vmul.f32 0.044715, %v1890_v58  ;;  %v1951_v13 = vmul.f32 0.044715, %v1933_v2 }
 0xa0f   : > { %v1954_v14 = vmul.f32 %v1946_v5, %v4376_v63  ;;  %v1956_v17 = vmul.f32 %v1948_v6, %v4378_v0  ;;  %v1950_v18 = vmul.f32 0.044715, %v4384_v7  ;;  %v1952_v30 = vmul.f32 0.044715, %v4386_v8 }
 0xa10   : > { %v1961_v19 = vmul.f32 %v1953_v9, %v4372_v59  ;;  %v1963_v20 = vmul.f32 %v1955_v10, %v4374_v60  ;;  %v1957_v21 = vmul.f32 %v1949_v12, %v1890_v58  ;;  %v1959_v22 = vmul.f32 %v1951_v13, %v1933_v2 }
 0xa11   : > { %v1962_v23 = vmul.f32 %v1954_v14, %v4376_v63  ;;  %v1964_v24 = vmul.f32 %v1956_v17, %v4378_v0  ;;  %v1958_v25 = vmul.f32 %v1950_v18, %v4384_v7  ;;  %v1960_v26 = vmul.f32 %v1952_v30, %v4386_v8 }
 0xa12   : > { %v1969_v27 = vadd.f32 %v1961_v19, %v4372_v59  ;;  %v1971_v28 = vadd.f32 %v1963_v20, %v4374_v60  ;;  %v1965_v29 = vmul.f32 %v1957_v21, %v1890_v58  ;;  %v1967_v31 = vmul.f32 %v1959_v22, %v1933_v2 }
 0xa13   : > { %v1966_v32 = vmul.f32 %v1958_v25, %v4384_v7  ;;  %v1968_v33 = vmul.f32 %v1960_v26, %v4386_v8  ;;  %v1970_v38 = vadd.f32 %v1962_v23, %v4376_v63  ;;  %v1972_v41 = vadd.f32 %v1964_v24, %v4378_v0 }
 0xa14   : > { %v1977_v34 = vmul.f32 0.7978846, %v1969_v27  ;;  %v1979_v35 = vmul.f32 0.7978846, %v1971_v28  ;;  %v1973_v36 = vadd.f32 %v1965_v29, %v1890_v58  ;;  %v1975_v37 = vadd.f32 %v1967_v31, %v1933_v2 }
 0xa15   : > { %v1974_v39 = vadd.f32 %v1966_v32, %v4384_v7  ;;  %v1978_v42 = vmul.f32 0.7978846, %v1970_v38  ;;  %v1976_v44 = vadd.f32 %v1968_v33, %v4386_v8  ;;  %v1980_v45 = vmul.f32 0.7978846, %v1972_v41 }
 0xa16   : > { %3225 = vtanh.f32 %v1977_v34  ;;  %v1981_v40 = vmul.f32 0.7978846, %v1973_v36  ;;  %v1983_v15 = vmul.f32 0.7978846, %v1975_v37  ;;  %v1937_v53 = vmul.f32 0.5, %v4372_v59 }
 0xa17   : > { %3227 = vtanh.f32 %v1979_v35  ;;  %v1982_v43 = vmul.f32 0.7978846, %v1974_v39  ;;  %v1984_v46 = vmul.f32 0.7978846, %v1976_v44  ;;  %v1941_v56 = vmul.f32 0.5, %v1890_v58 }
 0xa18   : > { %3229 = vtanh.f32 %v1981_v40  ;;  %v1939_v55 = vmul.f32 0.5, %v4374_v60  ;;  %v1943_v1 = vmul.f32 0.5, %v1933_v2  ;;  %v1938_v4 = vmul.f32 0.5, %v4376_v63  ;;  %v2707_v35 = vld [vmem:[#allocation26] ss:$0 sm:$0xff] }
 0xa19   : > { %3231 = vtanh.f32 %v1983_v15  ;;  %v1942_v10 = vmul.f32 0.5, %v4384_v7  ;;  %v1940_v58 = vmul.f32 0.5, %v4378_v0  ;;  %v1944_v17 = vmul.f32 0.5, %v4386_v8 }
 0xa1a   : > { %3233 = vtanh.f32 %v1978_v42 }
 0xa1b   : > { %3235 = vtanh.f32 %v1982_v43 }
 0xa1c   : > { %3237 = vtanh.f32 %v1980_v45 }
 0xa1d   : > { %3239 = vtanh.f32 %v1984_v46 }
 0xa20   : > { %v3226_v47 = vpop.eup %3225 }
 0xa21   : > { %v3228_v48 = vpop.eup %3227  ;;  %v1993_v49 = vadd.f32 1.0, %v3226_v47 }
 0xa22   : > { %v3230_v50 = vpop.eup %3229  ;;  %v1995_v51 = vadd.f32 1.0, %v3228_v48 }
 0xa23   : > { %v3232_v52 = vpop.eup %3231  ;;  %v1997_v61 = vadd.f32 1.0, %v3230_v50  ;;  %v2001_v5 = vmul.f32 %v1993_v49, %v1937_v53 }
 0xa24   : > { %v3234_v62 = vpop.eup %3233  ;;  %v1999_v57 = vadd.f32 1.0, %v3232_v52  ;;  %v2003_v13 = vmul.f32 %v1995_v51, %v1939_v55 }
 0xa25   : > { %v3236_v54 = vpop.eup %3235  ;;  %v1994_v3 = vadd.f32 1.0, %v3234_v62  ;;  %v2005_v6 = vmul.f32 %v1997_v61, %v1941_v56 }
 0xa26   : > { %v3238_v9 = vpop.eup %3237  ;;  %v1998_v12 = vadd.f32 1.0, %v3236_v54  ;;  %v2007_v14 = vmul.f32 %v1999_v57, %v1943_v1 }
 0xa27   : > { %v3240_v59 = vpop.eup %3239  ;;  %v1996_v60 = vadd.f32 1.0, %v3238_v9  ;;  %v2009_v2 = vpack.c.bf16 %v2005_v6, %v2001_v5  ;;  %v2002_v18 = vmul.f32 %v1994_v3, %v1938_v4 }
 0xa28   : > { %v2006_v30 = vmul.f32 %v1998_v12, %v1942_v10  ;;  %v2000_v19 = vadd.f32 1.0, %v3240_v59  ;;  %v2011_v63 = vpack.c.bf16 %v2007_v14, %v2003_v13 }
 0xa29   : > { %v2004_v21 = vmul.f32 %v1996_v60, %v1940_v58 }
 0xa2a   : > { %v2010_v20 = vpack.c.bf16 %v2006_v30, %v2002_v18  ;;  %v2008_v22 = vmul.f32 %v2000_v19, %v1944_v17 }
 0xa2c   : > { %2301 = vmatprep.mubr.bf16.mxu1 %v2010_v20  ;;  %v2012_v23 = vpack.c.bf16 %v2008_v22, %v2004_v21 }
 0xa2d   : > { %2302 = vmatmul.mubr.bf16.vlgmr.msra.gmra.mrb[32].mxu1 %v2009_v2 }
 0xa2e   : > { %2342 = vmatprep.mubr.bf16.mxu0 %v2012_v23 }
 0xa2f   : > { %2343 = vmatmul.mubr.bf16.vlgmr.msra.gmra.mrb[20].mxu0 %v2011_v63 }
 0xb00   : > { %v2765_v7 = vpop.f32.mrb[32].mxu1 }
 0xb01   : > { %v2766_v24 = vpop.f32.mrb[33].mxu1 }
 0xb02   : > { %v2787_v0 = vpop.f32.mrb[20].mxu0  ;;  %v2767_v8 = vadd.f32 %v2766_v24, %v2765_v7  ;;  %v2768_v25 = vpop.f32.mrb[34].mxu1 }
 0xb03   : > { %v2788_v26 = vpop.f32.mrb[21].mxu0  ;;  %v2769_v27 = vpop.f32.mrb[35].mxu1 }
 0xb04   : > { %v2789_v28 = vadd.f32 %v2788_v26, %v2787_v0  ;;  %v2790_v29 = vpop.f32.mrb[22].mxu0  ;;  %v2770_v31 = vadd.f32 %v2769_v27, %v2768_v25 }
 0xb05   : > { %v2791_v32 = vpop.f32.mrb[23].mxu0 }
 0xb06   : > { %v2345_v33 = vadd.f32 %v2789_v28, %v2767_v8  ;;  %v2792_v34 = vadd.f32 %v2791_v32, %v2790_v29 }
 0xb08   : > { %v2351_v36 = vadd.f32 %v2345_v33, %v4346_v11  ;;  %v2348_v37 = vadd.f32 %v2792_v34, %v2770_v31 }
 0xb0a   : > { %v2360_v38 = vadd.f32 %v2707_v35, %v2351_v36  ;;  %v2352_v39 = vadd.f32 %v2348_v37, %v4349_v16 }
 0xb0c   : > { %2362 = vst [vmem:[%s616_s13] sm:$0xff] %v2360_v38  ;;  %v2361_v11 = vadd.f32 %v2707_v35, %v2352_v39 }
 0xb0e   : > { %2363 = vst [vmem:[%s616_s13 + $0x8] sm:$0xff] %v2361_v11 }
 0xb0f   : > { %3622 = shalt.err (!%p3619_p7)
}
 0xb10   : > { %s3623_s13 = scalar_lea.hbm %s4422_s25, 256  ;;  %s3627_s17 = scalar_lea.hbm %s4531_s16, 512 }
 0xb11   : > { %p3624_p6 = scmp.ne.s32.totalorder %s4422_s25, %s3623_s13  ;;  %p3628_p13 = scmp.lt.u32.totalorder %s4422_s25, %s4531_s16 }
 0xb12   : > { %p3629_p1 = scmp.lt.u32.totalorder %s3627_s17, %s3623_s13  ;;  %p3631_p2 = scmp.lt.u32.totalorder %s3623_s13, %s4422_s25 }
 0xb13   : > { %p3625_p9 = pnand %p3624_p6, %p4532_p8 }
 0xb14   : > { %p3630_p3 = por %p3629_p1, %p3628_p13 }
 0xb15   : > { %p3626_p4 = pneg %p3625_p9 }
 0xb16   : > { %p3632_p10 = por %p3631_p2, %p3630_p3 }
 0xb18   : > { %p3633_p11 = pnand %p3632_p10, %p3626_p4 }
 0xb1a   : > { %3636 = shalt.err (!%p3633_p11)
}
 0xb1b   : > { %s3730_s1 = smov 128   ;;  %s3731_s30 = smov 8  }
 0xb1c   : > { %2931 = dma.vmem_to_hbm [thread:$0]  (%p4532_p8), %s4424_s19, 256, %s4422_s25, %s2365_s21, %s3730_s1, %s3730_s1, %s3731_s30  }
 0xb1d PF: > { %s4533_s14 = sld [smem:[#allocation36_spill]]  ;;  %p4534_p12 = scmp.ne.s32.totalorder %s4513_s23, 0 }
 0xb1e   : > { %p4535_p0 = scmp.ge.s32.totalorder %s3699_s28, 2 }
 0xb20   : > { %p2975_p5 = pnand %p4535_p0, %p4534_p12 }
 0xb23   : > { %s2393_s20 = sand.u32 1, %s4533_s14  }
 0xb24   : > { %s2394_s13 = scalar_lea.sflag [#allocation8], %s2393_s20 }
 0xb25   : > { %3682 = dma.done.wait (!%p2975_p5), %s2394_s13, 256  }
 0xb26   : > { %3684 = vsyncadd (!%p2975_p5), %s2394_s13, 4294967040  ;;  %p32_p7 = scmp.ge.s32.totalorder %s4093_s18, 4   ;;  %s4536_s25 = smov %s3691_s26 }
 0xb27   : > { %s4537_s26 = smov %s3695_s27  ;;  %s4538_s27 = smov %s4104_s29 }
 0xb28   : > { %s4539_s28 = smov %s4093_s18  ;;  %34 = sbr.rel (!%p32_p7) target bundleno = 16 (0x10), region = 174 }
 0xb2f   :  { %2399 = vsyncpa [#allocation7], 1 }
 0xb30   :  { %2401 = vsyncpa [#allocation7 + $0x1], 1 }
 0xb31   :  { %2402 = vsyncpa [#allocation10], 1 }
 0xb32   :  { %2403 = vsyncpa [#allocation13], 1 }
 0xb33   :  { %2404 = vsyncpa [#allocation16], 1 }
 0xb34   :  { %2405 = vsyncpa [#allocation19], 1 }
 0xb35   :  { %2406 = vsyncpa [#allocation22], 1 }
 0xb36   :  { %2407 = vsyncpa [#allocation25], 1 }
 0xb37   :  { %2408 = vsyncpa [#allocation8], 1 }
 0xb38   :  { %2410 = vsyncpa [#allocation8 + $0x1], 1 }

// kernel: tpu_custom_call.1
= control target key start
LH: loop header
LB: loop body
LE: loop exit
PB: predicated region body
PF: predicated region fallthrough
CT: control target
= control target key end

     0   :  { %s4468_s0 = inlined_call_operand.hbm [shape: f32[2,16,128], index: 0, kind: input, shape index: {}]   ;;  %s4469_s1 = inlined_call_operand.hbm [shape: f32[1,128], index: 1, kind: input, shape index: {}]   ;;  %s4470_s2 = inlined_call_operand.hbm [shape: f32[1,128], index: 2, kind: input, shape index: {}]   ;;  %s4471_s3 = inlined_call_operand.hbm [shape: bf16[128,384], index: 3, kind: input, shape index: {}]   ;;  %s4472_s4 = inlined_call_operand.hbm [shape: f32[1,384], index: 4, kind: input, shape index: {}]   ;;  %s4473_s5 = inlined_call_operand.hbm [shape: bf16[128,128], index: 5, kind: input, shape index: {}]   ;;  %s4474_s6 = inlined_call_operand.hbm [shape: f32[1,128], index: 6, kind: input, shape index: {}]   ;;  %s4475_s7 = inlined_call_operand.hbm [shape: f32[1,128], index: 7, kind: input, shape index: {}]   ;;  %s4476_s8 = inlined_call_operand.hbm [shape: f32[1,128], index: 8, kind: input, shape index: {}]   ;;  %s4477_s9 = inlined_call_operand.hbm [shape: bf16[128,512], index: 9, kind: input, shape index: {}]   ;;  %s4478_s10 = inlined_call_operand.hbm [shape: f32[1,512], index: 10, kind: input, shape index: {}]   ;;  %s4479_s11 = inlined_call_operand.hbm [shape: bf16[512,128], index: 11, kind: input, shape index: {}]   ;;  %s4480_s12 = inlined_call_operand.hbm [shape: f32[1,128], index: 12, kind: input, shape index: {}]   ;;  %s4481_s13 = inlined_call_operand.hbm [shape: f32[2,16,128], index: 13, kind: output, shape index: {}]  }
   0x1   :  { %4493 = sst [smem:[#allocation39_spill]] %s4468_s0 }
   0x2   :  { %4494 = sst [smem:[#allocation40_spill]] %s4469_s1 }
   0x3   :  { %4495 = sst [smem:[#allocation41_spill]] %s4471_s3 }
   0x4   :  { %4496 = sst [smem:[#allocation42_spill]] %s4481_s13 }
   0x5   :  { %18 = vsyncpa [#allocation7], 0 }
   0x6   :  { %20 = vsyncpa [#allocation7 + $0x1], 0 }
   0x7   :  { %21 = vsyncpa [#allocation10], 0 }
   0x8   :  { %22 = vsyncpa [#allocation13], 0 }
   0x9   :  { %23 = vsyncpa [#allocation16], 0 }
   0xa   :  { %24 = vsyncpa [#allocation19], 0 }
   0xb   :  { %25 = vsyncpa [#allocation22], 0 }
   0xc   :  { %26 = vsyncpa [#allocation25], 0 }
   0xd   :  { %27 = vsyncpa [#allocation8], 0 }
   0xe   :  { %29 = vsyncpa [#allocation8 + $0x1], 0  ;;  %s3802_s25 = smov 0   ;;  %s3804_s26 = smov 0  }
   0xf   :  { %s3806_s27 = smov 0   ;;  %s3808_s28 = smov 0  }
  0x10 LB: > { %4497 = sst [smem:[#allocation36_spill]] %s3687_s25  ;;  %s3701_s29 = smov [#allocation9]   ;;  %s3699_s28 = sphi %s3808_s28, %s4539_s28   ;;  %s3695_s27 = sphi %s3806_s27, %s4538_s27   ;;  %s3691_s26 = sphi %s3804_s26, %s4537_s26   ;;  %s3687_s25 = sphi %s3802_s25, %s4536_s25  }
  0x11   : > { %s357_s30 = sshll.u32 %s3701_s29, 4  ;;  %s3823_s14 = sadd.s32 4294967295, %s3699_s28   ;;  %s3828_s30 = int_to_ptr.vmem [resolvable:$true] %s357_s30 }
  0x12   : > { %4498 = sst [smem:[#allocation37_spill]] %s3823_s14  ;;  %p2566_p0 = scmp.ge.s32.totalorder %s3699_s28, 1 }
  0x13   : > { %p4488_p1 = scmp.eq.s32.totalorder %s3823_s14, 0  ;;  %p344_p2 = scmp.lt.s32.totalorder %s3699_s28, 3 }
  0x14   : > { %s3702_s16 = smov [#allocation12]   ;;  %s3703_s19 = smov [#allocation15]  }
  0x15   : > { %p3830_p3 = pnand %p2566_p0, %p344_p2  ;;  %s378_s17 = sshll.u32 %s3702_s16, 4  ;;  %s3837_s17 = int_to_ptr.vmem [resolvable:$true] %s378_s17 }
  0x16   : > { %s402_s20 = sshll.u32 %s3703_s19, 4  ;;  %s4502_s1 = sld [smem:[#allocation40_spill]]  ;;  %s3845_s20 = int_to_ptr.vmem [resolvable:$true] %s402_s20 }
  0x17   : > { %s4499_s15 = scalar_select %p3830_p3, 1, 0 }
  0x18   : > { %p2933_p5 = pneg %p3830_p3 }
  0x19   : > { %4500 = sst [smem:[#allocation38_spill]] %s4499_s15 }
  0x1a   : > { %p3841_p6 = pnand %p2933_p5, %p4488_p1 }
  0x1c   : > { %s3243_s23 = scalar_lea.hbm %s4502_s1, 16  ;;  %p3855_p8 = pneg %p3841_p6 }
  0x1d   : > { %p3244_p7 = scmp.ne.s32.totalorder %s4502_s1, %s3243_s23  ;;  %p3250_p11 = scmp.lt.u32.totalorder %s3243_s23, %s4502_s1 }
  0x1f   : > { %p3246_p9 = pnand %p3855_p8, %p3244_p7 }
  0x21   : > { %p3247_p10 = pneg %p3246_p9 }
  0x23   : > { %p3252_p12 = pnand %p3250_p11, %p3247_p10 }
  0x25   : > { %3255 = shalt.err (!%p3252_p12)
}
  0x26   : > { %s3256_s21 = scalar_lea.vmem %s3828_s30, 16  ;;  %s3263_s22 = scalar_lea.vmem %s3828_s30, 32 }
  0x27   : > { %p3257_p13 = scmp.ne.s32.totalorder %s3828_s30, %s3256_s21  ;;  %p3264_p5 = scmp.lt.s32.totalorder %s3828_s30, %s3828_s30 }
  0x28   : > { %p3265_p7 = scmp.lt.s32.totalorder %s3263_s22, %s3256_s21 }
  0x29   : > { %p3259_p0 = pnand %p3257_p13, %p3855_p8 }
  0x2a   : > { %p3266_p9 = por %p3265_p7, %p3264_p5 }
  0x2b   : > { %p3260_p2 = pneg %p3259_p0 }
  0x2d   : > { %p3267_p4 = pnand %p3266_p9, %p3260_p2 }
  0x2f   : > { %3270 = shalt.err (!%p3267_p4)
}
  0x30   : > { %2936 = dma.hbm_to_vmem [thread:$0]  (!%p3841_p6), %s4502_s1, 16, %s3828_s30, [#allocation10]  }
  0x31   : > { %s4504_s3 = sld [smem:[#allocation41_spill]] }
  0x37   : > { %s3271_s19 = scalar_lea.hbm %s4504_s3, 3072 }
  0x38   : > { %p3272_p10 = scmp.ne.s32.totalorder %s4504_s3, %s3271_s19  ;;  %p3278_p4 = scmp.lt.u32.totalorder %s3271_s19, %s4504_s3 }
  0x3a   : > { %p3274_p11 = pnand %p3272_p10, %p3855_p8 }
  0x3c   : > { %p3275_p12 = pneg %p3274_p11 }
  0x3e   : > { %p3280_p13 = pnand %p3278_p4, %p3275_p12 }
  0x40   : > { %3283 = shalt.err (!%p3280_p13)
}
  0x41   : > { %s3284_s30 = scalar_lea.vmem %s3837_s17, 3072  ;;  %p3292_p7 = scmp.lt.s32.totalorder %s3837_s17, %s3837_s17 }
  0x42   : > { %p3285_p0 = scmp.ne.s32.totalorder %s3837_s17, %s3284_s30  ;;  %p3293_p9 = scmp.lt.s32.totalorder %s3284_s30, %s3284_s30 }
  0x44   : > { %p3287_p2 = pnand %p3285_p0, %p3855_p8  ;;  %p3294_p10 = por %p3293_p9, %p3292_p7 }
  0x46   : > { %p3288_p5 = pneg %p3287_p2 }
  0x48   : > { %p3295_p11 = pnand %p3294_p10, %p3288_p5 }
  0x4a   : > { %3298 = shalt.err (!%p3295_p11)
}
  0x4b   : > { %s3704_s0 = smov 192   ;;  %s3705_s15 = smov 12  }
  0x4c   : > { %2942 = dma.hbm_to_vmem [thread:$0]  (!%p3841_p6), %s4504_s3, 3072, %s3837_s17, [#allocation13], %s3704_s0, %s3704_s0, %s3705_s15  }
  0x4d   : > { %s3299_s19 = scalar_lea.hbm %s4473_s5, 1024 }
  0x4e   : > { %p3300_p12 = scmp.ne.s32.totalorder %s4473_s5, %s3299_s19  ;;  %p3306_p0 = scmp.lt.u32.totalorder %s3299_s19, %s4473_s5 }
  0x50   : > { %p3302_p4 = pnand %p3300_p12, %p3855_p8 }
  0x52   : > { %p3303_p13 = pneg %p3302_p4 }
  0x54   : > { %p3308_p2 = pnand %p3306_p0, %p3303_p13 }
  0x56   : > { %3311 = shalt.err (!%p3308_p2)
}
  0x57   : > { %s3312_s17 = scalar_lea.vmem %s3845_s20, 1024  ;;  %p3320_p10 = scmp.lt.s32.totalorder %s3845_s20, %s3845_s20 }
  0x58   : > { %p3313_p5 = scmp.ne.s32.totalorder %s3845_s20, %s3312_s17  ;;  %p3321_p11 = scmp.lt.s32.totalorder %s3312_s17, %s3312_s17 }
  0x5a   : > { %p3315_p7 = pnand %p3313_p5, %p3855_p8  ;;  %p3322_p12 = por %p3321_p11, %p3320_p10 }
  0x5c   : > { %p3316_p9 = pneg %p3315_p7 }
  0x5e   : > { %p3323_p4 = pnand %p3322_p12, %p3316_p9 }
  0x60   : > { %3326 = shalt.err (!%p3323_p4)
}
  0x61   : > { %s4490_s0 = smov 64   ;;  %s4491_s1 = smov 4  }
  0x62   : > { %2948 = dma.hbm_to_vmem [thread:$0]  (!%p3841_p6), %s4473_s5, 1024, %s3845_s20, [#allocation16], %s4490_s0, %s4490_s0, %s4491_s1  }
  0x63   : > { %s3708_s23 = smov [#allocation18]   ;;  %s3709_s29 = smov [#allocation21]  }
  0x64   : > { %s427_s24 = sshll.u32 %s3708_s23, 4  ;;  %s448_s19 = sshll.u32 %s3709_s29, 4  ;;  %s428_s24 = int_to_ptr.vmem [resolvable:$true] %s427_s24  ;;  %s449_s19 = int_to_ptr.vmem [resolvable:$true] %s448_s19 }
  0x65   : > { %s3327_s30 = scalar_lea.hbm %s4475_s7, 16 }
  0x66   : > { %p3328_p13 = scmp.ne.s32.totalorder %s4475_s7, %s3327_s30  ;;  %p3334_p5 = scmp.lt.u32.totalorder %s3327_s30, %s4475_s7 }
  0x68   : > { %p3330_p0 = pnand %p3328_p13, %p3855_p8 }
  0x6a   : > { %p3331_p2 = pneg %p3330_p0 }
  0x6c   : > { %p3336_p7 = pnand %p3334_p5, %p3331_p2 }
  0x6e   : > { %3339 = shalt.err (!%p3336_p7)
}
  0x6f   : > { %s3340_s20 = scalar_lea.vmem %s428_s24, 16  ;;  %s3347_s15 = scalar_lea.vmem %s428_s24, 32 }
  0x70   : > { %p3341_p9 = scmp.ne.s32.totalorder %s428_s24, %s3340_s20  ;;  %p3348_p12 = scmp.lt.s32.totalorder %s428_s24, %s428_s24 }
  0x71   : > { %p3349_p4 = scmp.lt.s32.totalorder %s3347_s15, %s3340_s20 }
  0x72   : > { %p3343_p10 = pnand %p3341_p9, %p3855_p8 }
  0x73   : > { %p3350_p1 = por %p3349_p4, %p3348_p12 }
  0x74   : > { %p3344_p11 = pneg %p3343_p10 }
  0x76   : > { %p3351_p3 = pnand %p3350_p1, %p3344_p11 }
  0x78   : > { %3354 = shalt.err (!%p3351_p3)
}
  0x79   : > { %2954 = dma.hbm_to_vmem [thread:$0]  (!%p3841_p6), %s4475_s7, 16, %s428_s24, [#allocation19]  }
  0x7a   : > { %s3355_s23 = scalar_lea.hbm %s4477_s9, 4096 }
  0x7b   : > { %p3356_p13 = scmp.ne.s32.totalorder %s4477_s9, %s3355_s23  ;;  %p3362_p3 = scmp.lt.u32.totalorder %s3355_s23, %s4477_s9 }
  0x7d   : > { %p3358_p0 = pnand %p3356_p13, %p3855_p8 }
  0x7f   : > { %p3359_p1 = pneg %p3358_p0 }
  0x81   : > { %p3364_p2 = pnand %p3362_p3, %p3359_p1 }
  0x83   : > { %3367 = shalt.err (!%p3364_p2)
}
  0x84   : > { %s3368_s17 = scalar_lea.vmem %s449_s19, 4096  ;;  %p3376_p10 = scmp.lt.s32.totalorder %s449_s19, %s449_s19 }
  0x85   : > { %p3369_p5 = scmp.ne.s32.totalorder %s449_s19, %s3368_s17  ;;  %p3377_p11 = scmp.lt.s32.totalorder %s3368_s17, %s3368_s17 }
  0x87   : > { %p3371_p7 = pnand %p3369_p5, %p3855_p8  ;;  %p3378_p12 = por %p3377_p11, %p3376_p10 }
  0x89   : > { %p3372_p9 = pneg %p3371_p7 }
  0x8b   : > { %p3379_p4 = pnand %p3378_p12, %p3372_p9 }
  0x8d   : > { %3382 = shalt.err (!%p3379_p4)
}
  0x8e   : > { %s3710_s24 = smov 256   ;;  %s3711_s20 = smov 16  }
  0x8f   : > { %2960 = dma.hbm_to_vmem [thread:$0]  (!%p3841_p6), %s4477_s9, 4096, %s449_s19, [#allocation22], %s3710_s24, %s3710_s24, %s3711_s20  }
  0x90   : > { %s3712_s13 = smov [#allocation24]   ;;  %s3713_s14 = smov [#allocation11]  }
  0x91   : > { %s472_s25 = sshll.u32 %s3712_s13, 4  ;;  %s368_s23 = sshll.u32 %s3713_s14, 4  ;;  %s473_s25 = int_to_ptr.vmem [resolvable:$true] %s472_s25  ;;  %s369_s23 = int_to_ptr.vmem [resolvable:$true] %s368_s23 }
  0x92   : > { %s3383_s22 = scalar_lea.hbm %s4479_s11, 4096 }
  0x93   : > { %p3384_p13 = scmp.ne.s32.totalorder %s4479_s11, %s3383_s22  ;;  %p3390_p3 = scmp.lt.u32.totalorder %s3383_s22, %s4479_s11 }
  0x95   : > { %p3386_p0 = pnand %p3384_p13, %p3855_p8 }
  0x97   : > { %p3387_p1 = pneg %p3386_p0 }
  0x99   : > { %p3392_p2 = pnand %p3390_p3, %p3387_p1 }
  0x9b   : > { %3395 = shalt.err (!%p3392_p2)
}
  0x9c   : > { %s3396_s19 = scalar_lea.vmem %s473_s25, 4096  ;;  %p3404_p10 = scmp.lt.s32.totalorder %s473_s25, %s473_s25 }
  0x9d   : > { %p3397_p5 = scmp.ne.s32.totalorder %s473_s25, %s3396_s19  ;;  %p3405_p11 = scmp.lt.s32.totalorder %s3396_s19, %s3396_s19 }
  0x9f   : > { %p3399_p7 = pnand %p3397_p5, %p3855_p8  ;;  %p3406_p12 = por %p3405_p11, %p3404_p10 }
  0xa1   : > { %p3400_p9 = pneg %p3399_p7 }
  0xa3   : > { %p3407_p4 = pnand %p3406_p12, %p3400_p9 }
  0xa5   : > { %3410 = shalt.err (!%p3407_p4)
}
  0xa6   : > { %s4505_s24 = smov 4   ;;  %s4506_s20 = smov 64  }
  0xa7   : > { %2966 = dma.hbm_to_vmem [thread:$0]  (!%p3841_p6), %s4479_s11, 4096, %s473_s25, [#allocation25], %s4506_s20, %s4506_s20, %s4505_s24  }
  0xa8   : > { %s3411_s13 = scalar_lea.hbm %s4470_s2, 16 }
  0xa9   : > { %p3412_p13 = scmp.ne.s32.totalorder %s4470_s2, %s3411_s13  ;;  %p3418_p3 = scmp.lt.u32.totalorder %s3411_s13, %s4470_s2 }
  0xab   : > { %p3414_p0 = pnand %p3412_p13, %p3855_p8 }
  0xad   : > { %p3415_p1 = pneg %p3414_p0 }
  0xaf   : > { %p3420_p2 = pnand %p3418_p3, %p3415_p1 }
  0xb1   : > { %3423 = shalt.err (!%p3420_p2)
}
  0xb2   : > { %s3424_s30 = scalar_lea.vmem %s369_s23, 16  ;;  %s3431_s25 = scalar_lea.vmem %s369_s23, 32 }
  0xb3   : > { %p3425_p5 = scmp.ne.s32.totalorder %s369_s23, %s3424_s30  ;;  %p3432_p10 = scmp.lt.s32.totalorder %s369_s23, %s369_s23 }
  0xb4   : > { %p3433_p11 = scmp.lt.s32.totalorder %s3431_s25, %s3424_s30 }
  0xb5   : > { %p3427_p7 = pnand %p3425_p5, %p3855_p8 }
  0xb6   : > { %p3434_p12 = por %p3433_p11, %p3432_p10 }
  0xb7   : > { %p3428_p9 = pneg %p3427_p7 }
  0xb9   : > { %p3435_p4 = pnand %p3434_p12, %p3428_p9 }
  0xbb   : > { %3438 = shalt.err (!%p3435_p4)
}
  0xbc   : > { %2939 = dma.hbm_to_vmem [thread:$0]  (!%p3841_p6), %s4470_s2, 16, %s369_s23, [#allocation10]  }
  0xbd   : > { %s3714_s24 = smov [#allocation14]   ;;  %s3715_s0 = smov [#allocation17]  }
  0xbe   : > { %s392_s20 = sshll.u32 %s3714_s24, 4  ;;  %s416_s1 = sshll.u32 %s3715_s0, 4  ;;  %s393_s20 = int_to_ptr.vmem [resolvable:$true] %s392_s20  ;;  %s417_s1 = int_to_ptr.vmem [resolvable:$true] %s416_s1 }
  0xbf   : > { %s3439_s13 = scalar_lea.hbm %s4472_s4, 48 }
  0xc0   : > { %p3440_p13 = scmp.ne.s32.totalorder %s4472_s4, %s3439_s13  ;;  %p3446_p3 = scmp.lt.u32.totalorder %s3439_s13, %s4472_s4 }
  0xc2   : > { %p3442_p0 = pnand %p3440_p13, %p3855_p8 }
  0xc4   : > { %p3443_p1 = pneg %p3442_p0 }
  0xc6   : > { %p3448_p2 = pnand %p3446_p3, %p3443_p1 }
  0xc8   : > { %3451 = shalt.err (!%p3448_p2)
}
  0xc9   : > { %s3452_s23 = scalar_lea.vmem %s393_s20, 48  ;;  %s3459_s30 = scalar_lea.vmem %s393_s20, 64 }
  0xca   : > { %p3453_p5 = scmp.ne.s32.totalorder %s393_s20, %s3452_s23  ;;  %p3460_p10 = scmp.lt.s32.totalorder %s393_s20, %s393_s20 }
  0xcb   : > { %p3461_p11 = scmp.lt.s32.totalorder %s3459_s30, %s3452_s23 }
  0xcc   : > { %p3455_p7 = pnand %p3453_p5, %p3855_p8 }
  0xcd   : > { %p3462_p12 = por %p3461_p11, %p3460_p10 }
  0xce   : > { %p3456_p9 = pneg %p3455_p7 }
  0xd0   : > { %p3463_p4 = pnand %p3462_p12, %p3456_p9 }
  0xd2   : > { %3466 = shalt.err (!%p3463_p4)
}
  0xd3   : > { %2945 = dma.hbm_to_vmem [thread:$0]  (!%p3841_p6), %s4472_s4, 48, %s393_s20, [#allocation13]  }
  0xd4   : > { %s3467_s0 = scalar_lea.hbm %s4474_s6, 16 }
  0xd5   : > { %p3468_p13 = scmp.ne.s32.totalorder %s4474_s6, %s3467_s0  ;;  %p3474_p3 = scmp.lt.u32.totalorder %s3467_s0, %s4474_s6 }
  0xd7   : > { %p3470_p0 = pnand %p3468_p13, %p3855_p8 }
  0xd9   : > { %p3471_p1 = pneg %p3470_p0 }
  0xdb   : > { %p3476_p2 = pnand %p3474_p3, %p3471_p1 }
  0xdd   : > { %3479 = shalt.err (!%p3476_p2)
}
  0xde   : > { %s3480_s29 = scalar_lea.vmem %s417_s1, 16  ;;  %s3487_s20 = scalar_lea.vmem %s417_s1, 32 }
  0xdf   : > { %p3481_p5 = scmp.ne.s32.totalorder %s417_s1, %s3480_s29  ;;  %p3488_p10 = scmp.lt.s32.totalorder %s417_s1, %s417_s1 }
  0xe0   : > { %p3489_p11 = scmp.lt.s32.totalorder %s3487_s20, %s3480_s29 }
  0xe1   : > { %p3483_p7 = pnand %p3481_p5, %p3855_p8 }
  0xe2   : > { %p3490_p12 = por %p3489_p11, %p3488_p10 }
  0xe3   : > { %p3484_p9 = pneg %p3483_p7 }
  0xe5   : > { %p3491_p4 = pnand %p3490_p12, %p3484_p9 }
  0xe7   : > { %3494 = shalt.err (!%p3491_p4)
}
  0xe8   : > { %2951 = dma.hbm_to_vmem [thread:$0]  (!%p3841_p6), %s4474_s6, 16, %s417_s1, [#allocation16]  }
  0xe9   : > { %s3716_s23 = smov [#allocation20]   ;;  %s3717_s25 = smov [#allocation23]  }
  0xea   : > { %s438_s30 = sshll.u32 %s3716_s23, 4  ;;  %s462_s17 = sshll.u32 %s3717_s25, 4  ;;  %s439_s30 = int_to_ptr.vmem [resolvable:$true] %s438_s30  ;;  %s463_s17 = int_to_ptr.vmem [resolvable:$true] %s462_s17 }
  0xeb   : > { %s3495_s0 = scalar_lea.hbm %s4476_s8, 16 }
  0xec   : > { %p3496_p13 = scmp.ne.s32.totalorder %s4476_s8, %s3495_s0  ;;  %p3502_p3 = scmp.lt.u32.totalorder %s3495_s0, %s4476_s8 }
  0xee   : > { %p3498_p0 = pnand %p3496_p13, %p3855_p8 }
  0xf0   : > { %p3499_p1 = pneg %p3498_p0 }
  0xf2   : > { %p3504_p2 = pnand %p3502_p3, %p3499_p1 }
  0xf4   : > { %3507 = shalt.err (!%p3504_p2)
}
  0xf5   : > { %s3508_s1 = scalar_lea.vmem %s439_s30, 16  ;;  %s3515_s29 = scalar_lea.vmem %s439_s30, 32 }
  0xf6   : > { %p3509_p5 = scmp.ne.s32.totalorder %s439_s30, %s3508_s1  ;;  %p3516_p10 = scmp.lt.s32.totalorder %s439_s30, %s439_s30 }
  0xf7   : > { %p3517_p11 = scmp.lt.s32.totalorder %s3515_s29, %s3508_s1 }
  0xf8   : > { %p3511_p7 = pnand %p3509_p5, %p3855_p8 }
  0xf9   : > { %p3518_p12 = por %p3517_p11, %p3516_p10 }
  0xfa   : > { %p3512_p9 = pneg %p3511_p7 }
  0xfc   : > { %p3519_p4 = pnand %p3518_p12, %p3512_p9 }
  0xfe   : > { %3522 = shalt.err (!%p3519_p4)
}
  0xff   : > { %2957 = dma.hbm_to_vmem [thread:$0]  (!%p3841_p6), %s4476_s8, 16, %s439_s30, [#allocation19]  }
 0x100   : > { %s3523_s25 = scalar_lea.hbm %s4478_s10, 64 }
 0x101   : > { %p3524_p13 = scmp.ne.s32.totalorder %s4478_s10, %s3523_s25  ;;  %p3530_p3 = scmp.lt.u32.totalorder %s3523_s25, %s4478_s10 }
 0x103   : > { %p3526_p0 = pnand %p3524_p13, %p3855_p8 }
 0x105   : > { %p3527_p1 = pneg %p3526_p0 }
 0x107   : > { %p3532_p2 = pnand %p3530_p3, %p3527_p1 }
 0x109   : > { %3535 = shalt.err (!%p3532_p2)
}
 0x10a   : > { %s3536_s3 = scalar_lea.vmem %s463_s17, 64  ;;  %p3544_p10 = scmp.lt.s32.totalorder %s463_s17, %s463_s17 }
 0x10b   : > { %p3537_p5 = scmp.ne.s32.totalorder %s463_s17, %s3536_s3  ;;  %p3545_p11 = scmp.lt.s32.totalorder %s3536_s3, %s3536_s3 }
 0x10d   : > { %p3539_p7 = pnand %p3537_p5, %p3855_p8  ;;  %p3546_p12 = por %p3545_p11, %p3544_p10 }
 0x10f   : > { %p3540_p9 = pneg %p3539_p7 }
 0x111   : > { %p3547_p4 = pnand %p3546_p12, %p3540_p9 }
 0x113   : > { %3550 = shalt.err (!%p3547_p4)
}
 0x114   : > { %2963 = dma.hbm_to_vmem [thread:$0]  (!%p3841_p6), %s4478_s10, 64, %s463_s17, [#allocation22]  }
 0x115   : > { %s3718_s14 = smov [#allocation26]   ;;  %s3551_s21 = scalar_lea.hbm %s4480_s12, 16 }
 0x116   : > { %s486_s1 = sshll.u32 %s3718_s14, 4  ;;  %p3552_p13 = scmp.ne.s32.totalorder %s4480_s12, %s3551_s21  ;;  %s487_s1 = int_to_ptr.vmem [resolvable:$true] %s486_s1 }
 0x117   : > { %p3558_p3 = scmp.lt.u32.totalorder %s3551_s21, %s4480_s12 }
 0x118   : > { %p3554_p0 = pnand %p3552_p13, %p3855_p8 }
 0x11a   : > { %p3555_p1 = pneg %p3554_p0 }
 0x11c   : > { %p3560_p2 = pnand %p3558_p3, %p3555_p1 }
 0x11e   : > { %3563 = shalt.err (!%p3560_p2)
}
 0x11f   : > { %s3564_s17 = scalar_lea.vmem %s487_s1, 16  ;;  %s3571_s24 = scalar_lea.vmem %s487_s1, 32 }
 0x120   : > { %p3565_p5 = scmp.ne.s32.totalorder %s487_s1, %s3564_s17  ;;  %p3572_p10 = scmp.lt.s32.totalorder %s487_s1, %s487_s1 }
 0x121   : > { %p3573_p11 = scmp.lt.s32.totalorder %s3571_s24, %s3564_s17 }
 0x122   : > { %p3567_p7 = pnand %p3565_p5, %p3855_p8 }
 0x123   : > { %p3574_p12 = por %p3573_p11, %p3572_p10 }
 0x124   : > { %p3568_p9 = pneg %p3567_p7 }
 0x126   : > { %p3575_p4 = pnand %p3574_p12, %p3568_p9 }
 0x128   : > { %3578 = shalt.err (!%p3575_p4)
}
 0x129   : > { %s4507_s16 = sld [smem:[#allocation36_spill]]  ;;  %s4508_s3 = sld [smem:[#allocation37_spill]] }
 0x12a   : > { %2969 = dma.hbm_to_vmem [thread:$0]  (!%p3841_p6), %s4480_s12, 16, %s487_s1, [#allocation25]  }
 0x12b   : > { %s2565_s30 = sadd.s32 4294967294, %s3699_s28   ;;  %s4093_s18 = sadd.s32 1, %s3699_s28  }
 0x12c   : > { %s39_s13 = ssub.s32 %s3699_s28, %s4093_s18  ;;  %s42_s14 = sadd.s32 1, %s3695_s27 }
 0x12d   : > { %p40_p8 = scmp.eq.s32.totalorder %s39_s13, 0  ;;  %p49_p13 = scmp.ne.s32.totalorder %s3695_s27, %s3691_s26 }
 0x12e   : > { %p50_p0 = scmp.eq.s32.totalorder %s3699_s28, 0  ;;  %p337_p7 = scmp.eq.s32.totalorder %s2565_s30, 1 }
 0x12f   : > { %p55_p1 = scmp.ne.s32.totalorder %s3691_s26, %s4507_s16  ;;  %p4510_p2 = scmp.eq.s32.totalorder %s4508_s3, 0 }
 0x130   : > { %s4104_s29 = scalar_select %p40_p8, %s3695_s27, %s42_s14  }
 0x131   : > { %p4106_p3 = por %p50_p0, %p49_p13  ;;  %p4112_p6 = por %p4510_p2, %p55_p1 }
 0x132   : > { %p331_p5 = scmp.eq.s32.totalorder %s4508_s3, 1  ;;  %p2990_p9 = scmp.lt.s32.totalorder %s3699_s28, 2 }
 0x133   : > { %s497_s21 = sand.u32 1, %s3695_s27   ;;  %p4123_p11 = por %p337_p7, %p55_p1 }
 0x134   : > { %p4119_p10 = por %p331_p5, %p49_p13  ;;  %s2580_s25 = sshll.u32 %s497_s21, 4 }
 0x135   : > { %s4513_s23 = scalar_select %p4123_p11, 1, 0 }
 0x136   : > { %s4512_s22 = scalar_select %p4119_p10, 1, 0 }
 0x137   : > { %s2713_s19 = sshll.u32 %s3699_s28, 8  ;;  %s4514_s0 = sld [smem:[#allocation39_spill]] }
 0x138   : > { %s501_s16 = scalar_lea.vmem [#allocation6], %s2580_s25  ;;  %p4137_p12 = pnand %p2990_p9, %p4106_p3 }
 0x139   : > { %s508_s3 = sshll.u32 %s501_s16, 4  ;;  %s4141_s13 = scalar_lea.sflag [#allocation7], %s497_s21  ;;  %s4133_s3 = int_to_ptr.vmem [resolvable:$true] %s508_s3 }
 0x13a   : > { %p3581_p8 = pneg %p4137_p12 }
 0x13d   : > { %s4131_s15 = scalar_lea.hbm %s4514_s0, %s2713_s19  ;;  %s3584_s20 = scalar_lea.hbm %s4514_s0, 512 }
 0x13e   : > { %s3579_s14 = scalar_lea.hbm %s4131_s15, 256  ;;  %p3585_p1 = scmp.lt.u32.totalorder %s4131_s15, %s4514_s0 }
 0x13f   : > { %p3580_p4 = scmp.ne.s32.totalorder %s4131_s15, %s3579_s14  ;;  %p3586_p3 = scmp.lt.u32.totalorder %s3584_s20, %s3579_s14 }
 0x140   : > { %p3588_p5 = scmp.lt.u32.totalorder %s3579_s14, %s4131_s15 }
 0x141   : > { %p3582_p13 = pnand %p3581_p8, %p3580_p4  ;;  %p3587_p2 = por %p3586_p3, %p3585_p1 }
 0x143   : > { %p3583_p0 = pneg %p3582_p13  ;;  %p3589_p7 = por %p3588_p5, %p3587_p2 }
 0x145   : > { %p3590_p9 = pnand %p3589_p7, %p3583_p0 }
 0x147   : > { %3593 = shalt.err (!%p3590_p9)
}
 0x148   : > { %s3594_s21 = scalar_lea.vmem %s4133_s3, 256  ;;  %s3719_s16 = smov [#allocation6]  }
 0x149   : > { %p3595_p4 = scmp.ne.s32.totalorder %s4133_s3, %s3594_s21  ;;  %s3599_s25 = sshll.u32 %s3719_s16, 4  ;;  %s3600_s25 = int_to_ptr.vmem [resolvable:$false] %s3599_s25 }
 0x14a   : > { %s3601_s19 = scalar_lea.vmem %s3600_s25, 512  ;;  %p3602_p10 = scmp.lt.s32.totalorder %s4133_s3, %s3600_s25 }
 0x14b   : > { %p3597_p13 = pnand %p3595_p4, %p3581_p8  ;;  %p3603_p1 = scmp.lt.s32.totalorder %s3601_s19, %s3594_s21 }
 0x14d   : > { %p3598_p11 = pneg %p3597_p13  ;;  %p3604_p3 = por %p3603_p1, %p3602_p10 }
 0x14f   : > { %p3605_p2 = pnand %p3604_p3, %p3598_p11 }
 0x151   : > { %3608 = shalt.err (!%p3605_p2)
}
 0x152   : > { %s3720_s14 = smov 128   ;;  %s3721_s20 = smov 8  }
 0x153   : > { %2973 = dma.hbm_to_vmem [thread:$0]  (!%p4137_p12), %s4131_s15, 256, %s4133_s3, %s4141_s13, %s3720_s14, %s3720_s14, %s3721_s20  }
 0x154   : > { %s4516_s17 = sld [smem:[#allocation38_spill]] }
 0x15a   : > { %p4517_p8 = scmp.ne.s32.totalorder %s4516_s17, 0 }
 0x15b   : > { %s4172_s24 = sand.u32 (!%p4517_p8), 1, %s3691_s26  }
 0x15c   : > { %520 = sbr.rel (%p4517_p8) target bundleno = 2845 (0xb1d), region = 72  ;;  %s2584_s21 = sshll.u32 (!%p4517_p8), %s4172_s24, 4 }
 0x15d   : > { %s523_s16 = scalar_lea.sflag (!%p4517_p8), [#allocation7], %s4172_s24  ;;  %s4178_s25 = scalar_lea.vmem (!%p4517_p8), [#allocation6], %s2584_s21 }
 0x163   : > { %3654 = dma.done.wait (%p4112_p6), %s523_s16, 256  }
 0x164   : > { %3656 = vsyncadd (%p4112_p6), %s523_s16, 4294967040  ;;  %s4518_s15 = sld [smem:[#allocation37_spill]] }
 0x16a   : > { %p4519_p10 = scmp.eq.s32.totalorder %s4518_s15, 0 }
 0x16c   : > { %3658 = dma.done.wait (%p4519_p10), [#allocation10], 32   ;;  %p4520_p11 = pmov %p4519_p10 }
 0x16d   : > { %p4521_p12 = pmov %p4519_p10 }
 0x16e   : > { %3660 = vsyncadd (%p4520_p11), [#allocation10], 4294967264 }
 0x16f   : > { %3662 = dma.done.wait (%p4521_p12), [#allocation13], 3120   ;;  %p4522_p0 = pmov %p4519_p10 }
 0x171   : > { %3664 = vsyncadd (%p4522_p0), [#allocation13], 4294964176  ;;  %p4523_p5 = pmov %p4522_p0 }
 0x172   : > { %p4524_p7 = pmov %p4522_p0 }
 0x173   : > { %3666 = dma.done.wait (%p4523_p5), [#allocation16], 1040  }
 0x174   : > { %3668 = vsyncadd (%p4524_p7), [#allocation16], 4294966256  ;;  %p4525_p6 = pmov %p4522_p0 }
 0x175   : > { %p4526_p9 = pmov %p4522_p0 }
 0x176   : > { %3670 = dma.done.wait (%p4525_p6), [#allocation19], 32  }
 0x177   : > { %3672 = vsyncadd (%p4526_p9), [#allocation19], 4294967264  ;;  %p4527_p4 = pmov %p4522_p0 }
 0x178   : > { %p4528_p13 = pmov %p4522_p0 }
 0x179   : > { %3674 = dma.done.wait (%p4527_p4), [#allocation22], 4160  }
 0x17a   : > { %3676 = vsyncadd (%p4528_p13), [#allocation22], 4294963136  ;;  %p4529_p1 = pmov %p4522_p0 }
 0x17b   : > { %p4530_p3 = pmov %p4522_p0 }
 0x17c   : > { %3678 = dma.done.wait (%p4529_p1), [#allocation25], 4112  }
 0x17d   : > { %3680 = vsyncadd (%p4530_p3), [#allocation25], 4294963184  ;;  %v618_v0 = vld [vmem:[%s4178_s25] sm:$0xff]  ;;  %v619_v1 = vld [vmem:[%s4178_s25 + $0x8] sm:$0xff]  ;;  %v3722_v4 = vmov 0.0   ;;  %v3723_v30 = vmov 0   ;;  %v696_v53 = vlaneseq }
 0x17e   : > { %622 = vadd.xlane.f32.xlu0 %v618_v0  ;;  %v3065_v2 = vld [vmem:[#allocation12 + $0x4] ss:$12 sps:$4 sm:$0xff]   ;;  %v3067_v3 = vld [vmem:[#allocation12] ss:$12 sps:$4 sm:$0xff]   ;;  %2793 = vmatprep.subr.bf16.mxu1 %v3722_v4  ;;  %v3068_v5 = vld [vmem:[#allocation12 + $0x8] ss:$12 sps:$4 sm:$0xff]  }
 0x17f   : > { %v3069_v6 = vld [vmem:[#allocation12 + $0x1c] ss:$12 sps:$4 sm:$0xff]   ;;  %839 = vmatprep.subr.bf16.mxu0 %v3065_v2  ;;  %2794 = vmatpush3.bf16.msra.mxu1 %v3068_v5  ;;  %v3071_v15 = vld [vmem:[#allocation12 + $0x18] ss:$12 sps:$4 sm:$0xff]   ;;  %v3072_v16 = vld [vmem:[#allocation12 + $0x20] ss:$12 sps:$4 sm:$0xff]  }
 0x180   : > { %840 = vmatpush1.bf16.msra.mxu0 %v3067_v3  ;;  %2795 = vmatprep.subr.bf16.mxu1 %v3722_v4  ;;  %v3073_v17 = vld [vmem:[#allocation12 + $0x34] ss:$12 sps:$4 sm:$0xff]   ;;  %v3075_v18 = vld [vmem:[#allocation12 + $0x30] ss:$12 sps:$4 sm:$0xff]   ;;  %v3076_v19 = vld [vmem:[#allocation12 + $0x38] ss:$12 sps:$4 sm:$0xff]  }
 0x181   : > { %841 = vmatprep.subr.bf16.mxu0 %v3069_v6  ;;  %v3077_v20 = vld [vmem:[#allocation12 + $0x4c] ss:$12 sps:$4 sm:$0xff]   ;;  %v3079_v21 = vld [vmem:[#allocation12 + $0x48] ss:$12 sps:$4 sm:$0xff]   ;;  %v3080_v22 = vld [vmem:[#allocation12 + $0x50] ss:$12 sps:$4 sm:$0xff]   ;;  %871 = vmatprep.mubr.bf16.mxu0 %v3723_v30 }
 0x182   : > { %624 = vadd.xlane.f32.xlu0 %v619_v1  ;;  %v3081_v23 = vld [vmem:[#allocation12 + $0x64] ss:$12 sps:$4 sm:$0xff]   ;;  %v3083_v24 = vld [vmem:[#allocation12 + $0x60] ss:$12 sps:$4 sm:$0xff]   ;;  %v3084_v25 = vld [vmem:[#allocation12 + $0x68] ss:$12 sps:$4 sm:$0xff]  }
 0x183   : > { %2796 = vmatpush3.bf16.msra.mxu1 %v3072_v16  ;;  %v3085_v26 = vld [vmem:[#allocation12 + $0x7c] ss:$12 sps:$4 sm:$0xff]   ;;  %v3087_v27 = vld [vmem:[#allocation12 + $0x78] ss:$12 sps:$4 sm:$0xff]   ;;  %v3088_v28 = vld [vmem:[#allocation12 + $0x80] ss:$12 sps:$4 sm:$0xff]  }
 0x184   : > { %842 = vmatpush1.bf16.msra.mxu0 %v3071_v15  ;;  %2797 = vmatprep.subr.bf16.mxu1 %v3722_v4  ;;  %v3089_v29 = vld [vmem:[#allocation12 + $0x94] ss:$12 sps:$4 sm:$0xff]   ;;  %vm3724_vm0 = vmmov 0   ;;  %v3091_v31 = vld [vmem:[#allocation12 + $0x90] ss:$12 sps:$4 sm:$0xff]   ;;  %v4238_v54 = vshrl.u32 %v696_v53, 7 }
 0x185   : > { %843 = vmatprep.subr.bf16.mxu0 %v3073_v17  ;;  %2809 = vmatprep.mubr.msk.bf16.mxu1 %vm3724_vm0, %v3722_v4  ;;  %v3092_v32 = vld [vmem:[#allocation12 + $0x98] ss:$12 sps:$4 sm:$0xff]   ;;  %v3095_v34 = vld [vmem:[#allocation12 + $0xa8] ss:$12 sps:$4 sm:$0xff]   ;;  %v3096_v35 = vld [vmem:[#allocation12 + $0xb0] ss:$12 sps:$4 sm:$0xff]  }
 0x186   : > { %v3093_v33 = vld [vmem:[#allocation12 + $0xac] ss:$12 sps:$4 sm:$0xff]   ;;  %v2598_v44 = vld [vmem:[#allocation9] ss:$0 sm:$0xff]  ;;  %v2599_v48 = vld [vmem:[#allocation11] ss:$0 sm:$0xff] }
 0x187   : > { %2798 = vmatpush3.bf16.msra.mxu1 %v3076_v19  ;;  %v698_v55 = vsub.s32 0, %v4238_v54  ;;  %v694_v56 = vld [vmem:[#allocation14] sm:$0x7]  ;;  %v706_v57 = vsub.s32 2, %v4238_v54  ;;  %v702_v58 = vsub.s32 1, %v4238_v54  ;;  %vm926_vm1 = vcmask 261120  }
 0x188   : > { %844 = vmatpush1.bf16.msra.mxu0 %v3075_v18  ;;  %2799 = vmatprep.subr.bf16.mxu1 %v3722_v4  ;;  %s3725_s1 = smov 96   ;;  %s3726_s3 = smov 32   ;;  %vm1189_vm4 = vcmask 130048   ;;  %vm1465_vm5 = vcmask 523520   ;;  %vm1472_vm6 = vcmask 785920   ;;  %vm1479_vm7 = vcmask 1048320  }
 0x189   : > { %845 = vmatprep.subr.bf16.mxu0 %v3077_v20  ;;  %v699_v59 = vrot.slane %v694_v56, %v698_v55  ;;  %v707_v60 = vrot.slane %v694_v56, %v706_v57  ;;  %v703_v63 = vrot.slane %v694_v56, %v702_v58  ;;  %s3727_s30 = smov 64   ;;  %s616_s13 = scalar_lea.vmem [#allocation27], %s2584_s21 }
 0x18a   : > { %s2378_s19 = sshll.u32 %s616_s13, 4  ;;  %s2714_s14 = sshll.u32 %s4518_s15, 8  ;;  %s4424_s19 = int_to_ptr.vmem [resolvable:$true] %s2378_s19 }
 0x18b   : > { %2800 = vmatpush3.bf16.msra.mxu1 %v3080_v22  ;;  %s4531_s16 = sld [smem:[#allocation42_spill]]  ;;  %s2365_s21 = scalar_lea.sflag [#allocation8], %s4172_s24 }
 0x18c   : > { %846 = vmatpush1.bf16.msra.mxu0 %v3079_v21  ;;  %2801 = vmatprep.subr.bf16.mxu1 %v3722_v4  ;;  %p4532_p8 = scmp.ne.s32.totalorder %s4512_s22, 0  ;;  %s3729_s15 = smov [#allocation27]  }
 0x18d   : > { %847 = vmatprep.subr.bf16.mxu0 %v3081_v23 }
 0x18f   : > { %2802 = vmatpush3.bf16.msra.mxu1 %v3084_v25 }
 0x190   : > { %848 = vmatpush1.bf16.msra.mxu0 %v3083_v24  ;;  %2803 = vmatprep.subr.bf16.mxu1 %v3722_v4 }
 0x191   : > { %849 = vmatprep.subr.bf16.mxu0 %v3085_v26 }
 0x193   : > { %2804 = vmatpush3.bf16.msra.mxu1 %v3088_v28 }
 0x194   : > { %850 = vmatpush1.bf16.msra.mxu0 %v3087_v27  ;;  %2805 = vmatprep.subr.bf16.mxu1 %v3722_v4 }
 0x195   : > { %851 = vmatprep.subr.bf16.mxu0 %v3089_v29 }
 0x197   : > { %2806 = vmatpush3.bf16.msra.mxu1 %v3092_v32 }
 0x198   : > { %852 = vmatpush1.bf16.msra.mxu0 %v3091_v31  ;;  %2807 = vmatprep.subr.bf16.mxu1 %v3722_v4 }
 0x199   : > { %853 = vmatprep.subr.bf16.mxu0 %v3093_v33 }
 0x19b   : > { %2808 = vmatpush3.bf16.msra.mxu1 %v3096_v35 }
 0x19c   : > { %854 = vmatpush1.bf16.msra.mxu0 %v3095_v34  ;;  %2813 = vmatprep.subr.bf16.mxu1 %v3722_v4 }
 0x19d   : > { %2837 = vmatprep.subr.bf16.mxu0 %v3722_v4 }
 0x20b   : > { %v623_v7 = vpop.xlane.xlu0 %622 }
 0x20c   : > { %v627_v8 = vmul.f32 0.0078125, %v623_v7 }
 0x20e   : > { %v4212_v9 = vsub.f32 %v618_v0, %v627_v8 }
 0x20f   : > { %v625_v10 = vpop.xlane.xlu0 %624 }
 0x210   : > { %v628_v11 = vmul.f32 0.0078125, %v625_v10  ;;  %v631_v12 = vmul.f32 %v4212_v9, %v4212_v9 }
 0x212   : > { %v4216_v13 = vsub.f32 %v619_v1, %v628_v11  ;;  %633 = vadd.xlane.f32.xlu1 %v631_v12 }
 0x214   : > { %v632_v14 = vmul.f32 %v4216_v13, %v4216_v13 }
 0x216   : > { %635 = vadd.xlane.f32.xlu1 %v632_v14 }
 0x29f   : > { %v634_v36 = vpop.xlane.xlu1 %633 }
 0x2a0   : > { %v637_v37 = vmul.f32 0.0078125, %v634_v36 }
 0x2a2   : > { %v639_v38 = vadd.f32 1e-05, %v637_v37 }
 0x2a3   : > { %v636_v39 = vpop.xlane.xlu1 %635 }
 0x2a4   : > { %3185 = vrsqrt.f32 %v639_v38  ;;  %v638_v40 = vmul.f32 0.0078125, %v636_v39  ;;  %v984_v38 = vand.u32 127, %v696_v53  ;;  %v982_v39 = vadd.s32 8, %v4238_v54 }
 0x2a6   : > { %v640_v41 = vadd.f32 1e-05, %v638_v40  ;;  %vm985_vm2 = vcmp.le.s32.totalorder %v984_v38, %v4238_v54  ;;  %vm986_vm3 = vcmp.le.s32.totalorder %v984_v38, %v982_v39  ;;  %v3728_v40 = vmov -1e+09  }
 0x2a8   : > { %3187 = vrsqrt.f32 %v640_v41  ;;  %v987_v41 = vsel %vm985_vm2, 0.0, %v3728_v40 }
 0x2ae   : > { %v3186_v42 = vpop.eup %3185 }
 0x2af   : > { %v643_v43 = vmul.f32 %v3186_v42, %v4212_v9 }
 0x2b1   : > { %v651_v47 = vmul.f32 %v2598_v44, %v643_v43  ;;  %v988_v43 = vsel %vm986_vm3, 0.0, %v3728_v40 }
 0x2b2   : > { %v3188_v45 = vpop.eup %3187 }
 0x2b3   : > { %v644_v46 = vmul.f32 %v3188_v45, %v4216_v13  ;;  %v659_v50 = vadd.f32 %v2599_v48, %v651_v47 }
 0x2b5   : > { %v652_v49 = vmul.f32 %v2598_v44, %v644_v46 }
 0x2b7   : > { %v660_v51 = vadd.f32 %v2599_v48, %v652_v49 }
 0x2b9   : > { %v661_v52 = vpack.c.bf16 %v660_v51, %v659_v50 }
 0x2bb   : > { %872 = vmatmul.mubr.bf16.vlgmr.msra.gmra.mrb[0].mxu0 %v661_v52  ;;  %2810 = vmatmul.mubr.bf16.vlgmr.msra.gmra.mrb[0].mxu1 %v661_v52 }
 0x2bc   : > { %2815 = vmatprep.mubr.msk.bf16.mxu1 %vm3724_vm0, %v3722_v4  ;;  %2839 = vmatprep.mubr.msk.bf16.mxu0 %vm3724_vm0, %v3722_v4 }
 0x38e   : > { %v873_v61 = vpop.f32.mrb[0].mxu0  ;;  %v916_v62 = vpop.f32.mrb[0].mxu1 }
 0x38f   : > { %v874_v0 = vadd.f32 %v873_v61, %v699_v59  ;;  %v875_v1 = vpop.f32.mrb[1].mxu0  ;;  %v2811_v2 = vpop.f32.mrb[1].mxu1  ;;  %v917_v6 = vadd.f32 %v916_v62, %v707_v60 }
 0x390   : > { %v877_v3 = vpop.f32.mrb[2].mxu0  ;;  %v919_v5 = vpop.f32.mrb[2].mxu1  ;;  %v876_v11 = vadd.f32 %v875_v1, %v703_v63 }
 0x391   : > { %v878_v7 = vadd.f32 %v877_v3, %v699_v59  ;;  %v920_v8 = vadd.f32 %v919_v5, %v707_v60  ;;  %v879_v9 = vpop.f32.mrb[3].mxu0  ;;  %v2812_v10 = vpop.f32.mrb[3].mxu1  ;;  %v923_v13 = vmul.f32 0.17677669, %v874_v0 }
 0x392   : > { %v880_v12 = vadd.f32 %v879_v9, %v703_v63 }
 0x393   : > { %v924_v14 = vmul.f32 0.17677669, %v878_v7  ;;  %v4249_v15 = vpack.c.bf16 %v920_v8, %v917_v6 }
 0x394   : > { %v928_v16 = vpack.c.bf16 %v880_v12, %v876_v11 }
 0x395   : > { %v925_v17 = vpack.c.bf16 %v924_v14, %v923_v13  ;;  %931 = vst.msk [vmem:[#allocation4] sm:$0xff] %vm926_vm1, %v4249_v15 }
 0x396   : > { %929 = vst.msk [vmem:[#allocation3] sm:$0xff] %vm926_vm1, %v928_v16  ;;  %939 = vrot.lane.b32.xlu0 %v928_v16, %s3725_s1 }
 0x397   : > { %927 = vst.msk [vmem:[#allocation2] sm:$0xff] %vm926_vm1, %v925_v17  ;;  %933 = vrot.lane.b32.xlu1 %v925_v17, %s3725_s1 }
 0x39a   : > { %970 = vrot.lane.b32.xlu0 %v928_v16, %s3726_s3 }
 0x39b   : > { %955 = vrot.lane.b32.xlu1 %v928_v16, %s3727_s30 }
 0x39c   : > { %v997_v18 = vld [vmem:[#allocation4] sm:$0xff] }
 0x39d   : > { %2838 = vmatpush3.bf16.msra.mxu0 %v997_v18  ;;  %v993_v19 = vld [vmem:[#allocation3] sm:$0xff] }
 0x39e   : > { %v1005_v20 = vsel %vm926_vm1, %v993_v19, 0  ;;  %2849 = vmatprep.subr.bf16.mxu0 %v3722_v4  ;;  %v989_v21 = vld [vmem:[#allocation2] sm:$0xff] }
 0x39f   : > { %2814 = vmatpush3.bf16.xpose.msra.mxu1 %v1005_v20  ;;  %950 = vrot.lane.b32.xlu1 %v925_v17, %s3727_s30 }
 0x3a0   : > { %2819 = vmatprep.subr.bf16.mxu1 %v3722_v4 }
 0x3a3   : > { %965 = vrot.lane.b32.xlu1 %v925_v17, %s3726_s3 }
 0x3a6   : > { %2816 = vmatmul.mubr.msk.bf16.vlgmr.msra.gmra.mrb[4].mxu1 %vm926_vm1, %v989_v21 }
 0x3a7   : > { %2821 = vmatprep.mubr.msk.bf16.mxu1 %vm3724_vm0, %v3722_v4 }
 0x408   : > { %v940_v22 = vpop.permute.xlu0 %939 }
 0x409   : > { %943 = vst.msk [vmem:[#allocation3 + $0x8] sm:$0xff] %vm926_vm1, %v940_v22  ;;  %v934_v23 = vpop.permute.xlu1 %933 }
 0x40a   : > { %937 = vst.msk [vmem:[#allocation2 + $0x8] sm:$0xff] %vm926_vm1, %v934_v23 }
 0x40c   : > { %v971_v24 = vpop.permute.xlu0 %970 }
 0x40d   : > { %974 = vst.msk [vmem:[#allocation3 + $0x18] sm:$0xff] %vm926_vm1, %v971_v24  ;;  %v956_v25 = vpop.permute.xlu1 %955 }
 0x40e   : > { %959 = vst.msk [vmem:[#allocation3 + $0x10] sm:$0xff] %vm926_vm1, %v956_v25 }
 0x410   : > { %v994_v26 = vld [vmem:[#allocation3 + $0x8] sm:$0xff] }
 0x411   : > { %v951_v27 = vpop.permute.xlu1 %950  ;;  %v1052_v28 = vsel %vm926_vm1, %v994_v26, 0  ;;  %v990_v32 = vld [vmem:[#allocation2 + $0x8] sm:$0xff] }
 0x412   : > { %954 = vst.msk [vmem:[#allocation2 + $0x10] sm:$0xff] %vm926_vm1, %v951_v27  ;;  %2820 = vmatpush3.bf16.xpose.msra.mxu1 %v1052_v28 }
 0x413   : > { %2825 = vmatprep.subr.bf16.mxu1 %v3722_v4 }
 0x414   : > { %v996_v34 = vld [vmem:[#allocation3 + $0x18] sm:$0xff] }
 0x415   : > { %v966_v29 = vpop.permute.xlu1 %965  ;;  %v995_v31 = vld [vmem:[#allocation3 + $0x10] sm:$0xff]  ;;  %v1146_v36 = vsel %vm926_vm1, %v996_v34, 0 }
 0x416   : > { %969 = vst.msk [vmem:[#allocation2 + $0x18] sm:$0xff] %vm926_vm1, %v966_v29  ;;  %v1099_v33 = vsel %vm926_vm1, %v995_v31, 0 }
 0x419   : > { %2822 = vmatmul.mubr.msk.bf16.vlgmr.msra.gmra.mrb[8].mxu1 %vm926_vm1, %v990_v32  ;;  %v991_v35 = vld [vmem:[#allocation2 + $0x10] sm:$0xff] }
 0x41a   : > { %2826 = vmatpush3.bf16.xpose.msra.mxu1 %v1099_v33  ;;  %2827 = vmatprep.mubr.msk.bf16.mxu1 %vm3724_vm0, %v3722_v4 }
 0x41b   : > { %2831 = vmatprep.subr.bf16.mxu1 %v3722_v4 }
 0x41d   : > { %v992_v37 = vld [vmem:[#allocation2 + $0x18] sm:$0xff] }
 0x421   : > { %2828 = vmatmul.mubr.msk.bf16.vlgmr.msra.gmra.mrb[12].mxu1 %vm926_vm1, %v991_v35 }
 0x422   : > { %2832 = vmatpush3.bf16.xpose.msra.mxu1 %v1146_v36  ;;  %2833 = vmatprep.mubr.msk.bf16.mxu1 %vm3724_vm0, %v3722_v4 }
 0x423   : > { %2843 = vmatprep.subr.bf16.mxu1 %v3722_v4 }
 0x429   : > { %2834 = vmatmul.mubr.msk.bf16.vlgmr.msra.gmra.mrb[16].mxu1 %vm926_vm1, %v992_v37 }
 0x42a   : > { %2845 = vmatprep.mubr.msk.bf16.mxu1 %vm3724_vm0, %v3722_v4 }
 0x479   : > { %v1041_v42 = vpop.f32.mrb[4].mxu1 }
 0x47a   : > { %v1042_v44 = vadd.f32 %v1041_v42, %v987_v41  ;;  %v2817_v45 = vpop.f32.mrb[5].mxu1 }
 0x47b   : > { %v1044_v46 = vpop.f32.mrb[6].mxu1 }
 0x47c   : > { %v1045_v47 = vadd.f32 %v1044_v46, %v988_v43  ;;  %v2818_v48 = vpop.f32.mrb[7].mxu1  ;;  %v1190_v49 = vsel %vm1189_vm4, %v1042_v44, -inf }
 0x47d   : > { %1191 = vmax.xlane.f32.xlu0 %v1190_v49 }
 0x47e   : > { %v1193_v50 = vsel %vm1189_vm4, %v1045_v47, -inf }
 0x47f   : > { %1194 = vmax.xlane.f32.xlu1 %v1193_v50 }
 0x4ec   : > { %v1088_v51 = vpop.f32.mrb[8].mxu1 }
 0x4ed   : > { %v1089_v52 = vadd.f32 %v1088_v51, %v987_v41  ;;  %v2823_v53 = vpop.f32.mrb[9].mxu1 }
 0x4ee   : > { %v1091_v56 = vpop.f32.mrb[10].mxu1 }
 0x4ef   : > { %v1092_v59 = vadd.f32 %v1091_v56, %v988_v43  ;;  %v2824_v60 = vpop.f32.mrb[11].mxu1  ;;  %v1196_v61 = vsel %vm1189_vm4, %v1089_v52, -inf }
 0x4f0   : > { %1197 = vmax.xlane.f32.xlu0 %v1196_v61 }
 0x4f1   : > { %v1199_v62 = vsel %vm1189_vm4, %v1092_v59, -inf }
 0x4f4   : > { %1200 = vmax.xlane.f32.xlu0 %v1199_v62  ;;  %v1135_v63 = vpop.f32.mrb[12].mxu1 }
 0x4f5   : > { %v1136_v0 = vadd.f32 %v1135_v63, %v987_v41  ;;  %v2829_v1 = vpop.f32.mrb[13].mxu1 }
 0x4f6   : > { %v1138_v2 = vpop.f32.mrb[14].mxu1 }
 0x4f7   : > { %v1139_v3 = vadd.f32 %v1138_v2, %v988_v43  ;;  %v2830_v5 = vpop.f32.mrb[15].mxu1  ;;  %v1202_v6 = vsel %vm1189_vm4, %v1136_v0, -inf }
 0x4f8   : > { %1203 = vmax.xlane.f32.xlu0 %v1202_v6 }
 0x4f9   : > { %v1205_v7 = vsel %vm1189_vm4, %v1139_v3, -inf }
 0x4fa   : > { %1206 = vmax.xlane.f32.xlu1 %v1205_v7 }
 0x4fc   : > { %v1182_v8 = vpop.f32.mrb[16].mxu1 }
 0x4fd   : > { %v1183_v9 = vadd.f32 %v1182_v8, %v987_v41  ;;  %v2835_v10 = vpop.f32.mrb[17].mxu1 }
 0x4fe   : > { %v1185_v11 = vpop.f32.mrb[18].mxu1 }
 0x4ff   : > { %v2836_v12 = vpop.f32.mrb[19].mxu1  ;;  %v1208_v13 = vsel %vm1189_vm4, %v1183_v9, -inf  ;;  %v1186_v24 = vadd.f32 %v1185_v11, %v988_v43 }
 0x500   : > { %1209 = vmax.xlane.f32.xlu0 %v1208_v13 }
 0x501   : > { %v1211_v25 = vsel %vm1189_vm4, %v1186_v24, -inf }
 0x50a   : > { %v1192_v14 = vpop.xlane.xlu0 %1191 }
 0x50b   : > { %v1214_v16 = vsub.f32 %v1042_v44, %v1192_v14  ;;  %960 = vrot.lane.b32.xlu1 %v4249_v15, %s3727_s30 }
 0x50c   : > { %v1195_v17 = vpop.xlane.xlu1 %1194 }
 0x50d   : > { %v1222_v18 = vmul.f32 1.442695, %v1214_v16  ;;  %v1215_v19 = vsub.f32 %v1045_v47, %v1195_v17 }
 0x50f   : > { %v1224_v20 = vmul.f32 1.442695, %v1215_v19  ;;  %3189 = vpow2.f32 %v1222_v18 }
 0x511   : > { %3191 = vpow2.f32 %v1224_v20 }
 0x516   : > { %945 = vrot.lane.b32.xlu0 %v4249_v15, %s3725_s1 }
 0x519   : > { %v3190_v21 = vpop.eup %3189 }
 0x51a   : > { %v1238_v61 = vsel %vm1189_vm4, %v3190_v21, 0.0 }
 0x51b   : > { %v4302_v22 = vpop.eup %3191 }
 0x51c   : > { %v1270_v23 = vpack.c.bf16 %v4302_v22, %v3190_v21  ;;  %v1241_v7 = vsel %vm1189_vm4, %v4302_v22, 0.0 }
 0x51e   : > { %2840 = vmatmul.mubr.msk.bf16.vlgmr.msra.gmra.mrb[4].mxu0 %vm1189_vm4, %v1270_v23 }
 0x51f   : > { %2851 = vmatprep.mubr.msk.bf16.mxu0 %vm3724_vm0, %v3722_v4 }
 0x52f   : > { %1212 = vmax.xlane.f32.xlu1 %v1211_v25  ;;  %v3097_v25 = vld [vmem:[#allocation15] sm:$0xff]  }
 0x540   : > { %975 = vrot.lane.b32.xlu1 %v4249_v15, %s3726_s3 }
 0x57d   : > { %v1198_v26 = vpop.xlane.xlu0 %1197 }
 0x57e   : > { %v1216_v27 = vsub.f32 %v1089_v52, %v1198_v26 }
 0x580   : > { %v1226_v28 = vmul.f32 1.442695, %v1216_v27 }
 0x581   : > { %v1201_v29 = vpop.xlane.xlu0 %1200 }
 0x582   : > { %3193 = vpow2.f32 %v1226_v28  ;;  %v1217_v31 = vsub.f32 %v1092_v59, %v1201_v29  ;;  %v3098_v28 = vld [vmem:[#allocation15 + $0x8] sm:$0xff]  }
 0x584   : > { %v1228_v32 = vmul.f32 1.442695, %v1217_v31 }
 0x585   : > { %v1204_v33 = vpop.xlane.xlu0 %1203 }
 0x586   : > { %3195 = vpow2.f32 %v1228_v32  ;;  %v1218_v34 = vsub.f32 %v1136_v0, %v1204_v33 }
 0x587   : > { %v1207_v35 = vpop.xlane.xlu1 %1206 }
 0x588   : > { %v1230_v36 = vmul.f32 1.442695, %v1218_v34  ;;  %v1219_v37 = vsub.f32 %v1139_v3, %v1207_v35 }
 0x58a   : > { %3197 = vpow2.f32 %v1230_v36  ;;  %v1232_v38 = vmul.f32 1.442695, %v1219_v37 }
 0x58b   : > { %v961_v39 = vpop.permute.xlu1 %960 }
 0x58c   : > { %v3194_v40 = vpop.eup %3193  ;;  %3199 = vpow2.f32 %v1232_v38  ;;  %964 = vst.msk [vmem:[#allocation4 + $0x10] sm:$0xff] %vm926_vm1, %v961_v39  ;;  %v3099_v38 = vld [vmem:[#allocation15 + $0x10] sm:$0xff]  }
 0x58d   : > { %v1210_v15 = vpop.xlane.xlu0 %1209  ;;  %v1244_v41 = vsel %vm1189_vm4, %v3194_v40, 0.0 }
 0x58e   : > { %v1220_v42 = vsub.f32 %v1183_v9, %v1210_v15  ;;  %1245 = vadd.xlane.f32.xlu1 %v1244_v41 }
 0x590   : > { %v3196_v43 = vpop.eup %3195  ;;  %v1234_v44 = vmul.f32 1.442695, %v1220_v42 }
 0x591   : > { %v946_v45 = vpop.permute.xlu0 %945  ;;  %v1247_v46 = vsel %vm1189_vm4, %v3196_v43, 0.0  ;;  %v1271_v56 = vpack.c.bf16 %v3196_v43, %v3194_v40 }
 0x592   : > { %3201 = vpow2.f32 %v1234_v44  ;;  %949 = vst.msk [vmem:[#allocation4 + $0x8] sm:$0xff] %vm926_vm1, %v946_v45  ;;  %1248 = vadd.xlane.f32.xlu0 %v1247_v46  ;;  %v3100_v46 = vld [vmem:[#allocation15 + $0x18] sm:$0xff]  }
 0x593   : > { %v999_v47 = vld [vmem:[#allocation4 + $0x10] sm:$0xff] }
 0x594   : > { %v3198_v48 = vpop.eup %3197  ;;  %2850 = vmatpush3.bf16.msra.mxu0 %v999_v47 }
 0x595   : > { %v1250_v49 = vsel %vm1189_vm4, %v3198_v48, 0.0  ;;  %2861 = vmatprep.subr.bf16.mxu0 %v3722_v4 }
 0x596   : > { %v3200_v50 = vpop.eup %3199  ;;  %1251 = vadd.xlane.f32.xlu0 %v1250_v49  ;;  %v3102_v49 = vld [vmem:[#allocation15 + $0x28] sm:$0xff]  }
 0x597   : > { %v1272_v51 = vpack.c.bf16 %v3200_v50, %v3198_v48  ;;  %v1253_v52 = vsel %vm1189_vm4, %v3200_v50, 0.0  ;;  %v3101_v48 = vld [vmem:[#allocation15 + $0x20] sm:$0xff]   ;;  %v3103_v50 = vld [vmem:[#allocation15 + $0x30] sm:$0xff]  }
 0x599   : > { %2852 = vmatmul.mubr.msk.bf16.vlgmr.msra.gmra.mrb[8].mxu0 %vm1189_vm4, %v1272_v51  ;;  %v998_v53 = vld [vmem:[#allocation4 + $0x8] sm:$0xff] }
 0x59a   : > { %1254 = vadd.xlane.f32.xlu0 %v1253_v52  ;;  %2844 = vmatpush3.bf16.msra.mxu1 %v998_v53  ;;  %v3104_v51 = vld [vmem:[#allocation15 + $0x38] sm:$0xff]  }
 0x59b   : > { %2855 = vmatprep.subr.bf16.mxu1 %v3722_v4  ;;  %2877 = vmatprep.mubr.msk.bf16.mxu0 %vm3724_vm0, %v3722_v4 }
 0x59c   : > { %v3202_v59 = vpop.eup %3201  ;;  %2862 = vmatpush3.bf16.msra.mxu0 %v3097_v25 }
 0x59d   : > { %2846 = vmatmul.mubr.msk.bf16.vlgmr.msra.gmra.mrb[20].mxu1 %vm1189_vm4, %v1271_v56  ;;  %v1256_v60 = vsel %vm1189_vm4, %v3202_v59, 0.0  ;;  %2863 = vmatprep.subr.bf16.mxu0 %v3722_v4 }
 0x59e   : > { %1257 = vadd.xlane.f32.xlu1 %v1256_v60  ;;  %2857 = vmatprep.mubr.msk.bf16.mxu1 %vm3724_vm0, %v3722_v4 }
 0x5a0   : > { %2864 = vmatpush3.bf16.msra.mxu0 %v3098_v28 }
 0x5a1   : > { %2865 = vmatprep.subr.bf16.mxu0 %v3722_v4 }
 0x5a2   : > { %1239 = vadd.xlane.f32.xlu1 %v1238_v61 }
 0x5a4   : > { %2866 = vmatpush3.bf16.msra.mxu0 %v3099_v38  ;;  %v3128_v38 = vld [vmem:[#allocation21 + $0x6c] ss:$16 sps:$4 sm:$0xff]  }
 0x5a5   : > { %2867 = vmatprep.subr.bf16.mxu0 %v3722_v4 }
 0x5a8   : > { %2868 = vmatpush3.bf16.msra.mxu0 %v3100_v46  ;;  %v3135_v46 = vld [vmem:[#allocation21 + $0xa0] ss:$16 sps:$4 sm:$0xff]  }
 0x5a9   : > { %2869 = vmatprep.subr.bf16.mxu0 %v3722_v4 }
 0x5ac   : > { %2870 = vmatpush3.bf16.msra.mxu0 %v3101_v48  ;;  %v3143_v48 = vld [vmem:[#allocation21 + $0xc4] ss:$16 sps:$4 sm:$0xff]  }
 0x5ad   : > { %2871 = vmatprep.subr.bf16.mxu0 %v3722_v4 }
 0x5b0   : > { %2872 = vmatpush3.bf16.msra.mxu0 %v3102_v49  ;;  %v3146_v49 = vld [vmem:[#allocation21 + $0xcc] ss:$16 sps:$4 sm:$0xff]  }
 0x5b1   : > { %2873 = vmatprep.subr.bf16.mxu0 %v3722_v4 }
 0x5b4   : > { %2874 = vmatpush3.bf16.msra.mxu0 %v3103_v50  ;;  %v3141_v50 = vld [vmem:[#allocation21 + $0xc0] ss:$16 sps:$4 sm:$0xff]  }
 0x5b5   : > { %2875 = vmatprep.subr.bf16.mxu0 %v3722_v4 }
 0x5b8   : > { %2876 = vmatpush3.bf16.msra.mxu0 %v3104_v51  ;;  %v3144_v51 = vld [vmem:[#allocation21 + $0xc8] ss:$16 sps:$4 sm:$0xff]  }
 0x5bc   : > { %v1213_v62 = vpop.xlane.xlu1 %1212 }
 0x5bd   : > { %v1221_v63 = vsub.f32 %v1186_v24, %v1213_v62 }
 0x5bf   : > { %v1236_v0 = vmul.f32 1.442695, %v1221_v63 }
 0x5c0   : > { %v976_v1 = vpop.permute.xlu1 %975 }
 0x5c1   : > { %3203 = vpow2.f32 %v1236_v0  ;;  %979 = vst.msk [vmem:[#allocation4 + $0x18] sm:$0xff] %vm926_vm1, %v976_v1 }
 0x5c8   : > { %v1000_v2 = vld [vmem:[#allocation4 + $0x18] sm:$0xff] }
 0x5c9   : > { %2856 = vmatpush3.bf16.msra.mxu1 %v1000_v2 }
 0x5cb   : > { %v3204_v3 = vpop.eup %3203 }
 0x5cc   : > { %v1259_v5 = vsel %vm1189_vm4, %v3204_v3, 0.0  ;;  %v1273_v6 = vpack.c.bf16 %v3204_v3, %v3202_v59 }
 0x5cd   : > { %1260 = vadd.xlane.f32.xlu0 %v1259_v5  ;;  %v2632_v5 = vld [vmem:[#allocation17] ss:$0 sm:$0xff] }
 0x5ce   : > { %2858 = vmatmul.mubr.msk.bf16.vlgmr.msra.gmra.mrb[24].mxu1 %vm1189_vm4, %v1273_v6 }
 0x5cf   : > { %1883 = vmatprep.mubr.bf16.mxu1 %v3723_v30 }
 0x5d1   : > { %1242 = vadd.xlane.f32.xlu0 %v1241_v7 }
 0x5f1   : > { %v1311_v8 = vpop.f32.mrb[4].mxu0 }
 0x5f2   : > { %v2841_v9 = vpop.f32.mrb[5].mxu0 }
 0x5f3   : > { %v1314_v10 = vpop.f32.mrb[6].mxu0 }
 0x5f4   : > { %v2842_v11 = vpop.f32.mrb[7].mxu0 }
 0x61b   : > { %v1246_v13 = vpop.xlane.xlu1 %1245 }
 0x61f   : > { %v1249_v12 = vpop.xlane.xlu0 %1248 }
 0x623   : > { %v1252_v14 = vpop.xlane.xlu0 %1251 }
 0x627   : > { %v1255_v17 = vpop.xlane.xlu0 %1254 }
 0x62b   : > { %v1258_v16 = vpop.xlane.xlu1 %1257 }
 0x62f   : > { %v1240_v18 = vpop.xlane.xlu1 %1239 }
 0x630   : > { %3205 = vrcp.f32 %v1240_v18  ;;  %v3107_v18 = vld [vmem:[#allocation21 + $0x4] ss:$16 sps:$4 sm:$0xff]  }
 0x631   : > { %1851 = vmatprep.subr.bf16.mxu1 %v3107_v18  ;;  %v3155_v18 = vld [vmem:[#allocation24] sm:$0xff]  }
 0x63a   : > { %v3206_v21 = vpop.eup %3205 }
 0x63b   : > { %v1450_v23 = vmul.f32 %v3206_v21, %v1311_v8  ;;  %v3116_v21 = vld [vmem:[#allocation21 + $0x2c] ss:$16 sps:$4 sm:$0xff]  }
 0x65a   : > { %v1261_v19 = vpop.xlane.xlu0 %1260 }
 0x65e   : > { %v1243_v20 = vpop.xlane.xlu0 %1242 }
 0x65f   : > { %3207 = vrcp.f32 %v1243_v20  ;;  %v3113_v20 = vld [vmem:[#allocation21 + $0x24] ss:$16 sps:$4 sm:$0xff]  }
 0x660   : > { %3209 = vrcp.f32 %v1252_v14  ;;  %v3242_v14 = vld [vmem:[%s4178_s25 + $0x8] sm:$0xff] }
 0x661   : > { %3211 = vrcp.f32 %v1255_v17  ;;  %v3105_v17 = vld [vmem:[#allocation21] ss:$16 sps:$4 sm:$0xff]  }
 0x662   : > { %3213 = vrcp.f32 %v1246_v13  ;;  %1852 = vmatpush1.bf16.msra.mxu1 %v3105_v17  ;;  %v3154_v17 = vld [vmem:[#allocation24 + $0xc0] sm:$0xff]  }
 0x663   : > { %3215 = vrcp.f32 %v1249_v12  ;;  %1853 = vmatprep.subr.bf16.mxu1 %v3113_v20  ;;  %v3158_v20 = vld [vmem:[#allocation24 + $0xc8] sm:$0xff]  }
 0x664   : > { %3217 = vrcp.f32 %v1258_v16 }
 0x665   : > { %3219 = vrcp.f32 %v1261_v19  ;;  %v3110_v19 = vld [vmem:[#allocation21 + $0xc] ss:$16 sps:$4 sm:$0xff]  }
 0x666   : > { %1894 = vmatprep.subr.bf16.mxu0 %v3110_v19  ;;  %v3157_v19 = vld [vmem:[#allocation24 + $0x48] sm:$0xff]  }
 0x669   : > { %v3208_v22 = vpop.eup %3207 }
 0x66a   : > { %v1451_v24 = vmul.f32 %v3208_v22, %v1314_v10  ;;  %v3210_v29 = vpop.eup %3209  ;;  %v3241_v10 = vld [vmem:[%s4178_s25] sm:$0xff]  ;;  %s4422_s25 = scalar_lea.hbm %s4531_s16, %s2714_s14 }
 0x66b   : > { %v3212_v32 = vpop.eup %3211  ;;  %v3111_v22 = vld [vmem:[#allocation21 + $0x20] ss:$16 sps:$4 sm:$0xff]  }
 0x66c   : > { %v1399_v26 = vpop.f32.mrb[8].mxu0  ;;  %v1458_v27 = vpack.c.bf16 %v1451_v24, %v1450_v23  ;;  %v3214_v39 = vpop.eup %3213  ;;  %v3114_v23 = vld [vmem:[#allocation21 + $0x28] ss:$16 sps:$4 sm:$0xff]   ;;  %1854 = vmatpush1.bf16.msra.mxu1 %v3111_v22  ;;  %v3160_v22 = vld [vmem:[#allocation24 + $0x88] sm:$0xff]  }
 0x66d   : > { %v2853_v31 = vpop.f32.mrb[9].mxu0  ;;  %v1454_v34 = vmul.f32 %v3210_v29, %v1399_v26  ;;  %v3216_v41 = vpop.eup %3215 }
 0x66e   : > { %v1402_v33 = vpop.f32.mrb[10].mxu0  ;;  %1459 = vst.msk [vmem:[#allocation5] sm:$0xff] %vm926_vm1, %v1458_v27  ;;  %v3218_v53 = vpop.eup %3217 }
 0x66f   : > { %v1455_v35 = vmul.f32 %v3212_v32, %v1402_v33  ;;  %v2854_v36 = vpop.f32.mrb[11].mxu0  ;;  %v3220_v59 = vpop.eup %3219  ;;  %v3119_v33 = vld [vmem:[#allocation21 + $0x44] ss:$16 sps:$4 sm:$0xff]  }
 0x670   : > { %v1355_v37 = vpop.f32.mrb[20].mxu1  ;;  %v3120_v36 = vld [vmem:[#allocation21 + $0x48] ss:$16 sps:$4 sm:$0xff]   ;;  %1855 = vmatprep.subr.bf16.mxu1 %v3119_v33 }
 0x671   : > { %v1467_v40 = vpack.c.bf16 %v1455_v35, %v1454_v34  ;;  %v2847_v15 = vpop.f32.mrb[21].mxu1  ;;  %v1452_v43 = vmul.f32 %v3214_v39, %v1355_v37  ;;  %v3122_v34 = vld [vmem:[#allocation21 + $0x4c] ss:$16 sps:$4 sm:$0xff]   ;;  %v3117_v35 = vld [vmem:[#allocation21 + $0x40] ss:$16 sps:$4 sm:$0xff]   ;;  %v3170_v33 = vld [vmem:[#allocation24 + $0xe0] sm:$0xff]  }
 0x672   : > { %v1358_v42 = vpop.f32.mrb[22].mxu1  ;;  %1856 = vmatpush1.bf16.msra.mxu1 %v3117_v35  ;;  %v3125_v37 = vld [vmem:[#allocation21 + $0x64] ss:$16 sps:$4 sm:$0xff]   ;;  %v3123_v39 = vld [vmem:[#allocation21 + $0x60] ss:$16 sps:$4 sm:$0xff]  }
 0x673   : > { %v1453_v44 = vmul.f32 %v3216_v41, %v1358_v42  ;;  %1469 = vrot.lane.b32.xlu0 %v1467_v40, %s3727_s30  ;;  %v2848_v45 = vpop.f32.mrb[23].mxu1  ;;  %v3126_v40 = vld [vmem:[#allocation21 + $0x68] ss:$16 sps:$4 sm:$0xff]   ;;  %1857 = vmatprep.subr.bf16.mxu1 %v3125_v37  ;;  %v3131_v15 = vld [vmem:[#allocation21 + $0x84] ss:$16 sps:$4 sm:$0xff]   ;;  %v3174_v37 = vld [vmem:[#allocation24 + $0xe8] sm:$0xff]  }
 0x674   : > { %v3134_v41 = vld [vmem:[#allocation21 + $0x8c] ss:$16 sps:$4 sm:$0xff]   ;;  %v3129_v42 = vld [vmem:[#allocation21 + $0x80] ss:$16 sps:$4 sm:$0xff]   ;;  %v3172_v35 = vld [vmem:[#allocation24 + $0xa0] sm:$0xff]  }
 0x675   : > { %v1460_v47 = vpack.c.bf16 %v1453_v44, %v1452_v43  ;;  %v3132_v43 = vld [vmem:[#allocation21 + $0x88] ss:$16 sps:$4 sm:$0xff]   ;;  %v3137_v44 = vld [vmem:[#allocation21 + $0xa4] ss:$16 sps:$4 sm:$0xff]   ;;  %v3140_v45 = vld [vmem:[#allocation21 + $0xac] ss:$16 sps:$4 sm:$0xff]  }
 0x676   : > { %1858 = vmatpush1.bf16.msra.mxu1 %v3123_v39  ;;  %v3176_v39 = vld [vmem:[#allocation24 + $0xa8] sm:$0xff]  }
 0x677   : > { %1462 = vrot.lane.b32.xlu1 %v1460_v47, %s3726_s3  ;;  %1859 = vmatprep.subr.bf16.mxu1 %v3131_v15  ;;  %v3138_v47 = vld [vmem:[#allocation21 + $0xa8] ss:$16 sps:$4 sm:$0xff]   ;;  %s3613_s3 = sshll.u32 %s3729_s15, 4  ;;  %s3614_s3 = int_to_ptr.vmem [resolvable:$false] %s3613_s3 }
 0x678   : > { %v3178_v15 = vld [vmem:[#allocation24 + $0xf0] sm:$0xff]   ;;  %s3615_s30 = scalar_lea.vmem %s3614_s3, 512  ;;  %p3616_p12 = scmp.lt.s32.totalorder %s4424_s19, %s3614_s3 }
 0x67a   : > { %1860 = vmatpush1.bf16.msra.mxu1 %v3129_v42  ;;  %v3180_v42 = vld [vmem:[#allocation24 + $0xb0] sm:$0xff]  }
 0x67b   : > { %1861 = vmatprep.subr.bf16.mxu1 %v3137_v44  ;;  %v3182_v44 = vld [vmem:[#allocation24 + $0xf8] sm:$0xff]  }
 0x67e   : > { %1862 = vmatpush1.bf16.msra.mxu1 %v3135_v46  ;;  %v3184_v46 = vld [vmem:[#allocation24 + $0xb8] sm:$0xff]  }
 0x67f   : > { %1863 = vmatprep.subr.bf16.mxu1 %v3143_v48  ;;  %v1685_v48 = vsub.s32 3, %v4238_v54 }
 0x682   : > { %1864 = vmatpush1.bf16.msra.mxu1 %v3141_v50 }
 0x6a1   : > { %v1443_v52 = vpop.f32.mrb[24].mxu1 }
 0x6a2   : > { %v2859_v56 = vpop.f32.mrb[25].mxu1  ;;  %v1456_v61 = vmul.f32 %v3218_v53, %v1443_v52  ;;  %v3149_v52 = vld [vmem:[#allocation21 + $0xe4] ss:$16 sps:$4 sm:$0xff]   ;;  %v3147_v53 = vld [vmem:[#allocation21 + $0xe0] ss:$16 sps:$4 sm:$0xff]  }
 0x6a3   : > { %v1446_v60 = vpop.f32.mrb[26].mxu1  ;;  %v3150_v56 = vld [vmem:[#allocation21 + $0xe8] ss:$16 sps:$4 sm:$0xff]   ;;  %1865 = vmatprep.subr.bf16.mxu1 %v3149_v52 }
 0x6a4   : > { %v1457_v62 = vmul.f32 %v3220_v59, %v1446_v60  ;;  %v2860_v63 = vpop.f32.mrb[27].mxu1  ;;  %v3152_v59 = vld [vmem:[#allocation21 + $0xec] ss:$16 sps:$4 sm:$0xff]   ;;  %1866 = vmatpush1.bf16.msra.mxu1 %v3147_v53 }
 0x6a6   : > { %v1474_v0 = vpack.c.bf16 %v1457_v62, %v1456_v61 }
 0x6a8   : > { %1476 = vrot.lane.b32.xlu1 %v1474_v0, %s3725_s1  ;;  %s3609_s1 = scalar_lea.vmem %s4424_s19, 256 }
 0x6a9   : > { %p3610_p2 = scmp.ne.s32.totalorder %s4424_s19, %s3609_s1  ;;  %p3617_p0 = scmp.lt.s32.totalorder %s3615_s30, %s3609_s1 }
 0x6ab   : > { %p3611_p10 = pnand %p3610_p2, %p4532_p8  ;;  %p3618_p5 = por %p3617_p0, %p3616_p12 }
 0x6ad   : > { %p3612_p11 = pneg %p3611_p10 }
 0x6af   : > { %p3619_p7 = pnand %p3618_p5, %p3612_p11 }
 0x6e5   : > { %v1470_v2 = vpop.permute.xlu0 %1469 }
 0x6e9   : > { %v1463_v1 = vpop.permute.xlu1 %1462 }
 0x6ea   : > { %1466 = vst.msk [vmem:[#allocation5] sm:$0xff] %vm1465_vm5, %v1463_v1 }
 0x6eb   : > { %1473 = vst.msk [vmem:[#allocation5] sm:$0xff] %vm1472_vm6, %v1470_v2 }
 0x71a   : > { %v1477_v4 = vpop.permute.xlu1 %1476 }
 0x71b   : > { %1480 = vst.msk [vmem:[#allocation5] sm:$0xff] %vm1479_vm7, %v1477_v4  ;;  %v2641_v4 = vld [vmem:[#allocation18] ss:$0 sm:$0xff] }
 0x722   : > { %v1481_v3 = vld [vmem:[#allocation5] sm:$0xff] }
 0x723   : > { %2878 = vmatmul.mubr.bf16.vlgmr.msra.gmra.mrb[12].mxu0 %v1481_v3 }
 0x724   : > { %1926 = vmatprep.mubr.bf16.mxu0 %v3723_v30  ;;  %v3108_v30 = vld [vmem:[#allocation21 + $0x8] ss:$16 sps:$4 sm:$0xff]  }
 0x725   : > { %1895 = vmatpush1.bf16.msra.mxu0 %v3108_v30  ;;  %v3156_v30 = vld [vmem:[#allocation24 + $0x80] sm:$0xff]  }
 0x726   : > { %1896 = vmatprep.subr.bf16.mxu0 %v3116_v21  ;;  %v3159_v21 = vld [vmem:[#allocation24 + $0x8] sm:$0xff]  }
 0x729   : > { %1897 = vmatpush1.bf16.msra.mxu0 %v3114_v23  ;;  %v3161_v23 = vld [vmem:[#allocation24 + $0x50] sm:$0xff]  }
 0x72a   : > { %1898 = vmatprep.subr.bf16.mxu0 %v3122_v34  ;;  %v3171_v34 = vld [vmem:[#allocation24 + $0x20] sm:$0xff]  }
 0x72d   : > { %1899 = vmatpush1.bf16.msra.mxu0 %v3120_v36  ;;  %v3173_v36 = vld [vmem:[#allocation24 + $0x68] sm:$0xff]  }
 0x72e   : > { %1900 = vmatprep.subr.bf16.mxu0 %v3128_v38  ;;  %v3175_v38 = vld [vmem:[#allocation24 + $0x28] sm:$0xff]  }
 0x731   : > { %1901 = vmatpush1.bf16.msra.mxu0 %v3126_v40  ;;  %v3177_v40 = vld [vmem:[#allocation24 + $0x70] sm:$0xff]  }
 0x732   : > { %1902 = vmatprep.subr.bf16.mxu0 %v3134_v41  ;;  %v3179_v41 = vld [vmem:[#allocation24 + $0x30] sm:$0xff]  }
 0x735   : > { %1903 = vmatpush1.bf16.msra.mxu0 %v3132_v43  ;;  %v3181_v43 = vld [vmem:[#allocation24 + $0x78] sm:$0xff]  }
 0x736   : > { %1904 = vmatprep.subr.bf16.mxu0 %v3140_v45  ;;  %v3183_v45 = vld [vmem:[#allocation24 + $0x38] sm:$0xff]  }
 0x739   : > { %1905 = vmatpush1.bf16.msra.mxu0 %v3138_v47  ;;  %v1669_v47 = vld [vmem:[#allocation23] sm:$0xf] }
 0x73a   : > { %1906 = vmatprep.subr.bf16.mxu0 %v3146_v49  ;;  %v1674_v49 = vrot.slane %v1669_v47, %v698_v55  ;;  %v1682_v50 = vrot.slane %v1669_v47, %v706_v57  ;;  %v1686_v52 = vrot.slane %v1669_v47, %v1685_v48 }
 0x73d   : > { %1907 = vmatpush1.bf16.msra.mxu0 %v3144_v51  ;;  %v1678_v51 = vrot.slane %v1669_v47, %v702_v58 }
 0x73e   : > { %1908 = vmatprep.subr.bf16.mxu0 %v3152_v59 }
 0x741   : > { %1909 = vmatpush1.bf16.msra.mxu0 %v3150_v56 }
 0x742   : > { %2771 = vmatprep.subr.bf16.mxu0 %v3154_v17 }
 0x7f6   : > { %v1587_v6 = vpop.f32.mrb[12].mxu0 }
 0x7f7   : > { %v1588_v7 = vadd.f32 %v2632_v5, %v1587_v6  ;;  %v2879_v8 = vpop.f32.mrb[13].mxu0 }
 0x7f8   : > { %v1590_v9 = vpop.f32.mrb[14].mxu0  ;;  %v2642_v8 = vld [vmem:[#allocation20] ss:$0 sm:$0xff] }
 0x7f9   : > { %v4346_v11 = vadd.f32 %v3241_v10, %v1588_v7  ;;  %v1591_v12 = vadd.f32 %v2632_v5, %v1590_v9  ;;  %v2880_v13 = vpop.f32.mrb[15].mxu0 }
 0x7fb   : > { %v4349_v16 = vadd.f32 %v3242_v14, %v1591_v12  ;;  %1598 = vadd.xlane.f32.xlu1 %v4346_v11  ;;  %v3153_v14 = vld [vmem:[#allocation24 + $0x40] sm:$0xff]  }
 0x7fc   : > { %2749 = vmatprep.subr.bf16.mxu1 %v3153_v14 }
 0x7fd   : > { %1600 = vadd.xlane.f32.xlu0 %v4349_v16 }
 0x888   : > { %v1599_v24 = vpop.xlane.xlu1 %1598 }
 0x889   : > { %v1602_v25 = vmul.f32 0.0078125, %v1599_v24  ;;  %v3162_v24 = vld [vmem:[#allocation24 + $0xd0] sm:$0xff]  }
 0x88a   : > { %v1601_v26 = vpop.xlane.xlu0 %1600 }
 0x88b   : > { %v4354_v27 = vsub.f32 %v4346_v11, %v1602_v25  ;;  %v1603_v28 = vmul.f32 0.0078125, %v1601_v26  ;;  %v3163_v25 = vld [vmem:[#allocation24 + $0x10] sm:$0xff]  }
 0x88c   : > { %v3164_v26 = vld [vmem:[#allocation24 + $0x90] sm:$0xff]  }
 0x88d   : > { %v4357_v29 = vsub.f32 %v4349_v16, %v1603_v28  ;;  %v1606_v31 = vmul.f32 %v4354_v27, %v4354_v27  ;;  %v3166_v28 = vld [vmem:[#allocation24 + $0xd8] sm:$0xff]  }
 0x88f   : > { %1608 = vadd.xlane.f32.xlu0 %v1606_v31  ;;  %v1607_v32 = vmul.f32 %v4357_v29, %v4357_v29  ;;  %v3168_v31 = vld [vmem:[#allocation24 + $0x98] sm:$0xff]  }
 0x891   : > { %1610 = vadd.xlane.f32.xlu1 %v1607_v32  ;;  %v3169_v32 = vld [vmem:[#allocation24 + $0x60] sm:$0xff]  }
 0x91c   : > { %v1609_v60 = vpop.xlane.xlu0 %1608 }
 0x91d   : > { %v1612_v61 = vmul.f32 0.0078125, %v1609_v60 }
 0x91e   : > { %v1611_v62 = vpop.xlane.xlu1 %1610 }
 0x91f   : > { %v1614_v63 = vadd.f32 1e-05, %v1612_v61  ;;  %v1613_v0 = vmul.f32 0.0078125, %v1611_v62 }
 0x921   : > { %3221 = vrsqrt.f32 %v1614_v63  ;;  %v1615_v1 = vadd.f32 1e-05, %v1613_v0 }
 0x923   : > { %3223 = vrsqrt.f32 %v1615_v1 }
 0x92b   : > { %v3222_v2 = vpop.eup %3221 }
 0x92c   : > { %v1618_v3 = vmul.f32 %v3222_v2, %v4354_v27  ;;  %v3165_v27 = vld [vmem:[#allocation24 + $0x58] sm:$0xff]  }
 0x92d   : > { %v3224_v5 = vpop.eup %3223 }
 0x92e   : > { %v1619_v6 = vmul.f32 %v3224_v5, %v4357_v29  ;;  %v1626_v7 = vmul.f32 %v2641_v4, %v1618_v3  ;;  %v3167_v29 = vld [vmem:[#allocation24 + $0x18] sm:$0xff]  }
 0x930   : > { %v1627_v9 = vmul.f32 %v2641_v4, %v1619_v6  ;;  %v1634_v10 = vadd.f32 %v2642_v8, %v1626_v7 }
 0x932   : > { %v1635_v12 = vadd.f32 %v2642_v8, %v1627_v9 }
 0x934   : > { %v1636_v13 = vpack.c.bf16 %v1635_v12, %v1634_v10 }
 0x936   : > { %1884 = vmatmul.mubr.bf16.vlgmr.msra.gmra.mrb[28].mxu1 %v1636_v13  ;;  %1927 = vmatmul.mubr.bf16.vlgmr.msra.gmra.mrb[16].mxu0 %v1636_v13 }
 0x937   : > { %2750 = vmatpush3.bf16.msra.mxu1 %v3155_v18  ;;  %2772 = vmatpush3.bf16.msra.mxu0 %v3156_v30 }
 0x938   : > { %2751 = vmatprep.subr.bf16.mxu1 %v3157_v19  ;;  %2773 = vmatprep.subr.bf16.mxu0 %v3158_v20 }
 0x93b   : > { %2752 = vmatpush3.bf16.msra.mxu1 %v3159_v21  ;;  %2774 = vmatpush3.bf16.msra.mxu0 %v3160_v22 }
 0x93c   : > { %2753 = vmatprep.subr.bf16.mxu1 %v3161_v23  ;;  %2775 = vmatprep.subr.bf16.mxu0 %v3162_v24 }
 0x93f   : > { %2754 = vmatpush3.bf16.msra.mxu1 %v3163_v25  ;;  %2776 = vmatpush3.bf16.msra.mxu0 %v3164_v26 }
 0x940   : > { %2755 = vmatprep.subr.bf16.mxu1 %v3165_v27  ;;  %2777 = vmatprep.subr.bf16.mxu0 %v3166_v28 }
 0x943   : > { %2756 = vmatpush3.bf16.msra.mxu1 %v3167_v29  ;;  %2778 = vmatpush3.bf16.msra.mxu0 %v3168_v31 }
 0x944   : > { %2757 = vmatprep.subr.bf16.mxu1 %v3169_v32  ;;  %2779 = vmatprep.subr.bf16.mxu0 %v3170_v33 }
 0x947   : > { %2758 = vmatpush3.bf16.msra.mxu1 %v3171_v34  ;;  %2780 = vmatpush3.bf16.msra.mxu0 %v3172_v35 }
 0x948   : > { %2759 = vmatprep.subr.bf16.mxu1 %v3173_v36  ;;  %2781 = vmatprep.subr.bf16.mxu0 %v3174_v37 }
 0x94b   : > { %2760 = vmatpush3.bf16.msra.mxu1 %v3175_v38  ;;  %2782 = vmatpush3.bf16.msra.mxu0 %v3176_v39 }
 0x94c   : > { %2761 = vmatprep.subr.bf16.mxu1 %v3177_v40  ;;  %2783 = vmatprep.subr.bf16.mxu0 %v3178_v15 }
 0x94f   : > { %2762 = vmatpush3.bf16.msra.mxu1 %v3179_v41  ;;  %2784 = vmatpush3.bf16.msra.mxu0 %v3180_v42 }
 0x950   : > { %2763 = vmatprep.subr.bf16.mxu1 %v3181_v43  ;;  %2785 = vmatprep.subr.bf16.mxu0 %v3182_v44 }
 0x953   : > { %2764 = vmatpush3.bf16.msra.mxu1 %v3183_v45  ;;  %2786 = vmatpush3.bf16.msra.mxu0 %v3184_v46 }
 0xa09   : > { %v1885_v53 = vpop.f32.mrb[28].mxu1  ;;  %v1928_v56 = vpop.f32.mrb[16].mxu0 }
 0xa0a   : > { %v4372_v59 = vadd.f32 %v1885_v53, %v1674_v49  ;;  %v4374_v60 = vadd.f32 %v1928_v56, %v1682_v50  ;;  %v1887_v61 = vpop.f32.mrb[29].mxu1  ;;  %v1930_v62 = vpop.f32.mrb[17].mxu0 }
 0xa0b   : > { %v4376_v63 = vadd.f32 %v1887_v61, %v1678_v51  ;;  %v4378_v0 = vadd.f32 %v1930_v62, %v1686_v52  ;;  %v1889_v55 = vpop.f32.mrb[30].mxu1  ;;  %v1932_v1 = vpop.f32.mrb[18].mxu0 }
 0xa0c   : > { %v1945_v57 = vmul.f32 0.044715, %v4372_v59  ;;  %v1947_v54 = vmul.f32 0.044715, %v4374_v60  ;;  %v1890_v58 = vadd.f32 %v1889_v55, %v1674_v49  ;;  %v1933_v2 = vadd.f32 %v1932_v1, %v1682_v50  ;;  %v1891_v4 = vpop.f32.mrb[31].mxu1  ;;  %v1934_v3 = vpop.f32.mrb[19].mxu0 }
 0xa0d   : > { %v1946_v5 = vmul.f32 0.044715, %v4376_v63  ;;  %v1948_v6 = vmul.f32 0.044715, %v4378_v0  ;;  %v4384_v7 = vadd.f32 %v1891_v4, %v1678_v51  ;;  %v4386_v8 = vadd.f32 %v1934_v3, %v1686_v52 }
 0xa0e   : > { %v1953_v9 = vmul.f32 %v1945_v57, %v4372_v59  ;;  %v1955_v10 = vmul.f32 %v1947_v54, %v4374_v60  ;;  %v1949_v12 = vmul.f32 0.044715, %v1890_v58  ;;  %v1951_v13 = vmul.f32 0.044715, %v1933_v2 }
 0xa0f   : > { %v1954_v14 = vmul.f32 %v1946_v5, %v4376_v63  ;;  %v1956_v17 = vmul.f32 %v1948_v6, %v4378_v0  ;;  %v1950_v18 = vmul.f32 0.044715, %v4384_v7  ;;  %v1952_v30 = vmul.f32 0.044715, %v4386_v8 }
 0xa10   : > { %v1961_v19 = vmul.f32 %v1953_v9, %v4372_v59  ;;  %v1963_v20 = vmul.f32 %v1955_v10, %v4374_v60  ;;  %v1957_v21 = vmul.f32 %v1949_v12, %v1890_v58  ;;  %v1959_v22 = vmul.f32 %v1951_v13, %v1933_v2 }
 0xa11   : > { %v1962_v23 = vmul.f32 %v1954_v14, %v4376_v63  ;;  %v1964_v24 = vmul.f32 %v1956_v17, %v4378_v0  ;;  %v1958_v25 = vmul.f32 %v1950_v18, %v4384_v7  ;;  %v1960_v26 = vmul.f32 %v1952_v30, %v4386_v8 }
 0xa12   : > { %v1969_v27 = vadd.f32 %v1961_v19, %v4372_v59  ;;  %v1971_v28 = vadd.f32 %v1963_v20, %v4374_v60  ;;  %v1965_v29 = vmul.f32 %v1957_v21, %v1890_v58  ;;  %v1967_v31 = vmul.f32 %v1959_v22, %v1933_v2 }
 0xa13   : > { %v1966_v32 = vmul.f32 %v1958_v25, %v4384_v7  ;;  %v1968_v33 = vmul.f32 %v1960_v26, %v4386_v8  ;;  %v1970_v38 = vadd.f32 %v1962_v23, %v4376_v63  ;;  %v1972_v41 = vadd.f32 %v1964_v24, %v4378_v0 }
 0xa14   : > { %v1977_v34 = vmul.f32 0.7978846, %v1969_v27  ;;  %v1979_v35 = vmul.f32 0.7978846, %v1971_v28  ;;  %v1973_v36 = vadd.f32 %v1965_v29, %v1890_v58  ;;  %v1975_v37 = vadd.f32 %v1967_v31, %v1933_v2 }
 0xa15   : > { %v1974_v39 = vadd.f32 %v1966_v32, %v4384_v7  ;;  %v1978_v42 = vmul.f32 0.7978846, %v1970_v38  ;;  %v1976_v44 = vadd.f32 %v1968_v33, %v4386_v8  ;;  %v1980_v45 = vmul.f32 0.7978846, %v1972_v41 }
 0xa16   : > { %3225 = vtanh.f32 %v1977_v34  ;;  %v1981_v40 = vmul.f32 0.7978846, %v1973_v36  ;;  %v1983_v15 = vmul.f32 0.7978846, %v1975_v37  ;;  %v1937_v53 = vmul.f32 0.5, %v4372_v59 }
 0xa17   : > { %3227 = vtanh.f32 %v1979_v35  ;;  %v1982_v43 = vmul.f32 0.7978846, %v1974_v39  ;;  %v1984_v46 = vmul.f32 0.7978846, %v1976_v44  ;;  %v1941_v56 = vmul.f32 0.5, %v1890_v58 }
 0xa18   : > { %3229 = vtanh.f32 %v1981_v40  ;;  %v1939_v55 = vmul.f32 0.5, %v4374_v60  ;;  %v1943_v1 = vmul.f32 0.5, %v1933_v2  ;;  %v1938_v4 = vmul.f32 0.5, %v4376_v63  ;;  %v2707_v35 = vld [vmem:[#allocation26] ss:$0 sm:$0xff] }
 0xa19   : > { %3231 = vtanh.f32 %v1983_v15  ;;  %v1942_v10 = vmul.f32 0.5, %v4384_v7  ;;  %v1940_v58 = vmul.f32 0.5, %v4378_v0  ;;  %v1944_v17 = vmul.f32 0.5, %v4386_v8 }
 0xa1a   : > { %3233 = vtanh.f32 %v1978_v42 }
 0xa1b   : > { %3235 = vtanh.f32 %v1982_v43 }
 0xa1c   : > { %3237 = vtanh.f32 %v1980_v45 }
 0xa1d   : > { %3239 = vtanh.f32 %v1984_v46 }
 0xa20   : > { %v3226_v47 = vpop.eup %3225 }
 0xa21   : > { %v3228_v48 = vpop.eup %3227  ;;  %v1993_v49 = vadd.f32 1.0, %v3226_v47 }
 0xa22   : > { %v3230_v50 = vpop.eup %3229  ;;  %v1995_v51 = vadd.f32 1.0, %v3228_v48 }
 0xa23   : > { %v3232_v52 = vpop.eup %3231  ;;  %v1997_v61 = vadd.f32 1.0, %v3230_v50  ;;  %v2001_v5 = vmul.f32 %v1993_v49, %v1937_v53 }
 0xa24   : > { %v3234_v62 = vpop.eup %3233  ;;  %v1999_v57 = vadd.f32 1.0, %v3232_v52  ;;  %v2003_v13 = vmul.f32 %v1995_v51, %v1939_v55 }
 0xa25   : > { %v3236_v54 = vpop.eup %3235  ;;  %v1994_v3 = vadd.f32 1.0, %v3234_v62  ;;  %v2005_v6 = vmul.f32 %v1997_v61, %v1941_v56 }
 0xa26   : > { %v3238_v9 = vpop.eup %3237  ;;  %v1998_v12 = vadd.f32 1.0, %v3236_v54  ;;  %v2007_v14 = vmul.f32 %v1999_v57, %v1943_v1 }
 0xa27   : > { %v3240_v59 = vpop.eup %3239  ;;  %v1996_v60 = vadd.f32 1.0, %v3238_v9  ;;  %v2009_v2 = vpack.c.bf16 %v2005_v6, %v2001_v5  ;;  %v2002_v18 = vmul.f32 %v1994_v3, %v1938_v4 }
 0xa28   : > { %v2006_v30 = vmul.f32 %v1998_v12, %v1942_v10  ;;  %v2000_v19 = vadd.f32 1.0, %v3240_v59  ;;  %v2011_v63 = vpack.c.bf16 %v2007_v14, %v2003_v13 }
 0xa29   : > { %v2004_v21 = vmul.f32 %v1996_v60, %v1940_v58 }
 0xa2a   : > { %v2010_v20 = vpack.c.bf16 %v2006_v30, %v2002_v18  ;;  %v2008_v22 = vmul.f32 %v2000_v19, %v1944_v17 }
 0xa2c   : > { %2301 = vmatprep.mubr.bf16.mxu1 %v2010_v20  ;;  %v2012_v23 = vpack.c.bf16 %v2008_v22, %v2004_v21 }
 0xa2d   : > { %2302 = vmatmul.mubr.bf16.vlgmr.msra.gmra.mrb[32].mxu1 %v2009_v2 }
 0xa2e   : > { %2342 = vmatprep.mubr.bf16.mxu0 %v2012_v23 }
 0xa2f   : > { %2343 = vmatmul.mubr.bf16.vlgmr.msra.gmra.mrb[20].mxu0 %v2011_v63 }
 0xb00   : > { %v2765_v7 = vpop.f32.mrb[32].mxu1 }
 0xb01   : > { %v2766_v24 = vpop.f32.mrb[33].mxu1 }
 0xb02   : > { %v2787_v0 = vpop.f32.mrb[20].mxu0  ;;  %v2767_v8 = vadd.f32 %v2766_v24, %v2765_v7  ;;  %v2768_v25 = vpop.f32.mrb[34].mxu1 }
 0xb03   : > { %v2788_v26 = vpop.f32.mrb[21].mxu0  ;;  %v2769_v27 = vpop.f32.mrb[35].mxu1 }
 0xb04   : > { %v2789_v28 = vadd.f32 %v2788_v26, %v2787_v0  ;;  %v2790_v29 = vpop.f32.mrb[22].mxu0  ;;  %v2770_v31 = vadd.f32 %v2769_v27, %v2768_v25 }
 0xb05   : > { %v2791_v32 = vpop.f32.mrb[23].mxu0 }
 0xb06   : > { %v2345_v33 = vadd.f32 %v2789_v28, %v2767_v8  ;;  %v2792_v34 = vadd.f32 %v2791_v32, %v2790_v29 }
 0xb08   : > { %v2351_v36 = vadd.f32 %v2345_v33, %v4346_v11  ;;  %v2348_v37 = vadd.f32 %v2792_v34, %v2770_v31 }
 0xb0a   : > { %v2360_v38 = vadd.f32 %v2707_v35, %v2351_v36  ;;  %v2352_v39 = vadd.f32 %v2348_v37, %v4349_v16 }
 0xb0c   : > { %2362 = vst [vmem:[%s616_s13] sm:$0xff] %v2360_v38  ;;  %v2361_v11 = vadd.f32 %v2707_v35, %v2352_v39 }
 0xb0e   : > { %2363 = vst [vmem:[%s616_s13 + $0x8] sm:$0xff] %v2361_v11 }
 0xb0f   : > { %3622 = shalt.err (!%p3619_p7)
}
 0xb10   : > { %s3623_s13 = scalar_lea.hbm %s4422_s25, 256  ;;  %s3627_s17 = scalar_lea.hbm %s4531_s16, 512 }
 0xb11   : > { %p3624_p6 = scmp.ne.s32.totalorder %s4422_s25, %s3623_s13  ;;  %p3628_p13 = scmp.lt.u32.totalorder %s4422_s25, %s4531_s16 }
 0xb12   : > { %p3629_p1 = scmp.lt.u32.totalorder %s3627_s17, %s3623_s13  ;;  %p3631_p2 = scmp.lt.u32.totalorder %s3623_s13, %s4422_s25 }
 0xb13   : > { %p3625_p9 = pnand %p3624_p6, %p4532_p8 }
 0xb14   : > { %p3630_p3 = por %p3629_p1, %p3628_p13 }
 0xb15   : > { %p3626_p4 = pneg %p3625_p9 }
 0xb16   : > { %p3632_p10 = por %p3631_p2, %p3630_p3 }
 0xb18   : > { %p3633_p11 = pnand %p3632_p10, %p3626_p4 }
 0xb1a   : > { %3636 = shalt.err (!%p3633_p11)
}
 0xb1b   : > { %s3730_s1 = smov 128   ;;  %s3731_s30 = smov 8  }
 0xb1c   : > { %2931 = dma.vmem_to_hbm [thread:$0]  (%p4532_p8), %s4424_s19, 256, %s4422_s25, %s2365_s21, %s3730_s1, %s3730_s1, %s3731_s30  }
 0xb1d PF: > { %s4533_s14 = sld [smem:[#allocation36_spill]]  ;;  %p4534_p12 = scmp.ne.s32.totalorder %s4513_s23, 0 }
 0xb1e   : > { %p4535_p0 = scmp.ge.s32.totalorder %s3699_s28, 2 }
 0xb20   : > { %p2975_p5 = pnand %p4535_p0, %p4534_p12 }
 0xb23   : > { %s2393_s20 = sand.u32 1, %s4533_s14  }
 0xb24   : > { %s2394_s13 = scalar_lea.sflag [#allocation8], %s2393_s20 }
 0xb25   : > { %3682 = dma.done.wait (!%p2975_p5), %s2394_s13, 256  }
 0xb26   : > { %3684 = vsyncadd (!%p2975_p5), %s2394_s13, 4294967040  ;;  %p32_p7 = scmp.ge.s32.totalorder %s4093_s18, 4   ;;  %s4536_s25 = smov %s3691_s26 }
 0xb27   : > { %s4537_s26 = smov %s3695_s27  ;;  %s4538_s27 = smov %s4104_s29 }
 0xb28   : > { %s4539_s28 = smov %s4093_s18  ;;  %34 = sbr.rel (!%p32_p7) target bundleno = 16 (0x10), region = 174 }
 0xb2f   :  { %2399 = vsyncpa [#allocation7], 1 }
 0xb30   :  { %2401 = vsyncpa [#allocation7 + $0x1], 1 }
 0xb31   :  { %2402 = vsyncpa [#allocation10], 1 }
 0xb32   :  { %2403 = vsyncpa [#allocation13], 1 }
 0xb33   :  { %2404 = vsyncpa [#allocation16], 1 }
 0xb34   :  { %2405 = vsyncpa [#allocation19], 1 }
 0xb35   :  { %2406 = vsyncpa [#allocation22], 1 }
 0xb36   :  { %2407 = vsyncpa [#allocation25], 1 }
 0xb37   :  { %2408 = vsyncpa [#allocation8], 1 }
 0xb38   :  { %2410 = vsyncpa [#allocation8 + $0x1], 1 }

</bundles_post_ra>
